<compile_context>
chip_gen: v7x
topology: tpu7x:2x2x1
jax: 0.10.0
libtpu: 0.0.40
codegen_flags: <defaults>
</compile_context>

<pallas_src>
import jax
import jax.numpy as jnp
from jax.experimental import pallas as pl
from jax.experimental.pallas import tpu as pltpu


HIDDEN = 750        # nn.Linear(..., 750) in the reference module
HIDDEN_PAD = 768    # padded to a multiple of 128 for clean MXU tiling


def _round_up(x, m):
    return ((x + m - 1) // m) * m


# --------------------------------------------------------------------------
# Kernel
# --------------------------------------------------------------------------
def _vae_kernel(
    x_ref,                                   # (tm, sa_pad + z_pad) f32 packed
    e1w_ref, e1b_ref,
    e2w_ref, e2b_ref,
    headw_ref, headb_ref,
    d1ws_ref, d1wz_ref, d1b_ref,
    d2w_ref, d2b_ref,
    d3w_ref, d3b_ref,
    out_ref,                                 # (tm, a_pad + 2*z_pad) f32 packed
):
    f32 = jnp.float32
    bf16 = jnp.bfloat16

    sa_pad = e1w_ref.shape[0]                # 128-aligned [s | a] block width
    z_pad = d1wz_ref.shape[0]                # 128-aligned z block width
    a_pad = d3w_ref.shape[1]                 # 128-aligned action block width

    # Tile-aligned (free) views of the packed input.
    sa = x_ref[:, :sa_pad].astype(bf16)                  # [s | a | 0...]
    noise = x_ref[:, sa_pad:sa_pad + z_pad]              # [noise | 0...] f32

    # ---------------- encoder ----------------
    h = jnp.dot(sa, e1w_ref[...], preferred_element_type=f32) + e1b_ref[...]
    h = jnp.maximum(h, 0.0).astype(bf16)                 # ReLU fused with bf16 cast

    h = jnp.dot(h, e2w_ref[...], preferred_element_type=f32) + e2b_ref[...]
    h = jnp.maximum(h, 0.0).astype(bf16)

    # Fused mean / log_std head, each in its own 128-lane block.
    head = jnp.dot(h, headw_ref[...], preferred_element_type=f32) + headb_ref[...]
    mean = head[:, :z_pad]
    log_std = jnp.clip(head[:, z_pad:], -4.0, 15.0)
    std = jnp.exp(log_std)
    z = mean + std * noise                               # pad lanes stay 0

    # ---------------- decoder ----------------
    d = (jnp.dot(sa, d1ws_ref[...], preferred_element_type=f32)
         + jnp.dot(z.astype(bf16), d1wz_ref[...], preferred_element_type=f32)
         + d1b_ref[...])
    d = jnp.maximum(d, 0.0).astype(bf16)

    d = jnp.dot(d, d2w_ref[...], preferred_element_type=f32) + d2b_ref[...]
    d = jnp.maximum(d, 0.0).astype(bf16)

    a_out = jnp.tanh(
        jnp.dot(d, d3w_ref[...], preferred_element_type=f32) + d3b_ref[...]
    )

    # Packed, tile-aligned, unmasked stores -> single lane-dense output DMA.
    out_ref[:, :a_pad] = a_out.astype(out_ref.dtype)
    out_ref[:, a_pad:a_pad + z_pad] = mean.astype(out_ref.dtype)
    out_ref[:, a_pad + z_pad:] = std.astype(out_ref.dtype)


# --------------------------------------------------------------------------
# Wrapper
# --------------------------------------------------------------------------
def vae_forward(s, a, noise, kparams, *, batch_tile=512,
                vmem_limit_bytes=48 * 1024 * 1024):
    """Full VAE forward (encoder + reparam + decoder) in one Pallas call."""
    B, s_dim = s.shape
    a_dim = a.shape[1]
    z_dim = noise.shape[1]

    sa_pad = kparams["e1w"].shape[0]
    z_pad = kparams["d1w_z"].shape[0]
    a_pad = kparams["d3w"].shape[1]
    in_w = sa_pad + z_pad
    out_w = a_pad + 2 * z_pad

    # Adaptive batch tile: at most `batch_tile` rows, multiple of 8, and
    # chosen so total dead-row padding is <= 7 rows per tile.
    n_tiles = max(1, -(-B // batch_tile))
    tm = _round_up(-(-B // n_tiles), 8)
    b_pad = n_tiles * tm

    # Pack [s | a | 0..sa_pad | noise | 0..z_pad] into one lane-aligned slab.
    x = jnp.zeros((b_pad, in_w), jnp.float32)
    x = x.at[:B, :s_dim].set(s)
    x = x.at[:B, s_dim:s_dim + a_dim].set(a)
    x = x.at[:B, sa_pad:sa_pad + z_dim].set(noise)

    weights = (
        kparams["e1w"], kparams["e1b"],
        kparams["e2w"], kparams["e2b"],
        kparams["headw"], kparams["headb"],
        kparams["d1w_s"], kparams["d1w_z"], kparams["d1b"],
        kparams["d2w"], kparams["d2b"],
        kparams["d3w"], kparams["d3b"],
    )

    def resident_spec(shape):
        # Full-array block, constant index_map -> DMA'd once, stays in VMEM.
        # TODO(synk): pipeline_mode=pl.Buffered(1) would drop the unused second
        # buffer of these constants (extra v7x headroom); kept default for safety.
        return pl.BlockSpec(shape, lambda i: (0, 0))

    in_specs = [pl.BlockSpec((tm, in_w), lambda i: (i, 0))] + [
        resident_spec(w.shape) for w in weights
    ]
    out_specs = pl.BlockSpec((tm, out_w), lambda i: (i, 0))
    out_shape = jax.ShapeDtypeStruct((b_pad, out_w), jnp.float32)

    weight_bytes = sum(int(w.size) * w.dtype.itemsize for w in weights)
    flops = 2 * b_pad * (
        sa_pad * HIDDEN_PAD            # e1
        + HIDDEN_PAD * HIDDEN_PAD      # e2
        + HIDDEN_PAD * 2 * z_pad       # mean / log_std head
        + sa_pad * HIDDEN_PAD          # d1 (s part)
        + z_pad * HIDDEN_PAD           # d1 (z part)
        + HIDDEN_PAD * HIDDEN_PAD      # d2
        + HIDDEN_PAD * a_pad           # d3
    )
    cost = pl.CostEstimate(
        flops=flops,
        transcendentals=b_pad * (z_pad + a_pad),   # exp + tanh
        bytes_accessed=weight_bytes + 4 * b_pad * (in_w + out_w),
    )

    out = pl.pallas_call(
        _vae_kernel,
        out_shape=out_shape,
        grid=(b_pad // tm,),
        in_specs=in_specs,
        out_specs=out_specs,
        compiler_params=pltpu.CompilerParams(
            dimension_semantics=("parallel",),     # both TCs on v7x
            vmem_limit_bytes=vmem_limit_bytes,     # 48 MiB: safe on v5e/v6e/v7x
        ),
        cost_estimate=cost,
    )(x, *weights)

    a_out = out[:B, :a_dim]
    mean = out[:B, a_pad:a_pad + z_dim]
    std = out[:B, a_pad + z_pad:a_pad + z_pad + z_dim]
    return a_out, mean, std


# --------------------------------------------------------------------------
# Parameter construction (PyTorch nn.Linear-equivalent init, f32 "raw" layout)
# --------------------------------------------------------------------------
def init_linear(key, in_dim, out_dim):
    """PyTorch nn.Linear default init: U(-1/sqrt(in), 1/sqrt(in)).
    Weight already transposed to (in, out), bias as (1, out)."""
    kw, kb = jax.random.split(key)
    bound = 1.0 / jnp.sqrt(jnp.float32(in_dim))
    w = jax.random.uniform(kw, (in_dim, out_dim), jnp.float32, -bound, bound)
    b = jax.random.uniform(kb, (1, out_dim), jnp.float32, -bound, bound)
    return w, b


def make_params(key, s_dim, a_dim, z_dim):
    keys = jax.random.split(key, 7)
    p = {}
    p["e1w"], p["e1b"] = init_linear(keys[0], s_dim + a_dim, HIDDEN)
    p["e2w"], p["e2b"] = init_linear(keys[1], HIDDEN, HIDDEN)
    p["mw"], p["mb"] = init_linear(keys[2], HIDDEN, z_dim)
    p["lw"], p["lb"] = init_linear(keys[3], HIDDEN, z_dim)
    p["d1w"], p["d1b"] = init_linear(keys[4], s_dim + z_dim, HIDDEN)
    p["d2w"], p["d2b"] = init_linear(keys[5], HIDDEN, HIDDEN)
    p["d3w"], p["d3b"] = init_linear(keys[6], HIDDEN, a_dim)
    return p


def prepare_kernel_params(p, s_dim, a_dim, z_dim):
    """Transform raw f32 (in, out) weights into kernel layout:
      - [s,a] fused e1 weight; d1 split into s-part / z-part,
      - mean / log_std heads fused, each in its own 128-lane block,
      - HIDDEN zero-padded 750 -> 768, small dims zero-padded to 128,
      - weights bf16 (biases f32). Zero padding is exact (ReLU / dot preserve it)."""
    bf16 = jnp.bfloat16
    f32 = jnp.float32
    sa_pad = _round_up(s_dim + a_dim, 128)
    z_pad = _round_up(z_dim, 128)
    a_pad = _round_up(a_dim, 128)

    def place(w, rows, cols):
        out = jnp.zeros((rows, cols), f32)
        return out.at[:w.shape[0], :w.shape[1]].set(w)

    kp = {}
    kp["e1w"] = place(p["e1w"], sa_pad, HIDDEN_PAD).astype(bf16)
    kp["e1b"] = place(p["e1b"], 1, HIDDEN_PAD)
    kp["e2w"] = place(p["e2w"], HIDDEN_PAD, HIDDEN_PAD).astype(bf16)
    kp["e2b"] = place(p["e2b"], 1, HIDDEN_PAD)

    headw = jnp.zeros((HIDDEN_PAD, 2 * z_pad), f32)
    headw = headw.at[:HIDDEN, :z_dim].set(p["mw"])
    headw = headw.at[:HIDDEN, z_pad:z_pad + z_dim].set(p["lw"])
    kp["headw"] = headw.astype(bf16)
    headb = jnp.zeros((1, 2 * z_pad), f32)
    headb = headb.at[:, :z_dim].set(p["mb"])
    headb = headb.at[:, z_pad:z_pad + z_dim].set(p["lb"])
    kp["headb"] = headb

    kp["d1w_s"] = place(p["d1w"][:s_dim], sa_pad, HIDDEN_PAD).astype(bf16)
    kp["d1w_z"] = place(p["d1w"][s_dim:], z_pad, HIDDEN_PAD).astype(bf16)
    kp["d1b"] = place(p["d1b"], 1, HIDDEN_PAD)
    kp["d2w"] = place(p["d2w"], HIDDEN_PAD, HIDDEN_PAD).astype(bf16)
    kp["d2b"] = place(p["d2b"], 1, HIDDEN_PAD)
    kp["d3w"] = place(p["d3w"], HIDDEN_PAD, a_pad).astype(bf16)
    kp["d3b"] = place(p["d3b"], 1, a_pad)
    return kp


# --------------------------------------------------------------------------
# Plain-JAX f32 reference (PyTorch forward semantics) for sanity checking
# --------------------------------------------------------------------------
def reference_forward(s, a, noise, p):
    x = jnp.concatenate([s, a], axis=1)
    h = jax.nn.relu(x @ p["e1w"] + p["e1b"])
    h = jax.nn.relu(h @ p["e2w"] + p["e2b"])
    mean = h @ p["mw"] + p["mb"]
    log_std = jnp.clip(h @ p["lw"] + p["lb"], -4.0, 15.0)
    std = jnp.exp(log_std)
    z = mean + std * noise
    xd = jnp.concatenate([s, z], axis=1)
    d = jax.nn.relu(xd @ p["d1w"] + p["d1b"])
    d = jax.nn.relu(d @ p["d2w"] + p["d2b"])
    a_out = jnp.tanh(d @ p["d3w"] + p["d3b"])
    return a_out, mean, std


if __name__ == "__main__":
    # Small shapes consistent with the module's forward.
    B, S_DIM, A_DIM, Z_DIM = 8, 16, 8, 16

    key = jax.random.PRNGKey(0)
    k_params, k_s, k_a, k_noise = jax.random.split(key, 4)

    params = make_params(k_params, S_DIM, A_DIM, Z_DIM)
    kparams = prepare_kernel_params(params, S_DIM, A_DIM, Z_DIM)

    s = jax.random.normal(k_s, (B, S_DIM), jnp.float32)
    a = jax.random.normal(k_a, (B, A_DIM), jnp.float32)
    # Reparameterization noise (torch.randn_like(std)) generated as glue.
    noise = jax.random.normal(k_noise, (B, Z_DIM), jnp.float32)

    a_out, mean, std = vae_forward(s, a, noise, kparams)
    jax.block_until_ready((a_out, mean, std))

    # Sanity check vs. f32 reference (loose tol: weights/activations in bf16).
    a_ref, m_ref, s_ref = reference_forward(s, a, noise, params)
    assert jnp.allclose(a_out, a_ref, rtol=5e-2, atol=5e-2)
    assert jnp.allclose(mean, m_ref, rtol=5e-2, atol=5e-2)
    assert jnp.allclose(std, s_ref, rtol=5e-2, atol=5e-2)

    print("KERNEL_OK")
</pallas_src>

<mosaic_0001>
module attributes {stable_mosaic.version = 11 : i64} {
  func.func @_vae_kernel(%arg0: i32, %arg1: memref<8x256xf32, #tpu.memory_space<vmem>>, %arg2: memref<128x768xbf16, #tpu.memory_space<vmem>>, %arg3: memref<1x768xf32, #tpu.memory_space<vmem>>, %arg4: memref<768x768xbf16, #tpu.memory_space<vmem>>, %arg5: memref<1x768xf32, #tpu.memory_space<vmem>>, %arg6: memref<768x256xbf16, #tpu.memory_space<vmem>>, %arg7: memref<1x256xf32, #tpu.memory_space<vmem>>, %arg8: memref<128x768xbf16, #tpu.memory_space<vmem>>, %arg9: memref<128x768xbf16, #tpu.memory_space<vmem>>, %arg10: memref<1x768xf32, #tpu.memory_space<vmem>>, %arg11: memref<768x768xbf16, #tpu.memory_space<vmem>>, %arg12: memref<1x768xf32, #tpu.memory_space<vmem>>, %arg13: memref<768x128xbf16, #tpu.memory_space<vmem>>, %arg14: memref<1x128xf32, #tpu.memory_space<vmem>>, %arg15: memref<8x384xf32, #tpu.memory_space<vmem>>) attributes {dimension_semantics = [#tpu.dimension_semantics<parallel>], iteration_bounds = array<i64: 1>, scalar_prefetch = 0 : i64, scratch_operands = 0 : i64, tpu.core_type = #tpu.core_type<tc>, window_params = [{transform_indices = @transform_0, window_bounds = array<i64: 8, 256>}, {pipeline_mode = #tpu.pipeline_mode<synchronous>, transform_indices = @transform_1, window_bounds = array<i64: 128, 768>}, {pipeline_mode = #tpu.pipeline_mode<synchronous>, transform_indices = @transform_2, window_bounds = array<i64: 1, 768>}, {pipeline_mode = #tpu.pipeline_mode<synchronous>, transform_indices = @transform_3, window_bounds = array<i64: 768, 768>}, {pipeline_mode = #tpu.pipeline_mode<synchronous>, transform_indices = @transform_4, window_bounds = array<i64: 1, 768>}, {pipeline_mode = #tpu.pipeline_mode<synchronous>, transform_indices = @transform_5, window_bounds = array<i64: 768, 256>}, {pipeline_mode = #tpu.pipeline_mode<synchronous>, transform_indices = @transform_6, window_bounds = array<i64: 1, 256>}, {pipeline_mode = #tpu.pipeline_mode<synchronous>, transform_indices = @transform_7, window_bounds = array<i64: 128, 768>}, {pipeline_mode = #tpu.pipeline_mode<synchronous>, transform_indices = @transform_8, window_bounds = array<i64: 128, 768>}, {pipeline_mode = #tpu.pipeline_mode<synchronous>, transform_indices = @transform_9, window_bounds = array<i64: 1, 768>}, {pipeline_mode = #tpu.pipeline_mode<synchronous>, transform_indices = @transform_10, window_bounds = array<i64: 768, 768>}, {pipeline_mode = #tpu.pipeline_mode<synchronous>, transform_indices = @transform_11, window_bounds = array<i64: 1, 768>}, {pipeline_mode = #tpu.pipeline_mode<synchronous>, transform_indices = @transform_12, window_bounds = array<i64: 768, 128>}, {pipeline_mode = #tpu.pipeline_mode<synchronous>, transform_indices = @transform_13, window_bounds = array<i64: 1, 128>}, {transform_indices = @transform_14, window_bounds = array<i64: 8, 384>}]} {
    %c0 = arith.constant 0 : index
    %c0_0 = arith.constant 0 : index
    %0 = vector.load %arg1[%c0, %c0_0] : memref<8x256xf32, #tpu.memory_space<vmem>>, vector<8x128xf32>
    %1 = arith.truncf %0 : vector<8x128xf32> to vector<8x128xbf16>
    %c0_1 = arith.constant 0 : index
    %c128 = arith.constant 128 : index
    %2 = vector.load %arg1[%c0_1, %c128] : memref<8x256xf32, #tpu.memory_space<vmem>>, vector<8x128xf32>
    %c0_2 = arith.constant 0 : index
    %c0_3 = arith.constant 0 : index
    %3 = vector.load %arg2[%c0_2, %c0_3] : memref<128x768xbf16, #tpu.memory_space<vmem>>, vector<128x768xbf16>
    %cst = arith.constant dense<0.000000e+00> : vector<8x768xf32>
    %4 = tpu.matmul %1, %3, %cst {dimension_numbers = #tpu.dot_dimension_numbers<[1], [0], [0], [1], [0, 0, 1, 1], [], []>} : vector<8x128xbf16>, vector<128x768xbf16>, vector<8x768xf32> -> vector<8x768xf32>
    %c0_4 = arith.constant 0 : index
    %c0_5 = arith.constant 0 : index
    %5 = vector.load %arg3[%c0_4, %c0_5] : memref<1x768xf32, #tpu.memory_space<vmem>>, vector<1x768xf32>
    %6 = vector.broadcast %5 : vector<1x768xf32> to vector<8x768xf32>
    %7 = arith.addf %4, %6 : vector<8x768xf32>
    %cst_6 = arith.constant 0.000000e+00 : f32
    %8 = vector.broadcast %cst_6 : f32 to vector<8x768xf32>
    %9 = arith.maximumf %7, %8 : vector<8x768xf32>
    %10 = arith.truncf %9 : vector<8x768xf32> to vector<8x768xbf16>
    %c0_7 = arith.constant 0 : index
    %c0_8 = arith.constant 0 : index
    %11 = vector.load %arg4[%c0_7, %c0_8] : memref<768x768xbf16, #tpu.memory_space<vmem>>, vector<768x768xbf16>
    %cst_9 = arith.constant dense<0.000000e+00> : vector<8x768xf32>
    %12 = tpu.matmul %10, %11, %cst_9 {dimension_numbers = #tpu.dot_dimension_numbers<[1], [0], [0], [1], [0, 0, 1, 1], [], []>} : vector<8x768xbf16>, vector<768x768xbf16>, vector<8x768xf32> -> vector<8x768xf32>
    %c0_10 = arith.constant 0 : index
    %c0_11 = arith.constant 0 : index
    %13 = vector.load %arg5[%c0_10, %c0_11] : memref<1x768xf32, #tpu.memory_space<vmem>>, vector<1x768xf32>
    %14 = vector.broadcast %13 : vector<1x768xf32> to vector<8x768xf32>
    %15 = arith.addf %12, %14 : vector<8x768xf32>
    %cst_12 = arith.constant 0.000000e+00 : f32
    %16 = vector.broadcast %cst_12 : f32 to vector<8x768xf32>
    %17 = arith.maximumf %15, %16 : vector<8x768xf32>
    %18 = arith.truncf %17 : vector<8x768xf32> to vector<8x768xbf16>
    %c0_13 = arith.constant 0 : index
    %c0_14 = arith.constant 0 : index
    %19 = vector.load %arg6[%c0_13, %c0_14] : memref<768x256xbf16, #tpu.memory_space<vmem>>, vector<768x256xbf16>
    %cst_15 = arith.constant dense<0.000000e+00> : vector<8x256xf32>
    %20 = tpu.matmul %18, %19, %cst_15 {dimension_numbers = #tpu.dot_dimension_numbers<[1], [0], [0], [1], [0, 0, 1, 1], [], []>} : vector<8x768xbf16>, vector<768x256xbf16>, vector<8x256xf32> -> vector<8x256xf32>
    %c0_16 = arith.constant 0 : index
    %c0_17 = arith.constant 0 : index
    %21 = vector.load %arg7[%c0_16, %c0_17] : memref<1x256xf32, #tpu.memory_space<vmem>>, vector<1x256xf32>
    %22 = vector.broadcast %21 : vector<1x256xf32> to vector<8x256xf32>
    %23 = arith.addf %20, %22 : vector<8x256xf32>
    %24 = vector.extract_strided_slice %23 {offsets = [0, 0], sizes = [8, 128], strides = [1, 1]} : vector<8x256xf32> to vector<8x128xf32>
    %25 = vector.extract_strided_slice %23 {offsets = [0, 128], sizes = [8, 128], strides = [1, 1]} : vector<8x256xf32> to vector<8x128xf32>
    %cst_18 = arith.constant -4.000000e+00 : f32
    %cst_19 = arith.constant 1.500000e+01 : f32
    %26 = vector.broadcast %cst_18 : f32 to vector<8x128xf32>
    %27 = arith.maximumf %26, %25 : vector<8x128xf32>
    %28 = vector.broadcast %cst_19 : f32 to vector<8x128xf32>
    %29 = arith.minimumf %28, %27 : vector<8x128xf32>
    %30 = math.exp %29 : vector<8x128xf32>
    %31 = arith.mulf %30, %2 : vector<8x128xf32>
    %32 = arith.addf %24, %31 : vector<8x128xf32>
    %c0_20 = arith.constant 0 : index
    %c0_21 = arith.constant 0 : index
    %33 = vector.load %arg8[%c0_20, %c0_21] : memref<128x768xbf16, #tpu.memory_space<vmem>>, vector<128x768xbf16>
    %cst_22 = arith.constant dense<0.000000e+00> : vector<8x768xf32>
    %34 = tpu.matmul %1, %33, %cst_22 {dimension_numbers = #tpu.dot_dimension_numbers<[1], [0], [0], [1], [0, 0, 1, 1], [], []>} : vector<8x128xbf16>, vector<128x768xbf16>, vector<8x768xf32> -> vector<8x768xf32>
    %35 = arith.truncf %32 : vector<8x128xf32> to vector<8x128xbf16>
    %c0_23 = arith.constant 0 : index
    %c0_24 = arith.constant 0 : index
    %36 = vector.load %arg9[%c0_23, %c0_24] : memref<128x768xbf16, #tpu.memory_space<vmem>>, vector<128x768xbf16>
    %cst_25 = arith.constant dense<0.000000e+00> : vector<8x768xf32>
    %37 = tpu.matmul %35, %36, %cst_25 {dimension_numbers = #tpu.dot_dimension_numbers<[1], [0], [0], [1], [0, 0, 1, 1], [], []>} : vector<8x128xbf16>, vector<128x768xbf16>, vector<8x768xf32> -> vector<8x768xf32>
    %38 = arith.addf %34, %37 : vector<8x768xf32>
    %c0_26 = arith.constant 0 : index
    %c0_27 = arith.constant 0 : index
    %39 = vector.load %arg10[%c0_26, %c0_27] : memref<1x768xf32, #tpu.memory_space<vmem>>, vector<1x768xf32>
    %40 = vector.broadcast %39 : vector<1x768xf32> to vector<8x768xf32>
    %41 = arith.addf %38, %40 : vector<8x768xf32>
    %cst_28 = arith.constant 0.000000e+00 : f32
    %42 = vector.broadcast %cst_28 : f32 to vector<8x768xf32>
    %43 = arith.maximumf %41, %42 : vector<8x768xf32>
    %44 = arith.truncf %43 : vector<8x768xf32> to vector<8x768xbf16>
    %c0_29 = arith.constant 0 : index
    %c0_30 = arith.constant 0 : index
    %45 = vector.load %arg11[%c0_29, %c0_30] : memref<768x768xbf16, #tpu.memory_space<vmem>>, vector<768x768xbf16>
    %cst_31 = arith.constant dense<0.000000e+00> : vector<8x768xf32>
    %46 = tpu.matmul %44, %45, %cst_31 {dimension_numbers = #tpu.dot_dimension_numbers<[1], [0], [0], [1], [0, 0, 1, 1], [], []>} : vector<8x768xbf16>, vector<768x768xbf16>, vector<8x768xf32> -> vector<8x768xf32>
    %c0_32 = arith.constant 0 : index
    %c0_33 = arith.constant 0 : index
    %47 = vector.load %arg12[%c0_32, %c0_33] : memref<1x768xf32, #tpu.memory_space<vmem>>, vector<1x768xf32>
    %48 = vector.broadcast %47 : vector<1x768xf32> to vector<8x768xf32>
    %49 = arith.addf %46, %48 : vector<8x768xf32>
    %cst_34 = arith.constant 0.000000e+00 : f32
    %50 = vector.broadcast %cst_34 : f32 to vector<8x768xf32>
    %51 = arith.maximumf %49, %50 : vector<8x768xf32>
    %52 = arith.truncf %51 : vector<8x768xf32> to vector<8x768xbf16>
    %c0_35 = arith.constant 0 : index
    %c0_36 = arith.constant 0 : index
    %53 = vector.load %arg13[%c0_35, %c0_36] : memref<768x128xbf16, #tpu.memory_space<vmem>>, vector<768x128xbf16>
    %cst_37 = arith.constant dense<0.000000e+00> : vector<8x128xf32>
    %54 = tpu.matmul %52, %53, %cst_37 {dimension_numbers = #tpu.dot_dimension_numbers<[1], [0], [0], [1], [0, 0, 1, 1], [], []>} : vector<8x768xbf16>, vector<768x128xbf16>, vector<8x128xf32> -> vector<8x128xf32>
    %c0_38 = arith.constant 0 : index
    %c0_39 = arith.constant 0 : index
    %55 = vector.load %arg14[%c0_38, %c0_39] : memref<1x128xf32, #tpu.memory_space<vmem>>, vector<1x128xf32>
    %56 = vector.broadcast %55 : vector<1x128xf32> to vector<8x128xf32>
    %57 = arith.addf %54, %56 : vector<8x128xf32>
    %58 = math.tanh %57 : vector<8x128xf32>
    %c0_40 = arith.constant 0 : index
    %c0_41 = arith.constant 0 : index
    %59 = vector.load %arg15[%c0_40, %c0_41] : memref<8x384xf32, #tpu.memory_space<vmem>>, vector<8x128xf32>
    tpu.vector_store %arg15[%c0_40, %c0_41], %58 {strides = array<i32>} : memref<8x384xf32, #tpu.memory_space<vmem>>, vector<8x128xf32>,
    %c0_42 = arith.constant 0 : index
    %c128_43 = arith.constant 128 : index
    %60 = vector.load %arg15[%c0_42, %c128_43] : memref<8x384xf32, #tpu.memory_space<vmem>>, vector<8x128xf32>
    tpu.vector_store %arg15[%c0_42, %c128_43], %24 {strides = array<i32>} : memref<8x384xf32, #tpu.memory_space<vmem>>, vector<8x128xf32>,
    %c0_44 = arith.constant 0 : index
    %c256 = arith.constant 256 : index
    %61 = vector.load %arg15[%c0_44, %c256] : memref<8x384xf32, #tpu.memory_space<vmem>>, vector<8x128xf32>
    tpu.vector_store %arg15[%c0_44, %c256], %30 {strides = array<i32>} : memref<8x384xf32, #tpu.memory_space<vmem>>, vector<8x128xf32>,
    return
  }
  func.func @transform_0(%arg0: i32) -> (i32, i32) {
    %c0_i32 = arith.constant 0 : i32
    %c0_i32_0 = arith.constant 0 : i32
    return %arg0, %c0_i32 : i32, i32
  }
  func.func @transform_1(%arg0: i32) -> (i32, i32) {
    %c0_i32 = arith.constant 0 : i32
    %c0_i32_0 = arith.constant 0 : i32
    %c0_i32_1 = arith.constant 0 : i32
    return %c0_i32, %c0_i32_0 : i32, i32
  }
  func.func @transform_2(%arg0: i32) -> (i32, i32) {
    %c0_i32 = arith.constant 0 : i32
    %c0_i32_0 = arith.constant 0 : i32
    %c0_i32_1 = arith.constant 0 : i32
    return %c0_i32, %c0_i32_0 : i32, i32
  }
  func.func @transform_3(%arg0: i32) -> (i32, i32) {
    %c0_i32 = arith.constant 0 : i32
    %c0_i32_0 = arith.constant 0 : i32
    %c0_i32_1 = arith.constant 0 : i32
    return %c0_i32, %c0_i32_0 : i32, i32
  }
  func.func @transform_4(%arg0: i32) -> (i32, i32) {
    %c0_i32 = arith.constant 0 : i32
    %c0_i32_0 = arith.constant 0 : i32
    %c0_i32_1 = arith.constant 0 : i32
    return %c0_i32, %c0_i32_0 : i32, i32
  }
  func.func @transform_5(%arg0: i32) -> (i32, i32) {
    %c0_i32 = arith.constant 0 : i32
    %c0_i32_0 = arith.constant 0 : i32
    %c0_i32_1 = arith.constant 0 : i32
    return %c0_i32, %c0_i32_0 : i32, i32
  }
  func.func @transform_6(%arg0: i32) -> (i32, i32) {
    %c0_i32 = arith.constant 0 : i32
    %c0_i32_0 = arith.constant 0 : i32
    %c0_i32_1 = arith.constant 0 : i32
    return %c0_i32, %c0_i32_0 : i32, i32
  }
  func.func @transform_7(%arg0: i32) -> (i32, i32) {
    %c0_i32 = arith.constant 0 : i32
    %c0_i32_0 = arith.constant 0 : i32
    %c0_i32_1 = arith.constant 0 : i32
    return %c0_i32, %c0_i32_0 : i32, i32
  }
  func.func @transform_8(%arg0: i32) -> (i32, i32) {
    %c0_i32 = arith.constant 0 : i32
    %c0_i32_0 = arith.constant 0 : i32
    %c0_i32_1 = arith.constant 0 : i32
    return %c0_i32, %c0_i32_0 : i32, i32
  }
  func.func @transform_9(%arg0: i32) -> (i32, i32) {
    %c0_i32 = arith.constant 0 : i32
    %c0_i32_0 = arith.constant 0 : i32
    %c0_i32_1 = arith.constant 0 : i32
    return %c0_i32, %c0_i32_0 : i32, i32
  }
  func.func @transform_10(%arg0: i32) -> (i32, i32) {
    %c0_i32 = arith.constant 0 : i32
    %c0_i32_0 = arith.constant 0 : i32
    %c0_i32_1 = arith.constant 0 : i32
    return %c0_i32, %c0_i32_0 : i32, i32
  }
  func.func @transform_11(%arg0: i32) -> (i32, i32) {
    %c0_i32 = arith.constant 0 : i32
    %c0_i32_0 = arith.constant 0 : i32
    %c0_i32_1 = arith.constant 0 : i32
    return %c0_i32, %c0_i32_0 : i32, i32
  }
  func.func @transform_12(%arg0: i32) -> (i32, i32) {
    %c0_i32 = arith.constant 0 : i32
    %c0_i32_0 = arith.constant 0 : i32
    %c0_i32_1 = arith.constant 0 : i32
    return %c0_i32, %c0_i32_0 : i32, i32
  }
  func.func @transform_13(%arg0: i32) -> (i32, i32) {
    %c0_i32 = arith.constant 0 : i32
    %c0_i32_0 = arith.constant 0 : i32
    %c0_i32_1 = arith.constant 0 : i32
    return %c0_i32, %c0_i32_0 : i32, i32
  }
  func.func @transform_14(%arg0: i32) -> (i32, i32) {
    %c0_i32 = arith.constant 0 : i32
    %c0_i32_0 = arith.constant 0 : i32
    return %arg0, %c0_i32 : i32, i32
  }
}

</mosaic_0001>

<bundles_post_ra>
// kernel: tpu_custom_call.1
= control target key start
LH: loop header
LB: loop body
LE: loop exit
PB: predicated region body
PF: predicated region fallthrough
CT: control target
= control target key end

     0   :  { %19 = vsyncpa [#allocation3], 0  ;;  %s10221_s0 = inlined_call_operand.hbm [shape: f32[8,256], index: 0, kind: input, shape index: {}]   ;;  %s10222_s1 = inlined_call_operand.hbm [shape: bf16[128,768], index: 1, kind: input, shape index: {}]   ;;  %s10223_s2 = inlined_call_operand.hbm [shape: f32[1,768], index: 2, kind: input, shape index: {}]   ;;  %s10224_s3 = inlined_call_operand.hbm [shape: bf16[768,768], index: 3, kind: input, shape index: {}]   ;;  %s10225_s4 = inlined_call_operand.hbm [shape: f32[1,768], index: 4, kind: input, shape index: {}]   ;;  %s10226_s5 = inlined_call_operand.hbm [shape: bf16[768,256], index: 5, kind: input, shape index: {}]   ;;  %s10227_s6 = inlined_call_operand.hbm [shape: f32[1,256], index: 6, kind: input, shape index: {}]   ;;  %s10228_s7 = inlined_call_operand.hbm [shape: bf16[128,768], index: 7, kind: input, shape index: {}]   ;;  %s10229_s8 = inlined_call_operand.hbm [shape: bf16[128,768], index: 8, kind: input, shape index: {}]   ;;  %s10230_s9 = inlined_call_operand.hbm [shape: f32[1,768], index: 9, kind: input, shape index: {}]   ;;  %s10231_s10 = inlined_call_operand.hbm [shape: bf16[768,768], index: 10, kind: input, shape index: {}]   ;;  %s10232_s11 = inlined_call_operand.hbm [shape: f32[1,768], index: 11, kind: input, shape index: {}]   ;;  %s10233_s12 = inlined_call_operand.hbm [shape: bf16[768,128], index: 12, kind: input, shape index: {}]   ;;  %s10234_s13 = inlined_call_operand.hbm [shape: f32[1,128], index: 13, kind: input, shape index: {}]   ;;  %s10235_s14 = inlined_call_operand.hbm [shape: f32[8,384], index: 14, kind: output, shape index: {}]  }
   0x1   :  { %20 = vsyncpa [#allocation6], 0 }
   0x2   :  { %21 = vsyncpa [#allocation9], 0 }
   0x3   :  { %22 = vsyncpa [#allocation12], 0 }
   0x4   :  { %23 = vsyncpa [#allocation15], 0 }
   0x5   :  { %24 = vsyncpa [#allocation18], 0 }
   0x6   :  { %25 = vsyncpa [#allocation21], 0 }
   0x7   :  { %26 = vsyncpa [#allocation24], 0 }
   0x8   :  { %27 = vsyncpa [#allocation4], 0  ;;  %s9740_s29 = smov [#allocation5]   ;;  %s9392_s17 = scalar_lea.hbm %s10222_s1, 6144 }
   0x9   :  { %s43_s30 = sshll.u32 %s9740_s29, 4  ;;  %p9393_p0 = scmp.ne.s32.totalorder %s10222_s1, %s9392_s17  ;;  %s44_s30 = int_to_ptr.vmem [resolvable:$true] %s43_s30 }
   0xa   :  { %p9396_p1 = scmp.lt.u32.totalorder %s9392_s17, %s10222_s1 }
   0xc   :  { %p9398_p2 = pnand %p9396_p1, %p9393_p0 }
   0xe   :  { %9401 = shalt.err (!%p9398_p2)
}
   0xf   :  { %s9402_s22 = scalar_lea.vmem %s44_s30, 6144  ;;  %p9407_p4 = scmp.lt.s32.totalorder %s44_s30, %s44_s30 }
  0x10   :  { %p9403_p3 = scmp.ne.s32.totalorder %s44_s30, %s9402_s22  ;;  %p9408_p5 = scmp.lt.s32.totalorder %s9402_s22, %s9402_s22 }
  0x12   :  { %p9409_p6 = por %p9408_p5, %p9407_p4 }
  0x14   :  { %p9410_p7 = pnand %p9409_p6, %p9403_p3 }
  0x16   :  { %9413 = shalt.err (!%p9410_p7)
}
  0x17   :  { %s9741_s23 = smov 384   ;;  %s9742_s24 = smov 24  }
  0x18   :  { %49 = dma.hbm_to_vmem [thread:$0]  %s10222_s1, 6144, %s44_s30, [#allocation6], %s9741_s23, %s9741_s23, %s9742_s24  }
  0x19   :  { %s9743_s27 = smov [#allocation8]   ;;  %s9744_s29 = smov [#allocation11]  }
  0x1a   :  { %s65_s28 = sshll.u32 %s9743_s27, 4  ;;  %s87_s15 = sshll.u32 %s9744_s29, 4  ;;  %s66_s28 = int_to_ptr.vmem [resolvable:$true] %s65_s28  ;;  %s88_s15 = int_to_ptr.vmem [resolvable:$true] %s87_s15 }
  0x1b   :  { %s9414_s18 = scalar_lea.hbm %s10224_s3, 36864 }
  0x1c   :  { %p9415_p8 = scmp.ne.s32.totalorder %s10224_s3, %s9414_s18  ;;  %p9418_p9 = scmp.lt.u32.totalorder %s9414_s18, %s10224_s3 }
  0x1e   :  { %p9420_p10 = pnand %p9418_p9, %p9415_p8 }
  0x20   :  { %9423 = shalt.err (!%p9420_p10)
}
  0x21   :  { %s9424_s1 = scalar_lea.vmem %s66_s28, 36864  ;;  %p9429_p12 = scmp.lt.s32.totalorder %s66_s28, %s66_s28 }
  0x22   :  { %p9425_p11 = scmp.ne.s32.totalorder %s66_s28, %s9424_s1  ;;  %p9430_p13 = scmp.lt.s32.totalorder %s9424_s1, %s9424_s1 }
  0x24   :  { %p9431_p0 = por %p9430_p13, %p9429_p12 }
  0x26   :  { %p9432_p1 = pnand %p9431_p0, %p9425_p11 }
  0x28   :  { %9435 = shalt.err (!%p9432_p1)
}
  0x29   :  { %71 = dma.hbm_to_vmem [thread:$0]  %s10224_s3, 36864, %s66_s28, [#allocation9], %s9741_s23, %s9741_s23, %s9742_s24  }
  0x2a   :  { %s9436_s29 = scalar_lea.hbm %s10226_s5, 12288 }
  0x2b   :  { %p9437_p2 = scmp.ne.s32.totalorder %s10226_s5, %s9436_s29  ;;  %p9440_p3 = scmp.lt.u32.totalorder %s9436_s29, %s10226_s5 }
  0x2d   :  { %p9442_p4 = pnand %p9440_p3, %p9437_p2 }
  0x2f   :  { %9445 = shalt.err (!%p9442_p4)
}
  0x30   :  { %s9446_s20 = scalar_lea.vmem %s88_s15, 12288  ;;  %p9451_p6 = scmp.lt.s32.totalorder %s88_s15, %s88_s15 }
  0x31   :  { %p9447_p5 = scmp.ne.s32.totalorder %s88_s15, %s9446_s20  ;;  %p9452_p7 = scmp.lt.s32.totalorder %s9446_s20, %s9446_s20 }
  0x33   :  { %p9453_p8 = por %p9452_p7, %p9451_p6 }
  0x35   :  { %p9454_p9 = pnand %p9453_p8, %p9447_p5 }
  0x37   :  { %9457 = shalt.err (!%p9454_p9)
}
  0x38   :  { %s9745_s3 = smov 128   ;;  %s9746_s28 = smov 8  }
  0x39   :  { %93 = dma.hbm_to_vmem [thread:$0]  %s10226_s5, 12288, %s88_s15, [#allocation12], %s9745_s3, %s9745_s3, %s9746_s28  }
  0x3a   :  { %s9747_s1 = smov [#allocation14]   ;;  %s9748_s25 = smov [#allocation17]  }
  0x3b   :  { %s109_s30 = sshll.u32 %s9747_s1, 4  ;;  %s134_s26 = sshll.u32 %s9748_s25, 4  ;;  %s110_s30 = int_to_ptr.vmem [resolvable:$true] %s109_s30  ;;  %s135_s26 = int_to_ptr.vmem [resolvable:$true] %s134_s26 }
  0x3c   :  { %s9458_s16 = scalar_lea.hbm %s10228_s7, 6144 }
  0x3d   :  { %p9459_p10 = scmp.ne.s32.totalorder %s10228_s7, %s9458_s16  ;;  %p9462_p11 = scmp.lt.u32.totalorder %s9458_s16, %s10228_s7 }
  0x3f   :  { %p9464_p12 = pnand %p9462_p11, %p9459_p10 }
  0x41   :  { %9467 = shalt.err (!%p9464_p12)
}
  0x42   :  { %s9468_s5 = scalar_lea.vmem %s110_s30, 6144  ;;  %p9473_p0 = scmp.lt.s32.totalorder %s110_s30, %s110_s30 }
  0x43   :  { %p9469_p13 = scmp.ne.s32.totalorder %s110_s30, %s9468_s5  ;;  %p9474_p1 = scmp.lt.s32.totalorder %s9468_s5, %s9468_s5 }
  0x45   :  { %p9475_p2 = por %p9474_p1, %p9473_p0 }
  0x47   :  { %p9476_p3 = pnand %p9475_p2, %p9469_p13 }
  0x49   :  { %9479 = shalt.err (!%p9476_p3)
}
  0x4a   :  { %115 = dma.hbm_to_vmem [thread:$0]  %s10228_s7, 6144, %s110_s30, [#allocation15], %s9741_s23, %s9741_s23, %s9742_s24  }
  0x4b   :  { %s9480_s22 = scalar_lea.hbm %s10230_s9, 96 }
  0x4c   :  { %p9481_p4 = scmp.ne.s32.totalorder %s10230_s9, %s9480_s22  ;;  %p9484_p5 = scmp.lt.u32.totalorder %s9480_s22, %s10230_s9 }
  0x4e   :  { %p9486_p6 = pnand %p9484_p5, %p9481_p4 }
  0x50   :  { %9489 = shalt.err (!%p9486_p6)
}
  0x51   :  { %s9490_s16 = scalar_lea.vmem %s135_s26, 96  ;;  %p9495_p8 = scmp.lt.s32.totalorder %s135_s26, %s135_s26 }
  0x52   :  { %p9491_p7 = scmp.ne.s32.totalorder %s135_s26, %s9490_s16  ;;  %p9496_p9 = scmp.lt.s32.totalorder %s9490_s16, %s9490_s16 }
  0x54   :  { %p9497_p10 = por %p9496_p9, %p9495_p8 }
  0x56   :  { %p9498_p11 = pnand %p9497_p10, %p9491_p7 }
  0x58   :  { %9501 = shalt.err (!%p9498_p11)
}
  0x59   :  { %137 = dma.hbm_to_vmem [thread:$0]  %s10230_s9, 96, %s135_s26, [#allocation18]  }
  0x5a   :  { %s9749_s17 = smov [#allocation20]   ;;  %s9750_s19 = smov [#allocation2]  }
  0x5b   :  { %s156_s18 = sshll.u32 %s9749_s17, 4  ;;  %s34_s20 = sshll.u32 %s9750_s19, 4  ;;  %s157_s18 = int_to_ptr.vmem [resolvable:$true] %s156_s18  ;;  %s35_s20 = int_to_ptr.vmem [resolvable:$true] %s34_s20 }
  0x5c   :  { %s9502_s3 = scalar_lea.hbm %s10232_s11, 96 }
  0x5d   :  { %p9503_p12 = scmp.ne.s32.totalorder %s10232_s11, %s9502_s3  ;;  %p9506_p13 = scmp.lt.u32.totalorder %s9502_s3, %s10232_s11 }
  0x5f   :  { %p9508_p0 = pnand %p9506_p13, %p9503_p12 }
  0x61   :  { %9511 = shalt.err (!%p9508_p0)
}
  0x62   :  { %s9512_s9 = scalar_lea.vmem %s157_s18, 96  ;;  %p9517_p2 = scmp.lt.s32.totalorder %s157_s18, %s157_s18 }
  0x63   :  { %p9513_p1 = scmp.ne.s32.totalorder %s157_s18, %s9512_s9  ;;  %p9518_p3 = scmp.lt.s32.totalorder %s9512_s9, %s9512_s9 }
  0x65   :  { %p9519_p4 = por %p9518_p3, %p9517_p2 }
  0x67   :  { %p9520_p5 = pnand %p9519_p4, %p9513_p1 }
  0x69   :  { %9523 = shalt.err (!%p9520_p5)
}
  0x6a   :  { %159 = dma.hbm_to_vmem [thread:$0]  %s10232_s11, 96, %s157_s18, [#allocation21]  }
  0x6b   :  { %s9524_s16 = scalar_lea.hbm %s10221_s0, 256 }
  0x6c   :  { %p9525_p6 = scmp.ne.s32.totalorder %s10221_s0, %s9524_s16  ;;  %p9528_p7 = scmp.lt.u32.totalorder %s9524_s16, %s10221_s0 }
  0x6e   :  { %p9530_p8 = pnand %p9528_p7, %p9525_p6 }
  0x70   :  { %9533 = shalt.err (!%p9530_p8)
}
  0x71   :  { %s9534_s5 = scalar_lea.vmem %s35_s20, 256  ;;  %p9539_p10 = scmp.lt.s32.totalorder %s35_s20, %s35_s20 }
  0x72   :  { %p9535_p9 = scmp.ne.s32.totalorder %s35_s20, %s9534_s5  ;;  %p9540_p11 = scmp.lt.s32.totalorder %s9534_s5, %s9534_s5 }
  0x74   :  { %p9541_p12 = por %p9540_p11, %p9539_p10 }
  0x76   :  { %p9542_p13 = pnand %p9541_p12, %p9535_p9 }
  0x78   :  { %9545 = shalt.err (!%p9542_p13)
}
  0x79   :  { %37 = dma.hbm_to_vmem [thread:$0]  %s10221_s0, 256, %s35_s20, [#allocation3]  }
  0x7a   :  { %s9751_s15 = smov [#allocation7]   ;;  %s9752_s28 = smov [#allocation10]  }
  0x7b   :  { %s56_s3 = sshll.u32 %s9751_s15, 4  ;;  %s78_s21 = sshll.u32 %s9752_s28, 4  ;;  %s57_s3 = int_to_ptr.vmem [resolvable:$true] %s56_s3  ;;  %s79_s21 = int_to_ptr.vmem [resolvable:$true] %s78_s21 }
  0x7c   :  { %s9546_s9 = scalar_lea.hbm %s10223_s2, 96 }
  0x7d   :  { %p9547_p0 = scmp.ne.s32.totalorder %s10223_s2, %s9546_s9  ;;  %p9550_p1 = scmp.lt.u32.totalorder %s9546_s9, %s10223_s2 }
  0x7f   :  { %p9552_p2 = pnand %p9550_p1, %p9547_p0 }
  0x81   :  { %9555 = shalt.err (!%p9552_p2)
}
  0x82   :  { %s9556_s0 = scalar_lea.vmem %s57_s3, 96  ;;  %p9561_p4 = scmp.lt.s32.totalorder %s57_s3, %s57_s3 }
  0x83   :  { %p9557_p3 = scmp.ne.s32.totalorder %s57_s3, %s9556_s0  ;;  %p9562_p5 = scmp.lt.s32.totalorder %s9556_s0, %s9556_s0 }
  0x85   :  { %p9563_p6 = por %p9562_p5, %p9561_p4 }
  0x87   :  { %p9564_p7 = pnand %p9563_p6, %p9557_p3 }
  0x89   :  { %9567 = shalt.err (!%p9564_p7)
}
  0x8a   :  { %59 = dma.hbm_to_vmem [thread:$0]  %s10223_s2, 96, %s57_s3, [#allocation6]  }
  0x8b   :  { %s9568_s17 = scalar_lea.hbm %s10225_s4, 96 }
  0x8c   :  { %p9569_p8 = scmp.ne.s32.totalorder %s10225_s4, %s9568_s17  ;;  %p9572_p9 = scmp.lt.u32.totalorder %s9568_s17, %s10225_s4 }
  0x8e   :  { %p9574_p10 = pnand %p9572_p9, %p9569_p8 }
  0x90   :  { %9577 = shalt.err (!%p9574_p10)
}
  0x91   :  { %s9578_s15 = scalar_lea.vmem %s79_s21, 96  ;;  %p9583_p12 = scmp.lt.s32.totalorder %s79_s21, %s79_s21 }
  0x92   :  { %p9579_p11 = scmp.ne.s32.totalorder %s79_s21, %s9578_s15  ;;  %p9584_p13 = scmp.lt.s32.totalorder %s9578_s15, %s9578_s15 }
  0x94   :  { %p9585_p0 = por %p9584_p13, %p9583_p12 }
  0x96   :  { %p9586_p1 = pnand %p9585_p0, %p9579_p11 }
  0x98   :  { %9589 = shalt.err (!%p9586_p1)
}
  0x99   :  { %81 = dma.hbm_to_vmem [thread:$0]  %s10225_s4, 96, %s79_s21, [#allocation9]  }
  0x9a   :  { %s9753_s28 = smov [#allocation13]   ;;  %s9754_s1 = smov [#allocation16]  }
  0x9b   :  { %s100_s22 = sshll.u32 %s9753_s28, 4  ;;  %s121_s9 = sshll.u32 %s9754_s1, 4  ;;  %s101_s22 = int_to_ptr.vmem [resolvable:$true] %s100_s22  ;;  %s122_s9 = int_to_ptr.vmem [resolvable:$true] %s121_s9 }
  0x9c   :  { %s9590_s27 = scalar_lea.hbm %s10227_s6, 32 }
  0x9d   :  { %p9591_p2 = scmp.ne.s32.totalorder %s10227_s6, %s9590_s27  ;;  %p9594_p3 = scmp.lt.u32.totalorder %s9590_s27, %s10227_s6 }
  0x9f   :  { %p9596_p4 = pnand %p9594_p3, %p9591_p2 }
  0xa1   :  { %9599 = shalt.err (!%p9596_p4)
}
  0xa2   :  { %s9600_s4 = scalar_lea.vmem %s101_s22, 32  ;;  %p9605_p6 = scmp.lt.s32.totalorder %s101_s22, %s101_s22 }
  0xa3   :  { %p9601_p5 = scmp.ne.s32.totalorder %s101_s22, %s9600_s4  ;;  %p9606_p7 = scmp.lt.s32.totalorder %s9600_s4, %s9600_s4 }
  0xa5   :  { %p9607_p8 = por %p9606_p7, %p9605_p6 }
  0xa7   :  { %p9608_p9 = pnand %p9607_p8, %p9601_p5 }
  0xa9   :  { %9611 = shalt.err (!%p9608_p9)
}
  0xaa   :  { %103 = dma.hbm_to_vmem [thread:$0]  %s10227_s6, 32, %s101_s22, [#allocation12]  }
  0xab   :  { %s9612_s19 = scalar_lea.hbm %s10229_s8, 6144 }
  0xac   :  { %p9613_p10 = scmp.ne.s32.totalorder %s10229_s8, %s9612_s19  ;;  %p9616_p11 = scmp.lt.u32.totalorder %s9612_s19, %s10229_s8 }
  0xae   :  { %p9618_p12 = pnand %p9616_p11, %p9613_p10 }
  0xb0   :  { %9621 = shalt.err (!%p9618_p12)
}
  0xb1   :  { %s9622_s2 = scalar_lea.vmem %s122_s9, 6144  ;;  %p9627_p0 = scmp.lt.s32.totalorder %s122_s9, %s122_s9 }
  0xb2   :  { %p9623_p13 = scmp.ne.s32.totalorder %s122_s9, %s9622_s2  ;;  %p9628_p1 = scmp.lt.s32.totalorder %s9622_s2, %s9622_s2 }
  0xb4   :  { %p9629_p2 = por %p9628_p1, %p9627_p0 }
  0xb6   :  { %p9630_p3 = pnand %p9629_p2, %p9623_p13 }
  0xb8   :  { %9633 = shalt.err (!%p9630_p3)
}
  0xb9   :  { %127 = dma.hbm_to_vmem [thread:$0]  %s10229_s8, 6144, %s122_s9, [#allocation15], %s9741_s23, %s9741_s23, %s9742_s24  }
  0xba   :  { %s9755_s28 = smov [#allocation19]   ;;  %s9756_s1 = smov [#allocation22]  }
  0xbb   :  { %s143_s22 = sshll.u32 %s9755_s28, 4  ;;  %s165_s26 = sshll.u32 %s9756_s1, 4  ;;  %s144_s22 = int_to_ptr.vmem [resolvable:$true] %s143_s22  ;;  %s166_s26 = int_to_ptr.vmem [resolvable:$true] %s165_s26 }
  0xbc   :  { %s9634_s29 = scalar_lea.hbm %s10231_s10, 36864 }
  0xbd   :  { %p9635_p4 = scmp.ne.s32.totalorder %s10231_s10, %s9634_s29  ;;  %p9638_p5 = scmp.lt.u32.totalorder %s9634_s29, %s10231_s10 }
  0xbf   :  { %p9640_p6 = pnand %p9638_p5, %p9635_p4 }
  0xc1   :  { %9643 = shalt.err (!%p9640_p6)
}
  0xc2   :  { %s9644_s8 = scalar_lea.vmem %s144_s22, 36864  ;;  %p9649_p8 = scmp.lt.s32.totalorder %s144_s22, %s144_s22 }
  0xc3   :  { %p9645_p7 = scmp.ne.s32.totalorder %s144_s22, %s9644_s8  ;;  %p9650_p9 = scmp.lt.s32.totalorder %s9644_s8, %s9644_s8 }
  0xc5   :  { %p9651_p10 = por %p9650_p9, %p9649_p8 }
  0xc7   :  { %p9652_p11 = pnand %p9651_p10, %p9645_p7 }
  0xc9   :  { %9655 = shalt.err (!%p9652_p11)
}
  0xca   :  { %149 = dma.hbm_to_vmem [thread:$0]  %s10231_s10, 36864, %s144_s22, [#allocation18], %s9741_s23, %s9741_s23, %s9742_s24  }
  0xcb   :  { %s9656_s17 = scalar_lea.hbm %s10233_s12, 6144 }
  0xcc   :  { %p9657_p12 = scmp.ne.s32.totalorder %s10233_s12, %s9656_s17  ;;  %p9660_p13 = scmp.lt.u32.totalorder %s9656_s17, %s10233_s12 }
  0xce   :  { %p9662_p0 = pnand %p9660_p13, %p9657_p12 }
  0xd0   :  { %9665 = shalt.err (!%p9662_p0)
}
  0xd1   :  { %s9666_s15 = scalar_lea.vmem %s166_s26, 6144  ;;  %p9671_p2 = scmp.lt.s32.totalorder %s166_s26, %s166_s26 }
  0xd2   :  { %p9667_p1 = scmp.ne.s32.totalorder %s166_s26, %s9666_s15  ;;  %p9672_p3 = scmp.lt.s32.totalorder %s9666_s15, %s9666_s15 }
  0xd4   :  { %p9673_p4 = por %p9672_p3, %p9671_p2 }
  0xd6   :  { %p9674_p5 = pnand %p9673_p4, %p9667_p1 }
  0xd8   :  { %9677 = shalt.err (!%p9674_p5)
}
  0xd9   :  { %s9757_s10 = smov 64   ;;  %s9758_s23 = smov 4  }
  0xda   :  { %171 = dma.hbm_to_vmem [thread:$0]  %s10233_s12, 6144, %s166_s26, [#allocation21], %s9757_s10, %s9757_s10, %s9758_s23  }
  0xdb   :  { %s9759_s6 = smov [#allocation23]   ;;  %s9678_s1 = scalar_lea.hbm %s10234_s13, 16 }
  0xdc   :  { %s178_s3 = sshll.u32 %s9759_s6, 4  ;;  %p9679_p6 = scmp.ne.s32.totalorder %s10234_s13, %s9678_s1  ;;  %s179_s3 = int_to_ptr.vmem [resolvable:$true] %s178_s3 }
  0xdd   :  { %p9682_p7 = scmp.lt.u32.totalorder %s9678_s1, %s10234_s13 }
  0xdf   :  { %p9684_p8 = pnand %p9682_p7, %p9679_p6 }
  0xe1   :  { %9687 = shalt.err (!%p9684_p8)
}
  0xe2   :  { %s9688_s20 = scalar_lea.vmem %s179_s3, 16  ;;  %s9692_s12 = scalar_lea.vmem %s179_s3, 32 }
  0xe3   :  { %p9689_p9 = scmp.ne.s32.totalorder %s179_s3, %s9688_s20  ;;  %p9693_p10 = scmp.lt.s32.totalorder %s179_s3, %s179_s3 }
  0xe4   :  { %p9694_p11 = scmp.lt.s32.totalorder %s9692_s12, %s9688_s20 }
  0xe6   :  { %p9695_p12 = por %p9694_p11, %p9693_p10 }
  0xe8   :  { %p9696_p13 = pnand %p9695_p12, %p9689_p9 }
  0xea   :  { %9699 = shalt.err (!%p9696_p13)
}
  0xeb   :  { %181 = dma.hbm_to_vmem [thread:$0]  %s10234_s13, 16, %s179_s3, [#allocation24]  }
  0xec   :  { %9722 = dma.done.wait [#allocation3], 256  }
  0xed   :  { %9723 = vsyncadd [#allocation3], 4294967040 }
  0xee   :  { %9724 = dma.done.wait [#allocation6], 6240  }
  0xef   :  { %9725 = vsyncadd [#allocation6], 4294961056 }
  0xf0   :  { %9726 = dma.done.wait [#allocation9], 36960  }
  0xf1   :  { %9727 = vsyncadd [#allocation9], 4294930336 }
  0xf2   :  { %9728 = dma.done.wait [#allocation12], 12320  }
  0xf3   :  { %9729 = vsyncadd [#allocation12], 4294954976 }
  0xf4   :  { %9730 = dma.done.wait [#allocation15], 12288  }
  0xf5   :  { %9731 = vsyncadd [#allocation15], 4294955008 }
  0xf6   :  { %9732 = dma.done.wait [#allocation18], 36960  }
  0xf7   :  { %9733 = vsyncadd [#allocation18], 4294930336 }
  0xf8   :  { %9734 = dma.done.wait [#allocation21], 6240  }
  0xf9   :  { %9735 = vsyncadd [#allocation21], 4294961056 }
  0xfa   :  { %9736 = dma.done.wait [#allocation24], 16  }
  0xfb   :  { %9737 = vsyncadd [#allocation24], 4294967280  ;;  %v9760_v0 = vmov 0   ;;  %v8115_v1 = vld [vmem:[#allocation5 + $0x4] ss:$24 sps:$4 sm:$0xff]   ;;  %v225_v17 = vld [vmem:[#allocation2] sm:$0xff] }
  0xfc   :  { %580 = vmatprep.mubr.bf16.mxu0 %v9760_v0  ;;  %v8117_v2 = vld [vmem:[#allocation5] ss:$24 sps:$4 sm:$0xff]   ;;  %548 = vmatprep.subr.bf16.mxu0 %v8115_v1  ;;  %v8118_v3 = vld [vmem:[#allocation5 + $0x34] ss:$24 sps:$4 sm:$0xff]   ;;  %v8120_v4 = vld [vmem:[#allocation5 + $0x30] ss:$24 sps:$4 sm:$0xff]   ;;  %v10021_v19 = vpack.c.bf16 %v225_v17, %v225_v17 }
  0xfd   :  { %549 = vmatpush1.bf16.msra.mxu0 %v8117_v2  ;;  %v8121_v5 = vld [vmem:[#allocation5 + $0x64] ss:$24 sps:$4 sm:$0xff]   ;;  %v8123_v6 = vld [vmem:[#allocation5 + $0x60] ss:$24 sps:$4 sm:$0xff]   ;;  %v8124_v7 = vld [vmem:[#allocation5 + $0x94] ss:$24 sps:$4 sm:$0xff]  }
  0xfe   :  { %550 = vmatprep.subr.bf16.mxu0 %v8118_v3  ;;  %v8126_v8 = vld [vmem:[#allocation5 + $0x90] ss:$24 sps:$4 sm:$0xff]   ;;  %v8127_v9 = vld [vmem:[#allocation5 + $0xc4] ss:$24 sps:$4 sm:$0xff]   ;;  %v8129_v10 = vld [vmem:[#allocation5 + $0xc0] ss:$24 sps:$4 sm:$0xff]  }
  0xff   :  { %v8130_v11 = vld [vmem:[#allocation5 + $0xf4] ss:$24 sps:$4 sm:$0xff]   ;;  %v8132_v12 = vld [vmem:[#allocation5 + $0xf0] ss:$24 sps:$4 sm:$0xff]   ;;  %v8133_v13 = vld [vmem:[#allocation5 + $0x124] ss:$24 sps:$4 sm:$0xff]  }
 0x100   :  { %v8135_v14 = vld [vmem:[#allocation5 + $0x120] ss:$24 sps:$4 sm:$0xff]   ;;  %v8136_v15 = vld [vmem:[#allocation5 + $0x154] ss:$24 sps:$4 sm:$0xff]   ;;  %v8138_v16 = vld [vmem:[#allocation5 + $0x150] ss:$24 sps:$4 sm:$0xff]  }
 0x101   :  { %551 = vmatpush1.bf16.msra.mxu0 %v8120_v4  ;;  %v8141_v18 = vld [vmem:[#allocation5 + $0xc] ss:$24 sps:$4 sm:$0xff]   ;;  %v8139_v20 = vld [vmem:[#allocation5 + $0x8] ss:$24 sps:$4 sm:$0xff]   ;;  %v8144_v21 = vld [vmem:[#allocation5 + $0x3c] ss:$24 sps:$4 sm:$0xff]  }
 0x102   :  { %552 = vmatprep.subr.bf16.mxu0 %v8121_v5  ;;  %v8187_v22 = vld [vmem:[#allocation8 + $0x4] ss:$24 sps:$4 sm:$0xff]   ;;  %v8142_v23 = vld [vmem:[#allocation5 + $0x38] ss:$24 sps:$4 sm:$0xff]   ;;  %v8192_v24 = vld [vmem:[#allocation8] ss:$24 sps:$4 sm:$0xff]  }
 0x103   :  { %v8193_v25 = vld [vmem:[#allocation8 + $0x34] ss:$24 sps:$4 sm:$0xff]   ;;  %v8147_v26 = vld [vmem:[#allocation5 + $0x6c] ss:$24 sps:$4 sm:$0xff]   ;;  %2443 = vmatprep.subr.bf16.mxu1 %v8187_v22  ;;  %v8145_v29 = vld [vmem:[#allocation5 + $0x68] ss:$24 sps:$4 sm:$0xff]  }
 0x104   :  { %2444 = vmatpush1.bf16.msra.mxu1 %v8192_v24  ;;  %v8198_v27 = vld [vmem:[#allocation8 + $0x30] ss:$24 sps:$4 sm:$0xff]   ;;  %v8199_v28 = vld [vmem:[#allocation8 + $0x64] ss:$24 sps:$4 sm:$0xff]   ;;  %v8204_v31 = vld [vmem:[#allocation8 + $0x60] ss:$24 sps:$4 sm:$0xff]  }
 0x105   :  { %553 = vmatpush1.bf16.msra.mxu0 %v8123_v6  ;;  %2445 = vmatprep.subr.bf16.mxu1 %v8193_v25  ;;  %v8150_v30 = vld [vmem:[#allocation5 + $0x9c] ss:$24 sps:$4 sm:$0xff]   ;;  %v8148_v33 = vld [vmem:[#allocation5 + $0x98] ss:$24 sps:$4 sm:$0xff]   ;;  %v8153_v34 = vld [vmem:[#allocation5 + $0xcc] ss:$24 sps:$4 sm:$0xff]  }
 0x106   :  { %554 = vmatprep.subr.bf16.mxu0 %v8124_v7  ;;  %v8205_v32 = vld [vmem:[#allocation8 + $0x94] ss:$24 sps:$4 sm:$0xff]   ;;  %v8210_v35 = vld [vmem:[#allocation8 + $0x90] ss:$24 sps:$4 sm:$0xff]   ;;  %v8211_v36 = vld [vmem:[#allocation8 + $0xc4] ss:$24 sps:$4 sm:$0xff]  }
 0x107   :  { %v8151_v37 = vld [vmem:[#allocation5 + $0xc8] ss:$24 sps:$4 sm:$0xff]   ;;  %v8156_v38 = vld [vmem:[#allocation5 + $0xfc] ss:$24 sps:$4 sm:$0xff]   ;;  %v8154_v41 = vld [vmem:[#allocation5 + $0xf8] ss:$24 sps:$4 sm:$0xff]  }
 0x108   :  { %2446 = vmatpush1.bf16.msra.mxu1 %v8198_v27  ;;  %v8216_v39 = vld [vmem:[#allocation8 + $0xc0] ss:$24 sps:$4 sm:$0xff]   ;;  %v8217_v40 = vld [vmem:[#allocation8 + $0xf4] ss:$24 sps:$4 sm:$0xff]   ;;  %v8222_v43 = vld [vmem:[#allocation8 + $0xf0] ss:$24 sps:$4 sm:$0xff]  }
 0x109   :  { %555 = vmatpush1.bf16.msra.mxu0 %v8126_v8  ;;  %2447 = vmatprep.subr.bf16.mxu1 %v8199_v28  ;;  %v8159_v42 = vld [vmem:[#allocation5 + $0x12c] ss:$24 sps:$4 sm:$0xff]   ;;  %v8157_v45 = vld [vmem:[#allocation5 + $0x128] ss:$24 sps:$4 sm:$0xff]   ;;  %v8162_v46 = vld [vmem:[#allocation5 + $0x15c] ss:$24 sps:$4 sm:$0xff]  }
 0x10a   :  { %556 = vmatprep.subr.bf16.mxu0 %v8127_v9  ;;  %v8223_v44 = vld [vmem:[#allocation8 + $0x124] ss:$24 sps:$4 sm:$0xff]   ;;  %v8228_v47 = vld [vmem:[#allocation8 + $0x120] ss:$24 sps:$4 sm:$0xff]   ;;  %v8229_v48 = vld [vmem:[#allocation8 + $0x154] ss:$24 sps:$4 sm:$0xff]  }
 0x10b   :  { %v8160_v49 = vld [vmem:[#allocation5 + $0x158] ss:$24 sps:$4 sm:$0xff]   ;;  %v8165_v50 = vld [vmem:[#allocation5 + $0x14] ss:$24 sps:$4 sm:$0xff]   ;;  %v8168_v54 = vld [vmem:[#allocation5 + $0x44] ss:$24 sps:$4 sm:$0xff]  }
 0x10c   :  { %2448 = vmatpush1.bf16.msra.mxu1 %v8204_v31  ;;  %v8234_v51 = vld [vmem:[#allocation8 + $0x150] ss:$24 sps:$4 sm:$0xff]   ;;  %v8235_v52 = vld [vmem:[#allocation8 + $0x184] ss:$24 sps:$4 sm:$0xff]   ;;  %v8240_v55 = vld [vmem:[#allocation8 + $0x180] ss:$24 sps:$4 sm:$0xff]  }
 0x10d   :  { %557 = vmatpush1.bf16.msra.mxu0 %v8129_v10  ;;  %2449 = vmatprep.subr.bf16.mxu1 %v8205_v32  ;;  %v8163_v53 = vld [vmem:[#allocation5 + $0x10] ss:$24 sps:$4 sm:$0xff]   ;;  %v8166_v57 = vld [vmem:[#allocation5 + $0x40] ss:$24 sps:$4 sm:$0xff]   ;;  %v8171_v58 = vld [vmem:[#allocation5 + $0x74] ss:$24 sps:$4 sm:$0xff]  }
 0x10e   :  { %558 = vmatprep.subr.bf16.mxu0 %v8130_v11  ;;  %v8241_v56 = vld [vmem:[#allocation8 + $0x1b4] ss:$24 sps:$4 sm:$0xff]   ;;  %v8246_v60 = vld [vmem:[#allocation8 + $0x1b0] ss:$24 sps:$4 sm:$0xff]   ;;  %v8247_v61 = vld [vmem:[#allocation8 + $0x1e4] ss:$24 sps:$4 sm:$0xff]  }
 0x10f   :  { %v8169_v59 = vld [vmem:[#allocation5 + $0x70] ss:$24 sps:$4 sm:$0xff]   ;;  %v8174_v62 = vld [vmem:[#allocation5 + $0xa4] ss:$24 sps:$4 sm:$0xff]   ;;  %v8172_v2 = vld [vmem:[#allocation5 + $0xa0] ss:$24 sps:$4 sm:$0xff]  }
 0x110   :  { %2450 = vmatpush1.bf16.msra.mxu1 %v8210_v35  ;;  %v8252_v63 = vld [vmem:[#allocation8 + $0x1e0] ss:$24 sps:$4 sm:$0xff]   ;;  %v8253_v1 = vld [vmem:[#allocation8 + $0x214] ss:$24 sps:$4 sm:$0xff]   ;;  %v8258_v4 = vld [vmem:[#allocation8 + $0x210] ss:$24 sps:$4 sm:$0xff]  }
 0x111   :  { %559 = vmatpush1.bf16.msra.mxu0 %v8132_v12  ;;  %2451 = vmatprep.subr.bf16.mxu1 %v8211_v36  ;;  %v8177_v3 = vld [vmem:[#allocation5 + $0xd4] ss:$24 sps:$4 sm:$0xff]   ;;  %v8175_v6 = vld [vmem:[#allocation5 + $0xd0] ss:$24 sps:$4 sm:$0xff]   ;;  %v8180_v7 = vld [vmem:[#allocation5 + $0x104] ss:$24 sps:$4 sm:$0xff]  }
 0x112   :  { %560 = vmatprep.subr.bf16.mxu0 %v8133_v13  ;;  %v8259_v5 = vld [vmem:[#allocation8 + $0x244] ss:$24 sps:$4 sm:$0xff]   ;;  %v8264_v8 = vld [vmem:[#allocation8 + $0x240] ss:$24 sps:$4 sm:$0xff]   ;;  %v8265_v9 = vld [vmem:[#allocation8 + $0x274] ss:$24 sps:$4 sm:$0xff]  }
 0x113   :  { %v8178_v10 = vld [vmem:[#allocation5 + $0x100] ss:$24 sps:$4 sm:$0xff]   ;;  %v8183_v11 = vld [vmem:[#allocation5 + $0x134] ss:$24 sps:$4 sm:$0xff]   ;;  %v8181_v13 = vld [vmem:[#allocation5 + $0x130] ss:$24 sps:$4 sm:$0xff]  }
 0x114   :  { %2452 = vmatpush1.bf16.msra.mxu1 %v8216_v39  ;;  %v8270_v12 = vld [vmem:[#allocation8 + $0x270] ss:$24 sps:$4 sm:$0xff]   ;;  %v8215_v25 = vld [vmem:[#allocation8 + $0xcc] ss:$24 sps:$4 sm:$0xff]   ;;  %v8221_v27 = vld [vmem:[#allocation8 + $0xfc] ss:$24 sps:$4 sm:$0xff]  }
 0x115   :  { %561 = vmatpush1.bf16.msra.mxu0 %v8135_v14  ;;  %2453 = vmatprep.subr.bf16.mxu1 %v8217_v40  ;;  %v8186_v14 = vld [vmem:[#allocation5 + $0x164] ss:$24 sps:$4 sm:$0xff]   ;;  %v8282_v35 = vld [vmem:[#allocation8 + $0x2d0] ss:$24 sps:$4 sm:$0xff]   ;;  %s9761_s13 = smov [#allocation25]  }
 0x116   :  { %562 = vmatprep.subr.bf16.mxu0 %v8136_v15  ;;  %v8184_v15 = vld [vmem:[#allocation5 + $0x160] ss:$24 sps:$4 sm:$0xff]   ;;  %v8189_v17 = vld [vmem:[#allocation8 + $0x8] ss:$24 sps:$4 sm:$0xff]   ;;  %s7076_s4 = sshll.u32 %s9761_s13, 4  ;;  %s7077_s4 = int_to_ptr.vmem [resolvable:$true] %s7076_s4 }
 0x117   :  { %v8201_v22 = vld [vmem:[#allocation8 + $0x68] ss:$24 sps:$4 sm:$0xff]   ;;  %v8207_v24 = vld [vmem:[#allocation8 + $0x98] ss:$24 sps:$4 sm:$0xff]   ;;  %v8245_v40 = vld [vmem:[#allocation8 + $0x1bc] ss:$24 sps:$4 sm:$0xff]   ;;  %p9705_p1 = scmp.lt.s32.totalorder %s7077_s4, %s7077_s4 }
 0x118   :  { %2454 = vmatpush1.bf16.msra.mxu1 %v8222_v43  ;;  %v8219_v28 = vld [vmem:[#allocation8 + $0xf8] ss:$24 sps:$4 sm:$0xff]   ;;  %v8225_v32 = vld [vmem:[#allocation8 + $0x128] ss:$24 sps:$4 sm:$0xff]   ;;  %s9700_s8 = scalar_lea.vmem %s7077_s4, 384 }
 0x119   :  { %563 = vmatpush1.bf16.msra.mxu0 %v8138_v16  ;;  %2455 = vmatprep.subr.bf16.mxu1 %v8223_v44  ;;  %v8191_v16 = vld [vmem:[#allocation8 + $0xc] ss:$24 sps:$4 sm:$0xff]   ;;  %v8276_v31 = vld [vmem:[#allocation8 + $0x2a0] ss:$24 sps:$4 sm:$0xff]   ;;  %v8257_v44 = vld [vmem:[#allocation8 + $0x21c] ss:$24 sps:$4 sm:$0xff]   ;;  %p9701_p0 = scmp.ne.s32.totalorder %s7077_s4, %s9700_s8  ;;  %p9706_p2 = scmp.lt.s32.totalorder %s9700_s8, %s9700_s8 }
 0x11a   :  { %589 = vmatprep.subr.bf16.mxu0 %v8141_v18  ;;  %v8197_v18 = vld [vmem:[#allocation8 + $0x3c] ss:$24 sps:$4 sm:$0xff]   ;;  %v8231_v36 = vld [vmem:[#allocation8 + $0x158] ss:$24 sps:$4 sm:$0xff]   ;;  %v8237_v39 = vld [vmem:[#allocation8 + $0x188] ss:$24 sps:$4 sm:$0xff]  }
 0x11b   :  { %v8249_v43 = vld [vmem:[#allocation8 + $0x1e8] ss:$24 sps:$4 sm:$0xff]   ;;  %p9707_p3 = por %p9706_p2, %p9705_p1 }
 0x11c   :  { %581 = vmatmul.mubr.bf16.vlgmr.msra.gmra.mrb[0].mxu0 %v10021_v19  ;;  %2456 = vmatpush1.bf16.msra.mxu1 %v8228_v47  ;;  %v8261_v47 = vld [vmem:[#allocation8 + $0x248] ss:$24 sps:$4 sm:$0xff]  }
 0x11d   :  { %590 = vmatpush1.bf16.msra.mxu0 %v8139_v20  ;;  %621 = vmatprep.mubr.bf16.mxu0 %v9760_v0  ;;  %v8195_v20 = vld [vmem:[#allocation8 + $0x38] ss:$24 sps:$4 sm:$0xff]   ;;  %p9708_p4 = pnand %p9707_p3, %p9701_p0 }
 0x11e   :  { %591 = vmatprep.subr.bf16.mxu0 %v8144_v21  ;;  %2457 = vmatprep.subr.bf16.mxu1 %v8229_v48  ;;  %v8203_v21 = vld [vmem:[#allocation8 + $0x6c] ss:$24 sps:$4 sm:$0xff]   ;;  %v8269_v48 = vld [vmem:[#allocation8 + $0x27c] ss:$24 sps:$4 sm:$0xff]  }
 0x120   :  { %2458 = vmatpush1.bf16.msra.mxu1 %v8234_v51  ;;  %v8273_v51 = vld [vmem:[#allocation8 + $0x2a8] ss:$24 sps:$4 sm:$0xff]  }
 0x121   :  { %592 = vmatpush1.bf16.msra.mxu0 %v8142_v23  ;;  %2459 = vmatprep.subr.bf16.mxu1 %v8235_v52  ;;  %v8209_v23 = vld [vmem:[#allocation8 + $0x9c] ss:$24 sps:$4 sm:$0xff]  }
 0x122   :  { %593 = vmatprep.subr.bf16.mxu0 %v8147_v26  ;;  %v8213_v26 = vld [vmem:[#allocation8 + $0xc8] ss:$24 sps:$4 sm:$0xff]   ;;  %v8281_v52 = vld [vmem:[#allocation8 + $0x2dc] ss:$24 sps:$4 sm:$0xff]  }
 0x124   :  { %2460 = vmatpush1.bf16.msra.mxu1 %v8240_v55  ;;  %v278_v55 = vlaneseq }
 0x125   :  { %594 = vmatpush1.bf16.msra.mxu0 %v8145_v29  ;;  %2461 = vmatprep.subr.bf16.mxu1 %v8241_v56  ;;  %v8271_v29 = vld [vmem:[#allocation8 + $0x2a4] ss:$24 sps:$4 sm:$0xff]  }
 0x126   :  { %595 = vmatprep.subr.bf16.mxu0 %v8150_v30  ;;  %v8227_v30 = vld [vmem:[#allocation8 + $0x12c] ss:$24 sps:$4 sm:$0xff]   ;;  %v10028_v56 = vshrl.u32 %v278_v55, 7  ;;  %v8337_v55 = vld [vmem:[#allocation8 + $0x4b0] ss:$24 sps:$4 sm:$0xff]  }
 0x128   :  { %2462 = vmatpush1.bf16.msra.mxu1 %v8246_v60 }
 0x129   :  { %596 = vmatpush1.bf16.msra.mxu0 %v8148_v33  ;;  %2463 = vmatprep.subr.bf16.mxu1 %v8247_v61  ;;  %v8277_v33 = vld [vmem:[#allocation8 + $0x2d4] ss:$24 sps:$4 sm:$0xff]  }
 0x12a   :  { %597 = vmatprep.subr.bf16.mxu0 %v8153_v34  ;;  %v8233_v34 = vld [vmem:[#allocation8 + $0x15c] ss:$24 sps:$4 sm:$0xff]  }
 0x12c   :  { %2464 = vmatpush1.bf16.msra.mxu1 %v8252_v63 }
 0x12d   :  { %598 = vmatpush1.bf16.msra.mxu0 %v8151_v37  ;;  %2465 = vmatprep.subr.bf16.mxu1 %v8253_v1  ;;  %v8285_v37 = vld [vmem:[#allocation8 + $0x304] ss:$24 sps:$4 sm:$0xff]  }
 0x12e   :  { %599 = vmatprep.subr.bf16.mxu0 %v8156_v38  ;;  %v8239_v38 = vld [vmem:[#allocation8 + $0x18c] ss:$24 sps:$4 sm:$0xff]  }
 0x130   :  { %2466 = vmatpush1.bf16.msra.mxu1 %v8258_v4 }
 0x131   :  { %600 = vmatpush1.bf16.msra.mxu0 %v8154_v41  ;;  %2467 = vmatprep.subr.bf16.mxu1 %v8259_v5  ;;  %v8243_v41 = vld [vmem:[#allocation8 + $0x1b8] ss:$24 sps:$4 sm:$0xff]  }
 0x132   :  { %601 = vmatprep.subr.bf16.mxu0 %v8159_v42  ;;  %v8251_v42 = vld [vmem:[#allocation8 + $0x1ec] ss:$24 sps:$4 sm:$0xff]  }
 0x134   :  { %2468 = vmatpush1.bf16.msra.mxu1 %v8264_v8  ;;  %v8286_v8 = vld [vmem:[#allocation8 + $0x308] ss:$24 sps:$4 sm:$0xff]  }
 0x135   :  { %602 = vmatpush1.bf16.msra.mxu0 %v8157_v45  ;;  %2469 = vmatprep.subr.bf16.mxu1 %v8265_v9  ;;  %v8255_v45 = vld [vmem:[#allocation8 + $0x218] ss:$24 sps:$4 sm:$0xff]   ;;  %v8291_v9 = vld [vmem:[#allocation8 + $0x334] ss:$24 sps:$4 sm:$0xff]  }
 0x136   :  { %603 = vmatprep.subr.bf16.mxu0 %v8162_v46  ;;  %v8263_v46 = vld [vmem:[#allocation8 + $0x24c] ss:$24 sps:$4 sm:$0xff]  }
 0x138   :  { %2470 = vmatpush1.bf16.msra.mxu1 %v8270_v12  ;;  %v8294_v12 = vld [vmem:[#allocation8 + $0x33c] ss:$24 sps:$4 sm:$0xff]  }
 0x139   :  { %604 = vmatpush1.bf16.msra.mxu0 %v8160_v49  ;;  %2471 = vmatprep.subr.bf16.mxu1 %v8271_v29  ;;  %v8267_v49 = vld [vmem:[#allocation8 + $0x278] ss:$24 sps:$4 sm:$0xff]   ;;  %v8318_v29 = vld [vmem:[#allocation8 + $0x3fc] ss:$24 sps:$4 sm:$0xff]  }
 0x13a   :  { %630 = vmatprep.subr.bf16.mxu0 %v8165_v50  ;;  %v8275_v50 = vld [vmem:[#allocation8 + $0x2ac] ss:$24 sps:$4 sm:$0xff]  }
 0x13c   :  { %622 = vmatmul.mubr.bf16.vlgmr.msra.gmra.mrb[4].mxu0 %v10021_v19  ;;  %2472 = vmatpush1.bf16.msra.mxu1 %v8276_v31  ;;  %v8316_v31 = vld [vmem:[#allocation8 + $0x3f8] ss:$24 sps:$4 sm:$0xff]  }
 0x13d   :  { %631 = vmatpush1.bf16.msra.mxu0 %v8163_v53  ;;  %662 = vmatprep.mubr.bf16.mxu0 %v9760_v0  ;;  %v8279_v53 = vld [vmem:[#allocation8 + $0x2d8] ss:$24 sps:$4 sm:$0xff]  }
 0x13e   :  { %632 = vmatprep.subr.bf16.mxu0 %v8168_v54  ;;  %2473 = vmatprep.subr.bf16.mxu1 %v8277_v33  ;;  %v8288_v54 = vld [vmem:[#allocation8 + $0x30c] ss:$24 sps:$4 sm:$0xff]  }
 0x13f   :  { %v8324_v33 = vld [vmem:[#allocation8 + $0x42c] ss:$24 sps:$4 sm:$0xff]  }
 0x140   :  { %2474 = vmatpush1.bf16.msra.mxu1 %v8282_v35  ;;  %v8319_v35 = vld [vmem:[#allocation8 + $0x420] ss:$24 sps:$4 sm:$0xff]  }
 0x141   :  { %633 = vmatpush1.bf16.msra.mxu0 %v8166_v57  ;;  %2484 = vmatprep.subr.bf16.mxu1 %v8285_v37  ;;  %v10031_v57 = vsub.s32 0, %v10028_v56  ;;  %v8327_v37 = vld [vmem:[#allocation8 + $0x454] ss:$24 sps:$4 sm:$0xff]  }
 0x142   :  { %634 = vmatprep.subr.bf16.mxu0 %v8171_v58  ;;  %v10033_v58 = vld [vmem:[#allocation7] sm:$0x3f] }
 0x143   :  { %v281_v60 = vrot.slane %v10033_v58, %v10031_v57 }
 0x145   :  { %635 = vmatpush1.bf16.msra.mxu0 %v8169_v59  ;;  %v10036_v59 = vsub.s32 1, %v10028_v56 }
 0x146   :  { %636 = vmatprep.subr.bf16.mxu0 %v8174_v62 }
 0x147   :  { %v285_v61 = vrot.slane %v10033_v58, %v10036_v59 }
 0x149   :  { %637 = vmatpush1.bf16.msra.mxu0 %v8172_v2 }
 0x14a   :  { %638 = vmatprep.subr.bf16.mxu0 %v8177_v3 }
 0x14d   :  { %639 = vmatpush1.bf16.msra.mxu0 %v8175_v6 }
 0x14e   :  { %640 = vmatprep.subr.bf16.mxu0 %v8180_v7  ;;  %v8283_v7 = vld [vmem:[#allocation8 + $0x300] ss:$24 sps:$4 sm:$0xff]  }
 0x151   :  { %641 = vmatpush1.bf16.msra.mxu0 %v8178_v10 }
 0x152   :  { %642 = vmatprep.subr.bf16.mxu0 %v8183_v11 }
 0x155   :  { %643 = vmatpush1.bf16.msra.mxu0 %v8181_v13  ;;  %v8289_v13 = vld [vmem:[#allocation8 + $0x330] ss:$24 sps:$4 sm:$0xff]  }
 0x156   :  { %644 = vmatprep.subr.bf16.mxu0 %v8186_v14  ;;  %v8292_v14 = vld [vmem:[#allocation8 + $0x338] ss:$24 sps:$4 sm:$0xff]  }
 0x159   :  { %645 = vmatpush1.bf16.msra.mxu0 %v8184_v15  ;;  %v8297_v15 = vld [vmem:[#allocation8 + $0x364] ss:$24 sps:$4 sm:$0xff]  }
 0x15a   :  { %2566 = vmatprep.subr.bf16.mxu0 %v8191_v16  ;;  %v8300_v16 = vld [vmem:[#allocation8 + $0x36c] ss:$24 sps:$4 sm:$0xff]  }
 0x15c   :  { %663 = vmatmul.mubr.bf16.vlgmr.msra.gmra.mrb[8].mxu0 %v10021_v19 }
 0x15d   :  { %2567 = vmatpush1.bf16.msra.mxu0 %v8189_v17  ;;  %v8295_v17 = vld [vmem:[#allocation8 + $0x360] ss:$24 sps:$4 sm:$0xff]  }
 0x15e   :  { %2568 = vmatprep.subr.bf16.mxu0 %v8197_v18  ;;  %v8298_v18 = vld [vmem:[#allocation8 + $0x368] ss:$24 sps:$4 sm:$0xff]  }
 0x161   :  { %2569 = vmatpush1.bf16.msra.mxu0 %v8195_v20  ;;  %v8303_v20 = vld [vmem:[#allocation8 + $0x394] ss:$24 sps:$4 sm:$0xff]  }
 0x162   :  { %2570 = vmatprep.subr.bf16.mxu0 %v8203_v21  ;;  %v8306_v21 = vld [vmem:[#allocation8 + $0x39c] ss:$24 sps:$4 sm:$0xff]  }
 0x165   :  { %2571 = vmatpush1.bf16.msra.mxu0 %v8201_v22  ;;  %v8301_v22 = vld [vmem:[#allocation8 + $0x390] ss:$24 sps:$4 sm:$0xff]  }
 0x166   :  { %2572 = vmatprep.subr.bf16.mxu0 %v8209_v23  ;;  %v8304_v23 = vld [vmem:[#allocation8 + $0x398] ss:$24 sps:$4 sm:$0xff]  }
 0x169   :  { %2573 = vmatpush1.bf16.msra.mxu0 %v8207_v24  ;;  %v8309_v24 = vld [vmem:[#allocation8 + $0x3c4] ss:$24 sps:$4 sm:$0xff]  }
 0x16a   :  { %2574 = vmatprep.subr.bf16.mxu0 %v8215_v25  ;;  %v8312_v25 = vld [vmem:[#allocation8 + $0x3cc] ss:$24 sps:$4 sm:$0xff]  }
 0x16d   :  { %2575 = vmatpush1.bf16.msra.mxu0 %v8213_v26  ;;  %v8307_v26 = vld [vmem:[#allocation8 + $0x3c0] ss:$24 sps:$4 sm:$0xff]  }
 0x16e   :  { %2576 = vmatprep.subr.bf16.mxu0 %v8221_v27  ;;  %v8310_v27 = vld [vmem:[#allocation8 + $0x3c8] ss:$24 sps:$4 sm:$0xff]  }
 0x171   :  { %2577 = vmatpush1.bf16.msra.mxu0 %v8219_v28  ;;  %v8315_v28 = vld [vmem:[#allocation8 + $0x3f4] ss:$24 sps:$4 sm:$0xff]  }
 0x172   :  { %2578 = vmatprep.subr.bf16.mxu0 %v8227_v30  ;;  %v8313_v30 = vld [vmem:[#allocation8 + $0x3f0] ss:$24 sps:$4 sm:$0xff]  }
 0x175   :  { %2579 = vmatpush1.bf16.msra.mxu0 %v8225_v32  ;;  %v8321_v32 = vld [vmem:[#allocation8 + $0x424] ss:$24 sps:$4 sm:$0xff]  }
 0x176   :  { %2580 = vmatprep.subr.bf16.mxu0 %v8233_v34  ;;  %v10051_v34 = vsub.s32 3, %v10028_v56 }
 0x179   :  { %2581 = vmatpush1.bf16.msra.mxu0 %v8231_v36  ;;  %v8322_v36 = vld [vmem:[#allocation8 + $0x428] ss:$24 sps:$4 sm:$0xff]  }
 0x17a   :  { %2582 = vmatprep.subr.bf16.mxu0 %v8239_v38  ;;  %v8330_v38 = vld [vmem:[#allocation8 + $0x45c] ss:$24 sps:$4 sm:$0xff]  }
 0x17d   :  { %2583 = vmatpush1.bf16.msra.mxu0 %v8237_v39  ;;  %v293_v39 = vrot.slane %v10033_v58, %v10051_v34 }
 0x17e   :  { %2584 = vmatprep.subr.bf16.mxu0 %v8245_v40  ;;  %v8325_v40 = vld [vmem:[#allocation8 + $0x450] ss:$24 sps:$4 sm:$0xff]  }
 0x181   :  { %2585 = vmatpush1.bf16.msra.mxu0 %v8243_v41  ;;  %v8328_v41 = vld [vmem:[#allocation8 + $0x458] ss:$24 sps:$4 sm:$0xff]  }
 0x182   :  { %2586 = vmatprep.subr.bf16.mxu0 %v8251_v42 }
 0x185   :  { %2587 = vmatpush1.bf16.msra.mxu0 %v8249_v43 }
 0x186   :  { %2588 = vmatprep.subr.bf16.mxu0 %v8257_v44  ;;  %v8333_v44 = vld [vmem:[#allocation8 + $0x484] ss:$24 sps:$4 sm:$0xff]  }
 0x189   :  { %2589 = vmatpush1.bf16.msra.mxu0 %v8255_v45  ;;  %v8336_v45 = vld [vmem:[#allocation8 + $0x48c] ss:$24 sps:$4 sm:$0xff]  }
 0x18a   :  { %2590 = vmatprep.subr.bf16.mxu0 %v8263_v46 }
 0x18d   :  { %2591 = vmatpush1.bf16.msra.mxu0 %v8261_v47 }
 0x18e   :  { %2592 = vmatprep.subr.bf16.mxu0 %v8269_v48 }
 0x191   :  { %2593 = vmatpush1.bf16.msra.mxu0 %v8267_v49  ;;  %v8331_v49 = vld [vmem:[#allocation8 + $0x480] ss:$24 sps:$4 sm:$0xff]  }
 0x192   :  { %2594 = vmatprep.subr.bf16.mxu0 %v8275_v50  ;;  %v8334_v50 = vld [vmem:[#allocation8 + $0x488] ss:$24 sps:$4 sm:$0xff]  }
 0x195   :  { %2595 = vmatpush1.bf16.msra.mxu0 %v8273_v51 }
 0x196   :  { %2596 = vmatprep.subr.bf16.mxu0 %v8281_v52  ;;  %v8339_v52 = vld [vmem:[#allocation8 + $0x4b4] ss:$24 sps:$4 sm:$0xff]  }
 0x199   :  { %2597 = vmatpush1.bf16.msra.mxu0 %v8279_v53  ;;  %v8342_v53 = vld [vmem:[#allocation8 + $0x4bc] ss:$24 sps:$4 sm:$0xff]  }
 0x19a   :  { %2607 = vmatprep.subr.bf16.mxu0 %v8288_v54 }
 0x1ef   :  { %v582_v62 = vpop.f32.mrb[0].mxu0 }
 0x1f0   :  { %v583_v63 = vadd.f32 %v582_v62, %v281_v60  ;;  %v584_v1 = vpop.f32.mrb[1].mxu0  ;;  %v8340_v60 = vld [vmem:[#allocation8 + $0x4b8] ss:$24 sps:$4 sm:$0xff]   ;;  %v8348_v62 = vld [vmem:[#allocation8 + $0x4ec] ss:$24 sps:$4 sm:$0xff]  }
 0x1f1   :  { %v585_v2 = vadd.f32 %v584_v1, %v285_v61  ;;  %v586_v3 = vpop.f32.mrb[2].mxu0  ;;  %v8345_v61 = vld [vmem:[#allocation8 + $0x4e4] ss:$24 sps:$4 sm:$0xff]   ;;  %v8346_v1 = vld [vmem:[#allocation8 + $0x4e8] ss:$24 sps:$4 sm:$0xff]  }
 0x1f2   :  { %v671_v4 = vmax.f32 %v583_v63, 0.0  ;;  %v587_v5 = vpop.f32.mrb[3].mxu0  ;;  %v8343_v63 = vld [vmem:[#allocation8 + $0x4e0] ss:$24 sps:$4 sm:$0xff]   ;;  %v8354_v3 = vld [vmem:[#allocation8 + $0x51c] ss:$24 sps:$4 sm:$0xff]  }
 0x1f3   :  { %v672_v6 = vmax.f32 %v585_v2, 0.0  ;;  %v8351_v2 = vld [vmem:[#allocation8 + $0x514] ss:$24 sps:$4 sm:$0xff]   ;;  %v8352_v5 = vld [vmem:[#allocation8 + $0x518] ss:$24 sps:$4 sm:$0xff]  }
 0x1f4   :  { %v10044_v11 = vpack.c.bf16 %v671_v4, %v671_v4  ;;  %v8349_v4 = vld [vmem:[#allocation8 + $0x510] ss:$24 sps:$4 sm:$0xff]  }
 0x1f5   :  { %v10042_v10 = vpack.c.bf16 %v672_v6, %v672_v6  ;;  %v8357_v6 = vld [vmem:[#allocation8 + $0x544] ss:$24 sps:$4 sm:$0xff]  }
 0x1f7   :  { %2475 = vmatprep.mubr.bf16.mxu1 %v10042_v10  ;;  %2598 = vmatprep.mubr.bf16.mxu0 %v10042_v10 }
 0x1f8   :  { %2476 = vmatmul.mubr.bf16.vlgmr.msra.gmra.mrb[0].mxu1 %v10044_v11  ;;  %2599 = vmatmul.mubr.bf16.vlgmr.msra.gmra.mrb[12].mxu0 %v10044_v11 }
 0x1f9   :  { %2485 = vmatpush1.bf16.msra.mxu1 %v8283_v7  ;;  %2608 = vmatpush1.bf16.msra.mxu0 %v8286_v8  ;;  %v8360_v7 = vld [vmem:[#allocation8 + $0x54c] ss:$24 sps:$4 sm:$0xff]   ;;  %v8355_v8 = vld [vmem:[#allocation8 + $0x540] ss:$24 sps:$4 sm:$0xff]  }
 0x1fa   :  { %2486 = vmatprep.subr.bf16.mxu1 %v8291_v9  ;;  %2609 = vmatprep.subr.bf16.mxu0 %v8294_v12  ;;  %v8358_v9 = vld [vmem:[#allocation8 + $0x548] ss:$24 sps:$4 sm:$0xff]   ;;  %v10062_v12 = vsub.s32 2, %v10028_v56 }
 0x1fd   :  { %2487 = vmatpush1.bf16.msra.mxu1 %v8289_v13  ;;  %2610 = vmatpush1.bf16.msra.mxu0 %v8292_v14  ;;  %v8363_v13 = vld [vmem:[#allocation8 + $0x574] ss:$24 sps:$4 sm:$0xff]  }
 0x1fe   :  { %2488 = vmatprep.subr.bf16.mxu1 %v8297_v15  ;;  %2611 = vmatprep.subr.bf16.mxu0 %v8300_v16  ;;  %v8366_v14 = vld [vmem:[#allocation8 + $0x57c] ss:$24 sps:$4 sm:$0xff]   ;;  %v8361_v15 = vld [vmem:[#allocation8 + $0x570] ss:$24 sps:$4 sm:$0xff]  }
 0x1ff   :  { %v8364_v16 = vld [vmem:[#allocation8 + $0x578] ss:$24 sps:$4 sm:$0xff]  }
 0x201   :  { %2489 = vmatpush1.bf16.msra.mxu1 %v8295_v17  ;;  %2612 = vmatpush1.bf16.msra.mxu0 %v8298_v18  ;;  %v289_v17 = vrot.slane %v10033_v58, %v10062_v12  ;;  %v8369_v18 = vld [vmem:[#allocation8 + $0x5a4] ss:$24 sps:$4 sm:$0xff]  }
 0x202   :  { %2490 = vmatprep.subr.bf16.mxu1 %v8303_v20  ;;  %2613 = vmatprep.subr.bf16.mxu0 %v8306_v21  ;;  %v8372_v20 = vld [vmem:[#allocation8 + $0x5ac] ss:$24 sps:$4 sm:$0xff]   ;;  %v10067_v21 = vsub.s32 5, %v10028_v56 }
 0x205   :  { %2491 = vmatpush1.bf16.msra.mxu1 %v8301_v22  ;;  %2614 = vmatpush1.bf16.msra.mxu0 %v8304_v23  ;;  %v8367_v22 = vld [vmem:[#allocation8 + $0x5a0] ss:$24 sps:$4 sm:$0xff]  }
 0x206   :  { %2492 = vmatprep.subr.bf16.mxu1 %v8309_v24  ;;  %2615 = vmatprep.subr.bf16.mxu0 %v8312_v25  ;;  %v8370_v23 = vld [vmem:[#allocation8 + $0x5a8] ss:$24 sps:$4 sm:$0xff]   ;;  %v8375_v25 = vld [vmem:[#allocation8 + $0x5d4] ss:$24 sps:$4 sm:$0xff]  }
 0x209   :  { %2493 = vmatpush1.bf16.msra.mxu1 %v8307_v26  ;;  %2616 = vmatpush1.bf16.msra.mxu0 %v8310_v27  ;;  %v8378_v26 = vld [vmem:[#allocation8 + $0x5dc] ss:$24 sps:$4 sm:$0xff]   ;;  %v301_v27 = vrot.slane %v10033_v58, %v10067_v21 }
 0x20a   :  { %2494 = vmatprep.subr.bf16.mxu1 %v8315_v28  ;;  %2617 = vmatprep.subr.bf16.mxu0 %v8318_v29  ;;  %v8373_v28 = vld [vmem:[#allocation8 + $0x5d0] ss:$24 sps:$4 sm:$0xff]  }
 0x20b   :  { %v8376_v29 = vld [vmem:[#allocation8 + $0x5d8] ss:$24 sps:$4 sm:$0xff]  }
 0x20d   :  { %2495 = vmatpush1.bf16.msra.mxu1 %v8313_v30  ;;  %2618 = vmatpush1.bf16.msra.mxu0 %v8316_v31 }
 0x20e   :  { %2496 = vmatprep.subr.bf16.mxu1 %v8321_v32  ;;  %2619 = vmatprep.subr.bf16.mxu0 %v8324_v33  ;;  %v8381_v33 = vld [vmem:[#allocation8 + $0x604] ss:$24 sps:$4 sm:$0xff]  }
 0x20f   :  { %v10055_v42 = vpop.f32.mrb[4].mxu0 }
 0x210   :  { %v625_v43 = vpop.f32.mrb[5].mxu0  ;;  %v624_v24 = vadd.f32 %v10055_v42, %v289_v17  ;;  %v8387_v42 = vld [vmem:[#allocation8 + $0x634] ss:$24 sps:$4 sm:$0xff]  }
 0x211   :  { %2497 = vmatpush1.bf16.msra.mxu1 %v8319_v35  ;;  %2620 = vmatpush1.bf16.msra.mxu0 %v8322_v36  ;;  %v626_v46 = vadd.f32 %v625_v43, %v293_v39  ;;  %v627_v47 = vpop.f32.mrb[6].mxu0  ;;  %v8384_v35 = vld [vmem:[#allocation8 + $0x60c] ss:$24 sps:$4 sm:$0xff]   ;;  %v8379_v39 = vld [vmem:[#allocation8 + $0x600] ss:$24 sps:$4 sm:$0xff]  }
 0x212   :  { %2498 = vmatprep.subr.bf16.mxu1 %v8327_v37  ;;  %2621 = vmatprep.subr.bf16.mxu0 %v8330_v38  ;;  %v628_v48 = vpop.f32.mrb[7].mxu0  ;;  %v673_v31 = vmax.f32 %v624_v24, 0.0  ;;  %v8390_v43 = vld [vmem:[#allocation8 + $0x63c] ss:$24 sps:$4 sm:$0xff]   ;;  %v8432_v17 = vld [vmem:[#allocation8 + $0x78c] ss:$24 sps:$4 sm:$0xff]  }
 0x213   :  { %v674_v51 = vmax.f32 %v626_v46, 0.0  ;;  %v8393_v47 = vld [vmem:[#allocation8 + $0x664] ss:$24 sps:$4 sm:$0xff]   ;;  %v8433_v24 = vld [vmem:[#allocation8 + $0x7b0] ss:$24 sps:$4 sm:$0xff]  }
 0x214   :  { %v8396_v48 = vld [vmem:[#allocation8 + $0x66c] ss:$24 sps:$4 sm:$0xff]  }
 0x215   :  { %2499 = vmatpush1.bf16.msra.mxu1 %v8325_v40  ;;  %2622 = vmatpush1.bf16.msra.mxu0 %v8328_v41  ;;  %v10057_v54 = vpack.c.bf16 %v674_v51, %v674_v51  ;;  %v8382_v40 = vld [vmem:[#allocation8 + $0x608] ss:$24 sps:$4 sm:$0xff]   ;;  %v10074_v41 = vpack.c.bf16 %v673_v31, %v673_v31  ;;  %v8399_v51 = vld [vmem:[#allocation8 + $0x694] ss:$24 sps:$4 sm:$0xff]  }
 0x216   :  { %2500 = vmatprep.subr.bf16.mxu1 %v8333_v44  ;;  %2623 = vmatprep.subr.bf16.mxu0 %v8336_v45  ;;  %v8385_v44 = vld [vmem:[#allocation8 + $0x630] ss:$24 sps:$4 sm:$0xff]   ;;  %v8447_v31 = vld [vmem:[#allocation8 + $0x814] ss:$24 sps:$4 sm:$0xff]  }
 0x217   :  { %2516 = vmatprep.mubr.bf16.mxu1 %v10057_v54  ;;  %2639 = vmatprep.mubr.bf16.mxu0 %v10057_v54  ;;  %v8388_v45 = vld [vmem:[#allocation8 + $0x638] ss:$24 sps:$4 sm:$0xff]  }
 0x219   :  { %2501 = vmatpush1.bf16.msra.mxu1 %v8331_v49  ;;  %2624 = vmatpush1.bf16.msra.mxu0 %v8334_v50  ;;  %v8391_v49 = vld [vmem:[#allocation8 + $0x660] ss:$24 sps:$4 sm:$0xff]  }
 0x21a   :  { %2502 = vmatprep.subr.bf16.mxu1 %v8339_v52  ;;  %2625 = vmatprep.subr.bf16.mxu0 %v8342_v53  ;;  %v8394_v50 = vld [vmem:[#allocation8 + $0x668] ss:$24 sps:$4 sm:$0xff]   ;;  %v8402_v52 = vld [vmem:[#allocation8 + $0x69c] ss:$24 sps:$4 sm:$0xff]  }
 0x21b   :  { %v8397_v53 = vld [vmem:[#allocation8 + $0x690] ss:$24 sps:$4 sm:$0xff]  }
 0x21d   :  { %2503 = vmatpush1.bf16.msra.mxu1 %v8337_v55  ;;  %2626 = vmatpush1.bf16.msra.mxu0 %v8340_v60  ;;  %v8400_v55 = vld [vmem:[#allocation8 + $0x698] ss:$24 sps:$4 sm:$0xff]   ;;  %v8405_v60 = vld [vmem:[#allocation8 + $0x6c4] ss:$24 sps:$4 sm:$0xff]  }
 0x21e   :  { %2504 = vmatprep.subr.bf16.mxu1 %v8345_v61  ;;  %2627 = vmatprep.subr.bf16.mxu0 %v8348_v62  ;;  %v8408_v61 = vld [vmem:[#allocation8 + $0x6cc] ss:$24 sps:$4 sm:$0xff]   ;;  %v8403_v62 = vld [vmem:[#allocation8 + $0x6c0] ss:$24 sps:$4 sm:$0xff]  }
 0x221   :  { %2505 = vmatpush1.bf16.msra.mxu1 %v8343_v63  ;;  %2628 = vmatpush1.bf16.msra.mxu0 %v8346_v1  ;;  %v8406_v63 = vld [vmem:[#allocation8 + $0x6c8] ss:$24 sps:$4 sm:$0xff]   ;;  %v8411_v1 = vld [vmem:[#allocation8 + $0x6f4] ss:$24 sps:$4 sm:$0xff]  }
 0x222   :  { %2506 = vmatprep.subr.bf16.mxu1 %v8351_v2  ;;  %2629 = vmatprep.subr.bf16.mxu0 %v8354_v3  ;;  %v8414_v2 = vld [vmem:[#allocation8 + $0x6fc] ss:$24 sps:$4 sm:$0xff]   ;;  %v8409_v3 = vld [vmem:[#allocation8 + $0x6f0] ss:$24 sps:$4 sm:$0xff]  }
 0x225   :  { %2507 = vmatpush1.bf16.msra.mxu1 %v8349_v4  ;;  %2630 = vmatpush1.bf16.msra.mxu0 %v8352_v5  ;;  %v8412_v4 = vld [vmem:[#allocation8 + $0x6f8] ss:$24 sps:$4 sm:$0xff]   ;;  %v8417_v5 = vld [vmem:[#allocation8 + $0x724] ss:$24 sps:$4 sm:$0xff]  }
 0x226   :  { %2508 = vmatprep.subr.bf16.mxu1 %v8357_v6  ;;  %2631 = vmatprep.subr.bf16.mxu0 %v8360_v7  ;;  %v8420_v6 = vld [vmem:[#allocation8 + $0x72c] ss:$24 sps:$4 sm:$0xff]   ;;  %v8415_v7 = vld [vmem:[#allocation8 + $0x720] ss:$24 sps:$4 sm:$0xff]  }
 0x229   :  { %2509 = vmatpush1.bf16.msra.mxu1 %v8355_v8  ;;  %2632 = vmatpush1.bf16.msra.mxu0 %v8358_v9  ;;  %v8418_v8 = vld [vmem:[#allocation8 + $0x728] ss:$24 sps:$4 sm:$0xff]   ;;  %v8423_v9 = vld [vmem:[#allocation8 + $0x754] ss:$24 sps:$4 sm:$0xff]  }
 0x22a   :  { %2510 = vmatprep.subr.bf16.mxu1 %v8363_v13  ;;  %2633 = vmatprep.subr.bf16.mxu0 %v8366_v14  ;;  %v8426_v13 = vld [vmem:[#allocation8 + $0x75c] ss:$24 sps:$4 sm:$0xff]   ;;  %v8421_v14 = vld [vmem:[#allocation8 + $0x750] ss:$24 sps:$4 sm:$0xff]  }
 0x22d   :  { %2511 = vmatpush1.bf16.msra.mxu1 %v8361_v15  ;;  %2634 = vmatpush1.bf16.msra.mxu0 %v8364_v16  ;;  %v8424_v15 = vld [vmem:[#allocation8 + $0x758] ss:$24 sps:$4 sm:$0xff]   ;;  %v8429_v16 = vld [vmem:[#allocation8 + $0x784] ss:$24 sps:$4 sm:$0xff]  }
 0x22e   :  { %2512 = vmatprep.subr.bf16.mxu1 %v8369_v18  ;;  %2635 = vmatprep.subr.bf16.mxu0 %v8372_v20  ;;  %v8427_v18 = vld [vmem:[#allocation8 + $0x780] ss:$24 sps:$4 sm:$0xff]  }
 0x22f   :  { %v10072_v30 = vpop.f32.mrb[8].mxu0  ;;  %v8430_v20 = vld [vmem:[#allocation8 + $0x788] ss:$24 sps:$4 sm:$0xff]  }
 0x230   :  { %v666_v32 = vpop.f32.mrb[9].mxu0 }
 0x231   :  { %2513 = vmatpush1.bf16.msra.mxu1 %v8367_v22  ;;  %2636 = vmatpush1.bf16.msra.mxu0 %v8370_v23  ;;  %v667_v36 = vadd.f32 %v666_v32, %v301_v27  ;;  %v668_v37 = vpop.f32.mrb[10].mxu0  ;;  %v8435_v22 = vld [vmem:[#allocation8 + $0x7b4] ss:$24 sps:$4 sm:$0xff]  }
 0x232   :  { %2514 = vmatprep.subr.bf16.mxu1 %v8375_v25  ;;  %2637 = vmatprep.subr.bf16.mxu0 %v8378_v26  ;;  %v669_v38 = vpop.f32.mrb[11].mxu0  ;;  %v8438_v23 = vld [vmem:[#allocation8 + $0x7bc] ss:$24 sps:$4 sm:$0xff]   ;;  %v8436_v25 = vld [vmem:[#allocation8 + $0x7b8] ss:$24 sps:$4 sm:$0xff]  }
 0x233   :  { %v676_v58 = vmax.f32 %v667_v36, 0.0  ;;  %v8441_v26 = vld [vmem:[#allocation8 + $0x7e4] ss:$24 sps:$4 sm:$0xff]   ;;  %v8451_v38 = vld [vmem:[#allocation8 + $0x840] ss:$24 sps:$4 sm:$0xff]  }
 0x234   :  { %v8444_v27 = vld [vmem:[#allocation8 + $0x7ec] ss:$24 sps:$4 sm:$0xff]   ;;  %v8450_v32 = vld [vmem:[#allocation8 + $0x81c] ss:$24 sps:$4 sm:$0xff]  }
 0x235   :  { %2515 = vmatpush1.bf16.msra.mxu1 %v8373_v28  ;;  %2638 = vmatpush1.bf16.msra.mxu0 %v8376_v29  ;;  %v10076_v46 = vpack.c.bf16 %v676_v58, %v676_v58  ;;  %v8439_v28 = vld [vmem:[#allocation8 + $0x7e0] ss:$24 sps:$4 sm:$0xff]   ;;  %v8453_v36 = vld [vmem:[#allocation8 + $0x844] ss:$24 sps:$4 sm:$0xff]   ;;  %v8459_v58 = vld [vmem:[#allocation8 + $0x874] ss:$24 sps:$4 sm:$0xff]  }
 0x236   :  { %2525 = vmatprep.subr.bf16.mxu1 %v8381_v33  ;;  %2648 = vmatprep.subr.bf16.mxu0 %v8384_v35  ;;  %v8442_v29 = vld [vmem:[#allocation8 + $0x7e8] ss:$24 sps:$4 sm:$0xff]   ;;  %v8448_v35 = vld [vmem:[#allocation8 + $0x818] ss:$24 sps:$4 sm:$0xff]   ;;  %v8456_v37 = vld [vmem:[#allocation8 + $0x84c] ss:$24 sps:$4 sm:$0xff]  }
 0x237   :  { %v8445_v33 = vld [vmem:[#allocation8 + $0x810] ss:$24 sps:$4 sm:$0xff]  }
 0x238   :  { %2517 = vmatmul.mubr.bf16.vlgmr.msra.gmra.mrb[0].mxu1 %v10074_v41  ;;  %2640 = vmatmul.mubr.bf16.vlgmr.msra.gmra.mrb[12].mxu0 %v10074_v41 }
 0x239   :  { %2526 = vmatpush1.bf16.msra.mxu1 %v8379_v39  ;;  %2649 = vmatpush1.bf16.msra.mxu0 %v8382_v40  ;;  %v8454_v39 = vld [vmem:[#allocation8 + $0x848] ss:$24 sps:$4 sm:$0xff]   ;;  %v10083_v40 = vsub.s32 4, %v10028_v56 }
 0x23a   :  { %2527 = vmatprep.subr.bf16.mxu1 %v8387_v42  ;;  %2650 = vmatprep.subr.bf16.mxu0 %v8390_v43  ;;  %v8462_v42 = vld [vmem:[#allocation8 + $0x87c] ss:$24 sps:$4 sm:$0xff]   ;;  %v8457_v43 = vld [vmem:[#allocation8 + $0x870] ss:$24 sps:$4 sm:$0xff]  }
 0x23b   :  { %2557 = vmatprep.mubr.bf16.mxu1 %v10076_v46  ;;  %2680 = vmatprep.mubr.bf16.mxu0 %v10076_v46  ;;  %v8466_v56 = vld [vmem:[#allocation8 + $0x8a8] ss:$24 sps:$4 sm:$0xff]  }
 0x23d   :  { %2528 = vmatpush1.bf16.msra.mxu1 %v8385_v44  ;;  %2651 = vmatpush1.bf16.msra.mxu0 %v8388_v45  ;;  %v8460_v44 = vld [vmem:[#allocation8 + $0x878] ss:$24 sps:$4 sm:$0xff]  }
 0x23e   :  { %2529 = vmatprep.subr.bf16.mxu1 %v8393_v47  ;;  %2652 = vmatprep.subr.bf16.mxu0 %v8396_v48  ;;  %v9391_v45 = vld [vmem:[#allocation7] sm:$0x3f] }
 0x23f   :  { %v297_v47 = vrot.slane %v9391_v45, %v10083_v40  ;;  %v8465_v48 = vld [vmem:[#allocation8 + $0x8a4] ss:$24 sps:$4 sm:$0xff]   ;;  %v8514_v45 = vld [vmem:[#allocation8 + $0x280] ss:$24 sps:$4 sm:$0xff]  }
 0x241   :  { %2530 = vmatpush1.bf16.msra.mxu1 %v8391_v49  ;;  %2653 = vmatpush1.bf16.msra.mxu0 %v8394_v50  ;;  %v8468_v49 = vld [vmem:[#allocation8 + $0x8ac] ss:$24 sps:$4 sm:$0xff]   ;;  %v8463_v50 = vld [vmem:[#allocation8 + $0x8a0] ss:$24 sps:$4 sm:$0xff]  }
 0x242   :  { %2531 = vmatprep.subr.bf16.mxu1 %v8399_v51  ;;  %2654 = vmatprep.subr.bf16.mxu0 %v8402_v52  ;;  %v665_v51 = vadd.f32 %v10072_v30, %v297_v47  ;;  %v8471_v52 = vld [vmem:[#allocation8 + $0x8d4] ss:$24 sps:$4 sm:$0xff]   ;;  %v8480_v30 = vld [vmem:[#allocation8 + $0x44] ss:$24 sps:$4 sm:$0xff]  }
 0x243   :  { %v8628_v47 = vld [vmem:[#allocation11 + $0x60] ss:$8 sps:$4 sm:$0xff]  }
 0x245   :  { %2532 = vmatpush1.bf16.msra.mxu1 %v8397_v53  ;;  %2655 = vmatpush1.bf16.msra.mxu0 %v8400_v55  ;;  %v8474_v53 = vld [vmem:[#allocation8 + $0x8dc] ss:$24 sps:$4 sm:$0xff]   ;;  %v8469_v55 = vld [vmem:[#allocation8 + $0x8d0] ss:$24 sps:$4 sm:$0xff]  }
 0x246   :  { %2533 = vmatprep.subr.bf16.mxu1 %v8405_v60  ;;  %2656 = vmatprep.subr.bf16.mxu0 %v8408_v61  ;;  %v675_v60 = vmax.f32 %v665_v51, 0.0  ;;  %v8472_v61 = vld [vmem:[#allocation8 + $0x8d8] ss:$24 sps:$4 sm:$0xff]  }
 0x247   :  { %v8636_v51 = vld [vmem:[#allocation11 + $0x74] ss:$8 sps:$4 sm:$0xff]  }
 0x249   :  { %2534 = vmatpush1.bf16.msra.mxu1 %v8403_v62  ;;  %2657 = vmatpush1.bf16.msra.mxu0 %v8406_v63  ;;  %v8477_v62 = vld [vmem:[#allocation8 + $0x14] ss:$24 sps:$4 sm:$0xff]   ;;  %v8475_v63 = vld [vmem:[#allocation8 + $0x10] ss:$24 sps:$4 sm:$0xff]  }
 0x24a   :  { %2535 = vmatprep.subr.bf16.mxu1 %v8411_v1  ;;  %2658 = vmatprep.subr.bf16.mxu0 %v8414_v2  ;;  %v10087_v1 = vpack.c.bf16 %v675_v60, %v675_v60  ;;  %v8478_v2 = vld [vmem:[#allocation8 + $0x40] ss:$24 sps:$4 sm:$0xff]   ;;  %v8642_v60 = vld [vmem:[#allocation11 + $0x84] ss:$8 sps:$4 sm:$0xff]  }
 0x24d   :  { %2536 = vmatpush1.bf16.msra.mxu1 %v8409_v3  ;;  %2659 = vmatpush1.bf16.msra.mxu0 %v8412_v4  ;;  %v8483_v3 = vld [vmem:[#allocation8 + $0x74] ss:$24 sps:$4 sm:$0xff]   ;;  %v8481_v4 = vld [vmem:[#allocation8 + $0x70] ss:$24 sps:$4 sm:$0xff]  }
 0x24e   :  { %2537 = vmatprep.subr.bf16.mxu1 %v8417_v5  ;;  %2660 = vmatprep.subr.bf16.mxu0 %v8420_v6  ;;  %v8486_v5 = vld [vmem:[#allocation8 + $0xa4] ss:$24 sps:$4 sm:$0xff]   ;;  %v8484_v6 = vld [vmem:[#allocation8 + $0xa0] ss:$24 sps:$4 sm:$0xff]  }
 0x251   :  { %2538 = vmatpush1.bf16.msra.mxu1 %v8415_v7  ;;  %2661 = vmatpush1.bf16.msra.mxu0 %v8418_v8  ;;  %v8489_v7 = vld [vmem:[#allocation8 + $0xd4] ss:$24 sps:$4 sm:$0xff]   ;;  %v8487_v8 = vld [vmem:[#allocation8 + $0xd0] ss:$24 sps:$4 sm:$0xff]  }
 0x252   :  { %2539 = vmatprep.subr.bf16.mxu1 %v8423_v9  ;;  %2662 = vmatprep.subr.bf16.mxu0 %v8426_v13  ;;  %v8492_v9 = vld [vmem:[#allocation8 + $0x104] ss:$24 sps:$4 sm:$0xff]   ;;  %v8490_v13 = vld [vmem:[#allocation8 + $0x100] ss:$24 sps:$4 sm:$0xff]  }
 0x255   :  { %2540 = vmatpush1.bf16.msra.mxu1 %v8421_v14  ;;  %2663 = vmatpush1.bf16.msra.mxu0 %v8424_v15  ;;  %v8495_v14 = vld [vmem:[#allocation8 + $0x134] ss:$24 sps:$4 sm:$0xff]   ;;  %v8498_v15 = vld [vmem:[#allocation8 + $0x164] ss:$24 sps:$4 sm:$0xff]  }
 0x256   :  { %2541 = vmatprep.subr.bf16.mxu1 %v8429_v16  ;;  %2664 = vmatprep.subr.bf16.mxu0 %v8432_v17  ;;  %v8496_v16 = vld [vmem:[#allocation8 + $0x160] ss:$24 sps:$4 sm:$0xff]   ;;  %v8592_v17 = vld [vmem:[#allocation11] ss:$8 sps:$4 sm:$0xff]  }
 0x259   :  { %2542 = vmatpush1.bf16.msra.mxu1 %v8427_v18  ;;  %2665 = vmatpush1.bf16.msra.mxu0 %v8430_v20  ;;  %v8594_v18 = vld [vmem:[#allocation11 + $0x4] ss:$8 sps:$4 sm:$0xff]  }
 0x25a   :  { %2543 = vmatprep.subr.bf16.mxu1 %v8435_v22  ;;  %2666 = vmatprep.subr.bf16.mxu0 %v8438_v23  ;;  %v8501_v20 = vld [vmem:[#allocation8 + $0x194] ss:$24 sps:$4 sm:$0xff]   ;;  %v8499_v22 = vld [vmem:[#allocation8 + $0x190] ss:$24 sps:$4 sm:$0xff]  }
 0x25b   :  { %v8598_v23 = vld [vmem:[#allocation11 + $0x10] ss:$8 sps:$4 sm:$0xff]  }
 0x25d   :  { %2544 = vmatpush1.bf16.msra.mxu1 %v8433_v24  ;;  %2667 = vmatpush1.bf16.msra.mxu0 %v8436_v25  ;;  %v8600_v24 = vld [vmem:[#allocation11 + $0x14] ss:$8 sps:$4 sm:$0xff]  }
 0x25e   :  { %2545 = vmatprep.subr.bf16.mxu1 %v8441_v26  ;;  %2668 = vmatprep.subr.bf16.mxu0 %v8444_v27  ;;  %v8504_v25 = vld [vmem:[#allocation8 + $0x1c4] ss:$24 sps:$4 sm:$0xff]   ;;  %v8502_v26 = vld [vmem:[#allocation8 + $0x1c0] ss:$24 sps:$4 sm:$0xff]  }
 0x25f   :  { %v8604_v27 = vld [vmem:[#allocation11 + $0x20] ss:$8 sps:$4 sm:$0xff]  }
 0x261   :  { %2546 = vmatpush1.bf16.msra.mxu1 %v8439_v28  ;;  %2669 = vmatpush1.bf16.msra.mxu0 %v8442_v29  ;;  %v8606_v28 = vld [vmem:[#allocation11 + $0x24] ss:$8 sps:$4 sm:$0xff]  }
 0x262   :  { %2547 = vmatprep.subr.bf16.mxu1 %v8447_v31  ;;  %2670 = vmatprep.subr.bf16.mxu0 %v8450_v32  ;;  %v8507_v29 = vld [vmem:[#allocation8 + $0x1f4] ss:$24 sps:$4 sm:$0xff]   ;;  %v8505_v31 = vld [vmem:[#allocation8 + $0x1f0] ss:$24 sps:$4 sm:$0xff]  }
 0x263   :  { %v8610_v32 = vld [vmem:[#allocation11 + $0x30] ss:$8 sps:$4 sm:$0xff]  }
 0x265   :  { %2548 = vmatpush1.bf16.msra.mxu1 %v8445_v33  ;;  %2671 = vmatpush1.bf16.msra.mxu0 %v8448_v35  ;;  %v8612_v33 = vld [vmem:[#allocation11 + $0x34] ss:$8 sps:$4 sm:$0xff]  }
 0x266   :  { %2549 = vmatprep.subr.bf16.mxu1 %v8453_v36  ;;  %2672 = vmatprep.subr.bf16.mxu0 %v8456_v37  ;;  %v8510_v35 = vld [vmem:[#allocation8 + $0x224] ss:$24 sps:$4 sm:$0xff]   ;;  %v8508_v36 = vld [vmem:[#allocation8 + $0x220] ss:$24 sps:$4 sm:$0xff]  }
 0x267   :  { %v8616_v37 = vld [vmem:[#allocation11 + $0x40] ss:$8 sps:$4 sm:$0xff]  }
 0x269   :  { %2550 = vmatpush1.bf16.msra.mxu1 %v8451_v38  ;;  %2673 = vmatpush1.bf16.msra.mxu0 %v8454_v39  ;;  %v8618_v38 = vld [vmem:[#allocation11 + $0x44] ss:$8 sps:$4 sm:$0xff]  }
 0x26a   :  { %2551 = vmatprep.subr.bf16.mxu1 %v8459_v58  ;;  %2674 = vmatprep.subr.bf16.mxu0 %v8462_v42  ;;  %v8513_v39 = vld [vmem:[#allocation8 + $0x254] ss:$24 sps:$4 sm:$0xff]   ;;  %v8511_v58 = vld [vmem:[#allocation8 + $0x250] ss:$24 sps:$4 sm:$0xff]  }
 0x26b   :  { %v8622_v42 = vld [vmem:[#allocation11 + $0x50] ss:$8 sps:$4 sm:$0xff]  }
 0x26d   :  { %2552 = vmatpush1.bf16.msra.mxu1 %v8457_v43  ;;  %2675 = vmatpush1.bf16.msra.mxu0 %v8460_v44  ;;  %v8624_v43 = vld [vmem:[#allocation11 + $0x54] ss:$8 sps:$4 sm:$0xff]  }
 0x26e   :  { %2553 = vmatprep.subr.bf16.mxu1 %v8465_v48  ;;  %2676 = vmatprep.subr.bf16.mxu0 %v8468_v49  ;;  %v8516_v44 = vld [vmem:[#allocation8 + $0x284] ss:$24 sps:$4 sm:$0xff]   ;;  %v8630_v48 = vld [vmem:[#allocation11 + $0x64] ss:$8 sps:$4 sm:$0xff]  }
 0x26f   :  { %v8519_v49 = vld [vmem:[#allocation8 + $0x2b4] ss:$24 sps:$4 sm:$0xff]  }
 0x271   :  { %2554 = vmatpush1.bf16.msra.mxu1 %v8463_v50  ;;  %2677 = vmatpush1.bf16.msra.mxu0 %v8466_v56  ;;  %v8517_v50 = vld [vmem:[#allocation8 + $0x2b0] ss:$24 sps:$4 sm:$0xff]   ;;  %v8634_v56 = vld [vmem:[#allocation11 + $0x70] ss:$8 sps:$4 sm:$0xff]  }
 0x272   :  { %2555 = vmatprep.subr.bf16.mxu1 %v8471_v52  ;;  %2678 = vmatprep.subr.bf16.mxu0 %v8474_v53  ;;  %v8522_v52 = vld [vmem:[#allocation8 + $0x2e4] ss:$24 sps:$4 sm:$0xff]   ;;  %v8520_v53 = vld [vmem:[#allocation8 + $0x2e0] ss:$24 sps:$4 sm:$0xff]  }
 0x275   :  { %2556 = vmatpush1.bf16.msra.mxu1 %v8469_v55  ;;  %2679 = vmatpush1.bf16.msra.mxu0 %v8472_v61  ;;  %v8640_v55 = vld [vmem:[#allocation11 + $0x80] ss:$8 sps:$4 sm:$0xff]  }
 0x276   :  { %2689 = vmatprep.subr.bf16.mxu1 %v8477_v62  ;;  %3412 = vmatprep.subr.bf16.mxu0 %v8594_v18  ;;  %v8525_v61 = vld [vmem:[#allocation8 + $0x314] ss:$24 sps:$4 sm:$0xff]   ;;  %v8523_v62 = vld [vmem:[#allocation8 + $0x310] ss:$24 sps:$4 sm:$0xff]   ;;  %v8540_v18 = vld [vmem:[#allocation8 + $0x404] ss:$24 sps:$4 sm:$0xff]  }
 0x278   :  { %2558 = vmatmul.mubr.bf16.vlgmr.msra.gmra.mrb[0].mxu1 %v10087_v1  ;;  %2681 = vmatmul.mubr.bf16.vlgmr.msra.gmra.mrb[12].mxu0 %v10087_v1 }
 0x279   :  { %2690 = vmatpush1.bf16.msra.mxu1 %v8475_v63  ;;  %2721 = vmatprep.mubr.bf16.mxu1 %v10042_v10  ;;  %v8493_v10 = vld [vmem:[#allocation8 + $0x130] ss:$24 sps:$4 sm:$0xff]   ;;  %v8646_v63 = vld [vmem:[#allocation11 + $0x90] ss:$8 sps:$4 sm:$0xff]  }
 0x27a   :  { %2691 = vmatprep.subr.bf16.mxu1 %v8480_v30  ;;  %3413 = vmatpush1.bf16.msra.mxu0 %v8592_v17  ;;  %v8648_v30 = vld [vmem:[#allocation11 + $0x94] ss:$8 sps:$4 sm:$0xff]   ;;  %v8535_v17 = vld [vmem:[#allocation8 + $0x3d0] ss:$24 sps:$4 sm:$0xff]  }
 0x27b   :  { %3414 = vmatprep.subr.bf16.mxu0 %v8600_v24  ;;  %v8661_v24 = vld [vmem:[#allocation11 + $0xe0] ss:$8 sps:$4 sm:$0xff]  }
 0x27d   :  { %2692 = vmatpush1.bf16.msra.mxu1 %v8478_v2  ;;  %v8528_v2 = vld [vmem:[#allocation8 + $0x344] ss:$24 sps:$4 sm:$0xff]  }
 0x27e   :  { %2693 = vmatprep.subr.bf16.mxu1 %v8483_v3  ;;  %3415 = vmatpush1.bf16.msra.mxu0 %v8598_v23  ;;  %v8649_v3 = vld [vmem:[#allocation11 + $0xa0] ss:$8 sps:$4 sm:$0xff]  }
 0x27f   :  { %3416 = vmatprep.subr.bf16.mxu0 %v8606_v28  ;;  %v8543_v23 = vld [vmem:[#allocation8 + $0x434] ss:$24 sps:$4 sm:$0xff]  }
 0x280   :  { %v8664_v28 = vld [vmem:[#allocation11 + $0xf0] ss:$8 sps:$4 sm:$0xff]  }
 0x281   :  { %2694 = vmatpush1.bf16.msra.mxu1 %v8481_v4  ;;  %v8651_v4 = vld [vmem:[#allocation11 + $0xa4] ss:$8 sps:$4 sm:$0xff]  }
 0x282   :  { %2695 = vmatprep.subr.bf16.mxu1 %v8486_v5  ;;  %3417 = vmatpush1.bf16.msra.mxu0 %v8604_v27  ;;  %v8526_v5 = vld [vmem:[#allocation8 + $0x340] ss:$24 sps:$4 sm:$0xff]   ;;  %v8546_v27 = vld [vmem:[#allocation8 + $0x464] ss:$24 sps:$4 sm:$0xff]  }
 0x283   :  { %3418 = vmatprep.subr.bf16.mxu0 %v8612_v33  ;;  %v8547_v33 = vld [vmem:[#allocation8 + $0x490] ss:$24 sps:$4 sm:$0xff]  }
 0x285   :  { %2696 = vmatpush1.bf16.msra.mxu1 %v8484_v6  ;;  %v8654_v6 = vld [vmem:[#allocation11 + $0xb4] ss:$8 sps:$4 sm:$0xff]  }
 0x286   :  { %2697 = vmatprep.subr.bf16.mxu1 %v8489_v7  ;;  %3419 = vmatpush1.bf16.msra.mxu0 %v8610_v32  ;;  %v8531_v7 = vld [vmem:[#allocation8 + $0x374] ss:$24 sps:$4 sm:$0xff]  }
 0x287   :  { %3420 = vmatprep.subr.bf16.mxu0 %v8618_v38  ;;  %v8549_v32 = vld [vmem:[#allocation8 + $0x494] ss:$24 sps:$4 sm:$0xff]   ;;  %v8553_v38 = vld [vmem:[#allocation8 + $0x4f0] ss:$24 sps:$4 sm:$0xff]  }
 0x289   :  { %2698 = vmatpush1.bf16.msra.mxu1 %v8487_v8  ;;  %v8652_v8 = vld [vmem:[#allocation11 + $0xb0] ss:$8 sps:$4 sm:$0xff]  }
 0x28a   :  { %2699 = vmatprep.subr.bf16.mxu1 %v8492_v9  ;;  %3421 = vmatpush1.bf16.msra.mxu0 %v8616_v37  ;;  %v8529_v9 = vld [vmem:[#allocation8 + $0x370] ss:$24 sps:$4 sm:$0xff]   ;;  %v8555_v37 = vld [vmem:[#allocation8 + $0x4f4] ss:$24 sps:$4 sm:$0xff]  }
 0x28b   :  { %3422 = vmatprep.subr.bf16.mxu0 %v8624_v43  ;;  %v8559_v43 = vld [vmem:[#allocation8 + $0x550] ss:$24 sps:$4 sm:$0xff]  }
 0x28d   :  { %2700 = vmatpush1.bf16.msra.mxu1 %v8490_v13  ;;  %v8657_v13 = vld [vmem:[#allocation11 + $0xc4] ss:$8 sps:$4 sm:$0xff]  }
 0x28e   :  { %2701 = vmatprep.subr.bf16.mxu1 %v8495_v14  ;;  %3423 = vmatpush1.bf16.msra.mxu0 %v8622_v42  ;;  %v8534_v14 = vld [vmem:[#allocation8 + $0x3a4] ss:$24 sps:$4 sm:$0xff]   ;;  %v8561_v42 = vld [vmem:[#allocation8 + $0x554] ss:$24 sps:$4 sm:$0xff]  }
 0x28f   :  { %3424 = vmatprep.subr.bf16.mxu0 %v8630_v48  ;;  %v8565_v48 = vld [vmem:[#allocation8 + $0x5b0] ss:$24 sps:$4 sm:$0xff]  }
 0x291   :  { %2702 = vmatpush1.bf16.msra.mxu1 %v8493_v10  ;;  %v8532_v10 = vld [vmem:[#allocation8 + $0x3a0] ss:$24 sps:$4 sm:$0xff]  }
 0x292   :  { %2703 = vmatprep.subr.bf16.mxu1 %v8498_v15  ;;  %3425 = vmatpush1.bf16.msra.mxu0 %v8628_v47  ;;  %v8660_v15 = vld [vmem:[#allocation11 + $0xd4] ss:$8 sps:$4 sm:$0xff]   ;;  %v8567_v47 = vld [vmem:[#allocation8 + $0x5b4] ss:$24 sps:$4 sm:$0xff]  }
 0x293   :  { %3426 = vmatprep.subr.bf16.mxu0 %v8636_v51  ;;  %v8571_v51 = vld [vmem:[#allocation8 + $0x610] ss:$24 sps:$4 sm:$0xff]  }
 0x295   :  { %2704 = vmatpush1.bf16.msra.mxu1 %v8496_v16  ;;  %v8658_v16 = vld [vmem:[#allocation11 + $0xd0] ss:$8 sps:$4 sm:$0xff]  }
 0x296   :  { %2705 = vmatprep.subr.bf16.mxu1 %v8501_v20  ;;  %3427 = vmatpush1.bf16.msra.mxu0 %v8634_v56  ;;  %v8538_v20 = vld [vmem:[#allocation8 + $0x400] ss:$24 sps:$4 sm:$0xff]   ;;  %v8573_v56 = vld [vmem:[#allocation8 + $0x614] ss:$24 sps:$4 sm:$0xff]  }
 0x297   :  { %3428 = vmatprep.subr.bf16.mxu0 %v8642_v60  ;;  %v8577_v60 = vld [vmem:[#allocation8 + $0x670] ss:$24 sps:$4 sm:$0xff]  }
 0x299   :  { %2706 = vmatpush1.bf16.msra.mxu1 %v8499_v22  ;;  %v8663_v22 = vld [vmem:[#allocation11 + $0xe4] ss:$8 sps:$4 sm:$0xff]  }
 0x29a   :  { %2707 = vmatprep.subr.bf16.mxu1 %v8504_v25  ;;  %3429 = vmatpush1.bf16.msra.mxu0 %v8640_v55  ;;  %v8541_v25 = vld [vmem:[#allocation8 + $0x430] ss:$24 sps:$4 sm:$0xff]   ;;  %v8579_v55 = vld [vmem:[#allocation8 + $0x674] ss:$24 sps:$4 sm:$0xff]  }
 0x29b   :  { %3430 = vmatprep.subr.bf16.mxu0 %v8648_v30  ;;  %v8583_v30 = vld [vmem:[#allocation8 + $0x6d0] ss:$24 sps:$4 sm:$0xff]  }
 0x29d   :  { %2708 = vmatpush1.bf16.msra.mxu1 %v8502_v26  ;;  %v8666_v26 = vld [vmem:[#allocation11 + $0xf4] ss:$8 sps:$4 sm:$0xff]  }
 0x29e   :  { %2709 = vmatprep.subr.bf16.mxu1 %v8507_v29  ;;  %3431 = vmatpush1.bf16.msra.mxu0 %v8646_v63  ;;  %v8544_v29 = vld [vmem:[#allocation8 + $0x460] ss:$24 sps:$4 sm:$0xff]   ;;  %v8585_v63 = vld [vmem:[#allocation8 + $0x6d4] ss:$24 sps:$4 sm:$0xff]  }
 0x29f   :  { %3432 = vmatprep.subr.bf16.mxu0 %v8651_v4  ;;  %v8597_v4 = vld [vmem:[#allocation8 + $0x764] ss:$24 sps:$4 sm:$0xff]  }
 0x2a1   :  { %2710 = vmatpush1.bf16.msra.mxu1 %v8505_v31  ;;  %v8669_v31 = vld [vmem:[#allocation11 + $0x104] ss:$8 sps:$4 sm:$0xff]  }
 0x2a2   :  { %2711 = vmatprep.subr.bf16.mxu1 %v8510_v35  ;;  %3433 = vmatpush1.bf16.msra.mxu0 %v8649_v3  ;;  %v8552_v35 = vld [vmem:[#allocation8 + $0x4c4] ss:$24 sps:$4 sm:$0xff]   ;;  %v8591_v3 = vld [vmem:[#allocation8 + $0x734] ss:$24 sps:$4 sm:$0xff]  }
 0x2a3   :  { %3434 = vmatprep.subr.bf16.mxu0 %v8654_v6  ;;  %v8603_v6 = vld [vmem:[#allocation8 + $0x794] ss:$24 sps:$4 sm:$0xff]  }
 0x2a5   :  { %2712 = vmatpush1.bf16.msra.mxu1 %v8508_v36  ;;  %v8550_v36 = vld [vmem:[#allocation8 + $0x4c0] ss:$24 sps:$4 sm:$0xff]  }
 0x2a6   :  { %2713 = vmatprep.subr.bf16.mxu1 %v8513_v39  ;;  %3435 = vmatpush1.bf16.msra.mxu0 %v8652_v8  ;;  %v8558_v39 = vld [vmem:[#allocation8 + $0x524] ss:$24 sps:$4 sm:$0xff]  }
 0x2a7   :  { %3436 = vmatprep.subr.bf16.mxu0 %v8657_v13  ;;  %v8609_v8 = vld [vmem:[#allocation8 + $0x7c4] ss:$24 sps:$4 sm:$0xff]   ;;  %v8615_v13 = vld [vmem:[#allocation8 + $0x7f4] ss:$24 sps:$4 sm:$0xff]  }
 0x2a9   :  { %2714 = vmatpush1.bf16.msra.mxu1 %v8511_v58  ;;  %v8556_v58 = vld [vmem:[#allocation8 + $0x520] ss:$24 sps:$4 sm:$0xff]  }
 0x2aa   :  { %2715 = vmatprep.subr.bf16.mxu1 %v8516_v44  ;;  %v8564_v44 = vld [vmem:[#allocation8 + $0x584] ss:$24 sps:$4 sm:$0xff]  }
 0x2ad   :  { %2716 = vmatpush1.bf16.msra.mxu1 %v8514_v45  ;;  %v8562_v45 = vld [vmem:[#allocation8 + $0x580] ss:$24 sps:$4 sm:$0xff]  }
 0x2ae   :  { %2717 = vmatprep.subr.bf16.mxu1 %v8519_v49  ;;  %v8570_v49 = vld [vmem:[#allocation8 + $0x5e4] ss:$24 sps:$4 sm:$0xff]  }
 0x2b1   :  { %2718 = vmatpush1.bf16.msra.mxu1 %v8517_v50  ;;  %v8568_v50 = vld [vmem:[#allocation8 + $0x5e0] ss:$24 sps:$4 sm:$0xff]  }
 0x2b2   :  { %2719 = vmatprep.subr.bf16.mxu1 %v8522_v52  ;;  %v8576_v52 = vld [vmem:[#allocation8 + $0x644] ss:$24 sps:$4 sm:$0xff]  }
 0x2b5   :  { %2720 = vmatpush1.bf16.msra.mxu1 %v8520_v53  ;;  %v8574_v53 = vld [vmem:[#allocation8 + $0x640] ss:$24 sps:$4 sm:$0xff]  }
 0x2b6   :  { %2730 = vmatprep.subr.bf16.mxu1 %v8525_v61  ;;  %v8582_v61 = vld [vmem:[#allocation8 + $0x6a4] ss:$24 sps:$4 sm:$0xff]  }
 0x2b8   :  { %2722 = vmatmul.mubr.bf16.vlgmr.msra.gmra.mrb[4].mxu1 %v10044_v11  ;;  %v8655_v11 = vld [vmem:[#allocation11 + $0xc0] ss:$8 sps:$4 sm:$0xff]  }
 0x2b9   :  { %2731 = vmatpush1.bf16.msra.mxu1 %v8523_v62  ;;  %2762 = vmatprep.mubr.bf16.mxu1 %v10057_v54  ;;  %v8537_v54 = vld [vmem:[#allocation8 + $0x3d4] ss:$24 sps:$4 sm:$0xff]   ;;  %v8580_v62 = vld [vmem:[#allocation8 + $0x6a0] ss:$24 sps:$4 sm:$0xff]  }
 0x2ba   :  { %2732 = vmatprep.subr.bf16.mxu1 %v8528_v2  ;;  %3437 = vmatpush1.bf16.msra.mxu0 %v8655_v11  ;;  %v8588_v2 = vld [vmem:[#allocation8 + $0x704] ss:$24 sps:$4 sm:$0xff]  }
 0x2bb   :  { %3438 = vmatprep.subr.bf16.mxu0 %v8660_v15  ;;  %v8621_v11 = vld [vmem:[#allocation8 + $0x824] ss:$24 sps:$4 sm:$0xff]   ;;  %v8627_v15 = vld [vmem:[#allocation8 + $0x854] ss:$24 sps:$4 sm:$0xff]  }
 0x2bd   :  { %2733 = vmatpush1.bf16.msra.mxu1 %v8526_v5  ;;  %v8595_v5 = vld [vmem:[#allocation8 + $0x760] ss:$24 sps:$4 sm:$0xff]  }
 0x2be   :  { %2734 = vmatprep.subr.bf16.mxu1 %v8531_v7  ;;  %3439 = vmatpush1.bf16.msra.mxu0 %v8658_v16  ;;  %v8601_v7 = vld [vmem:[#allocation8 + $0x790] ss:$24 sps:$4 sm:$0xff]   ;;  %v8633_v16 = vld [vmem:[#allocation8 + $0x884] ss:$24 sps:$4 sm:$0xff]  }
 0x2bf   :  { %3440 = vmatprep.subr.bf16.mxu0 %v8663_v22  ;;  %v8645_v22 = vld [vmem:[#allocation8 + $0x8e4] ss:$24 sps:$4 sm:$0xff]  }
 0x2c1   :  { %2735 = vmatpush1.bf16.msra.mxu1 %v8529_v9  ;;  %v8607_v9 = vld [vmem:[#allocation8 + $0x7c0] ss:$24 sps:$4 sm:$0xff]  }
 0x2c2   :  { %2736 = vmatprep.subr.bf16.mxu1 %v8534_v14  ;;  %3441 = vmatpush1.bf16.msra.mxu0 %v8661_v24  ;;  %v8613_v14 = vld [vmem:[#allocation8 + $0x7f0] ss:$24 sps:$4 sm:$0xff]   ;;  %v10098_v24 = vld [vmem:[#allocation10] sm:$0x3f] }
 0x2c3   :  { %3442 = vmatprep.subr.bf16.mxu0 %v8666_v26  ;;  %v980_v26 = vrot.slane %v10098_v24, %v10036_v59 }
 0x2c5   :  { %2737 = vmatpush1.bf16.msra.mxu1 %v8532_v10  ;;  %v8619_v10 = vld [vmem:[#allocation8 + $0x820] ss:$24 sps:$4 sm:$0xff]  }
 0x2c6   :  { %2738 = vmatprep.subr.bf16.mxu1 %v8537_v54  ;;  %3443 = vmatpush1.bf16.msra.mxu0 %v8664_v28  ;;  %v8625_v54 = vld [vmem:[#allocation8 + $0x850] ss:$24 sps:$4 sm:$0xff]  }
 0x2c7   :  { %3453 = vmatprep.subr.bf16.mxu0 %v8669_v31 }
 0x2c9   :  { %2739 = vmatpush1.bf16.msra.mxu1 %v8535_v17  ;;  %v8631_v17 = vld [vmem:[#allocation8 + $0x880] ss:$24 sps:$4 sm:$0xff]  }
 0x2ca   :  { %2740 = vmatprep.subr.bf16.mxu1 %v8540_v18  ;;  %v8639_v18 = vld [vmem:[#allocation8 + $0x8b4] ss:$24 sps:$4 sm:$0xff]  }
 0x2cd   :  { %2741 = vmatpush1.bf16.msra.mxu1 %v8538_v20  ;;  %v8637_v20 = vld [vmem:[#allocation8 + $0x8b0] ss:$24 sps:$4 sm:$0xff]  }
 0x2ce   :  { %2742 = vmatprep.subr.bf16.mxu1 %v8543_v23  ;;  %v8643_v23 = vld [vmem:[#allocation8 + $0x8e0] ss:$24 sps:$4 sm:$0xff]  }
 0x2d1   :  { %2743 = vmatpush1.bf16.msra.mxu1 %v8541_v25  ;;  %v976_v25 = vrot.slane %v10098_v24, %v10031_v57 }
 0x2d2   :  { %2744 = vmatprep.subr.bf16.mxu1 %v8546_v27  ;;  %v988_v27 = vrot.slane %v10098_v24, %v10051_v34 }
 0x2d5   :  { %2745 = vmatpush1.bf16.msra.mxu1 %v8544_v29 }
 0x2d6   :  { %2746 = vmatprep.subr.bf16.mxu1 %v8549_v32 }
 0x2d9   :  { %2747 = vmatpush1.bf16.msra.mxu1 %v8547_v33 }
 0x2da   :  { %2748 = vmatprep.subr.bf16.mxu1 %v8552_v35 }
 0x2dd   :  { %2749 = vmatpush1.bf16.msra.mxu1 %v8550_v36 }
 0x2de   :  { %2750 = vmatprep.subr.bf16.mxu1 %v8555_v37 }
 0x2e1   :  { %2751 = vmatpush1.bf16.msra.mxu1 %v8553_v38 }
 0x2e2   :  { %2752 = vmatprep.subr.bf16.mxu1 %v8558_v39 }
 0x2e5   :  { %2753 = vmatpush1.bf16.msra.mxu1 %v8556_v58 }
 0x2e6   :  { %2754 = vmatprep.subr.bf16.mxu1 %v8561_v42 }
 0x2e9   :  { %2755 = vmatpush1.bf16.msra.mxu1 %v8559_v43 }
 0x2ea   :  { %2756 = vmatprep.subr.bf16.mxu1 %v8564_v44 }
 0x2ed   :  { %2757 = vmatpush1.bf16.msra.mxu1 %v8562_v45  ;;  %v8667_v45 = vld [vmem:[#allocation11 + $0x100] ss:$8 sps:$4 sm:$0xff]  }
 0x2ee   :  { %2758 = vmatprep.subr.bf16.mxu1 %v8567_v47 }
 0x2f1   :  { %2759 = vmatpush1.bf16.msra.mxu1 %v8565_v48  ;;  %v8672_v48 = vld [vmem:[#allocation11 + $0x114] ss:$8 sps:$4 sm:$0xff]  }
 0x2f2   :  { %2760 = vmatprep.subr.bf16.mxu1 %v8570_v49 }
 0x2f5   :  { %2761 = vmatpush1.bf16.msra.mxu1 %v8568_v50  ;;  %v8670_v50 = vld [vmem:[#allocation11 + $0x110] ss:$8 sps:$4 sm:$0xff]  }
 0x2f6   :  { %2771 = vmatprep.subr.bf16.mxu1 %v8573_v56  ;;  %v8675_v56 = vld [vmem:[#allocation11 + $0x124] ss:$8 sps:$4 sm:$0xff]  }
 0x2f8   :  { %2763 = vmatmul.mubr.bf16.vlgmr.msra.gmra.mrb[4].mxu1 %v10074_v41  ;;  %v8586_v41 = vld [vmem:[#allocation8 + $0x700] ss:$24 sps:$4 sm:$0xff]  }
 0x2f9   :  { %2772 = vmatpush1.bf16.msra.mxu1 %v8571_v51  ;;  %2803 = vmatprep.mubr.bf16.mxu1 %v10076_v46  ;;  %v8589_v46 = vld [vmem:[#allocation8 + $0x730] ss:$24 sps:$4 sm:$0xff]  }
 0x2fa   :  { %2773 = vmatprep.subr.bf16.mxu1 %v8576_v52  ;;  %v8673_v51 = vld [vmem:[#allocation11 + $0x120] ss:$8 sps:$4 sm:$0xff]   ;;  %v8678_v52 = vld [vmem:[#allocation11 + $0x134] ss:$8 sps:$4 sm:$0xff]  }
 0x2fd   :  { %2774 = vmatpush1.bf16.msra.mxu1 %v8574_v53  ;;  %v8676_v53 = vld [vmem:[#allocation11 + $0x130] ss:$8 sps:$4 sm:$0xff]  }
 0x2fe   :  { %2775 = vmatprep.subr.bf16.mxu1 %v8579_v55  ;;  %v8681_v55 = vld [vmem:[#allocation11 + $0x144] ss:$8 sps:$4 sm:$0xff]  }
 0x301   :  { %2776 = vmatpush1.bf16.msra.mxu1 %v8577_v60  ;;  %v8679_v60 = vld [vmem:[#allocation11 + $0x140] ss:$8 sps:$4 sm:$0xff]  }
 0x302   :  { %2777 = vmatprep.subr.bf16.mxu1 %v8582_v61  ;;  %v8684_v61 = vld [vmem:[#allocation11 + $0x154] ss:$8 sps:$4 sm:$0xff]  }
 0x305   :  { %2778 = vmatpush1.bf16.msra.mxu1 %v8580_v62  ;;  %v8682_v62 = vld [vmem:[#allocation11 + $0x150] ss:$8 sps:$4 sm:$0xff]  }
 0x306   :  { %2779 = vmatprep.subr.bf16.mxu1 %v8585_v63  ;;  %v8687_v63 = vld [vmem:[#allocation11 + $0x164] ss:$8 sps:$4 sm:$0xff]  }
 0x309   :  { %2780 = vmatpush1.bf16.msra.mxu1 %v8583_v30  ;;  %v8685_v30 = vld [vmem:[#allocation11 + $0x160] ss:$8 sps:$4 sm:$0xff]  }
 0x30a   :  { %2781 = vmatprep.subr.bf16.mxu1 %v8588_v2  ;;  %v8690_v2 = vld [vmem:[#allocation11 + $0x174] ss:$8 sps:$4 sm:$0xff]  }
 0x30d   :  { %2782 = vmatpush1.bf16.msra.mxu1 %v8586_v41  ;;  %v8688_v41 = vld [vmem:[#allocation11 + $0x170] ss:$8 sps:$4 sm:$0xff]  }
 0x30e   :  { %2783 = vmatprep.subr.bf16.mxu1 %v8591_v3  ;;  %v8693_v3 = vld [vmem:[#allocation11 + $0x184] ss:$8 sps:$4 sm:$0xff]  }
 0x311   :  { %2784 = vmatpush1.bf16.msra.mxu1 %v8589_v46  ;;  %v8691_v46 = vld [vmem:[#allocation11 + $0x180] ss:$8 sps:$4 sm:$0xff]  }
 0x312   :  { %2785 = vmatprep.subr.bf16.mxu1 %v8597_v4  ;;  %v8696_v4 = vld [vmem:[#allocation11 + $0x194] ss:$8 sps:$4 sm:$0xff]  }
 0x315   :  { %2786 = vmatpush1.bf16.msra.mxu1 %v8595_v5  ;;  %v8694_v5 = vld [vmem:[#allocation11 + $0x190] ss:$8 sps:$4 sm:$0xff]  }
 0x316   :  { %2787 = vmatprep.subr.bf16.mxu1 %v8603_v6  ;;  %v8699_v6 = vld [vmem:[#allocation11 + $0x1a4] ss:$8 sps:$4 sm:$0xff]  }
 0x319   :  { %2788 = vmatpush1.bf16.msra.mxu1 %v8601_v7  ;;  %v8697_v7 = vld [vmem:[#allocation11 + $0x1a0] ss:$8 sps:$4 sm:$0xff]  }
 0x31a   :  { %2789 = vmatprep.subr.bf16.mxu1 %v8609_v8  ;;  %v8702_v8 = vld [vmem:[#allocation11 + $0x1b4] ss:$8 sps:$4 sm:$0xff]  }
 0x31d   :  { %2790 = vmatpush1.bf16.msra.mxu1 %v8607_v9  ;;  %v8700_v9 = vld [vmem:[#allocation11 + $0x1b0] ss:$8 sps:$4 sm:$0xff]  }
 0x31e   :  { %2791 = vmatprep.subr.bf16.mxu1 %v8615_v13  ;;  %v8705_v13 = vld [vmem:[#allocation11 + $0x1c4] ss:$8 sps:$4 sm:$0xff]  }
 0x321   :  { %2792 = vmatpush1.bf16.msra.mxu1 %v8613_v14  ;;  %v8703_v14 = vld [vmem:[#allocation11 + $0x1c0] ss:$8 sps:$4 sm:$0xff]  }
 0x322   :  { %2793 = vmatprep.subr.bf16.mxu1 %v8621_v11  ;;  %v8708_v11 = vld [vmem:[#allocation11 + $0x1d4] ss:$8 sps:$4 sm:$0xff]  }
 0x325   :  { %2794 = vmatpush1.bf16.msra.mxu1 %v8619_v10  ;;  %v8706_v10 = vld [vmem:[#allocation11 + $0x1d0] ss:$8 sps:$4 sm:$0xff]  }
 0x326   :  { %2795 = vmatprep.subr.bf16.mxu1 %v8627_v15  ;;  %v984_v15 = vrot.slane %v10098_v24, %v10062_v12 }
 0x329   :  { %2796 = vmatpush1.bf16.msra.mxu1 %v8625_v54  ;;  %v8711_v54 = vld [vmem:[#allocation11 + $0x1e4] ss:$8 sps:$4 sm:$0xff]  }
 0x32a   :  { %2797 = vmatprep.subr.bf16.mxu1 %v8633_v16  ;;  %v8709_v16 = vld [vmem:[#allocation11 + $0x1e0] ss:$8 sps:$4 sm:$0xff]  }
 0x32d   :  { %2798 = vmatpush1.bf16.msra.mxu1 %v8631_v17 }
 0x32e   :  { %2799 = vmatprep.subr.bf16.mxu1 %v8639_v18  ;;  %v8714_v18 = vld [vmem:[#allocation11 + $0x1f4] ss:$8 sps:$4 sm:$0xff]  }
 0x331   :  { %2800 = vmatpush1.bf16.msra.mxu1 %v8637_v20  ;;  %v8712_v20 = vld [vmem:[#allocation11 + $0x1f0] ss:$8 sps:$4 sm:$0xff]  }
 0x332   :  { %2801 = vmatprep.subr.bf16.mxu1 %v8645_v22 }
 0x335   :  { %2802 = vmatpush1.bf16.msra.mxu1 %v8643_v23  ;;  %v8717_v23 = vld [vmem:[#allocation11 + $0x204] ss:$8 sps:$4 sm:$0xff]  }
 0x338   :  { %2804 = vmatmul.mubr.bf16.vlgmr.msra.gmra.mrb[4].mxu1 %v10087_v1 }
 0x339   :  { %3910 = vmatprep.mubr.bf16.mxu1 %v9760_v0 }
 0x34b   :  { %v2559_v28 = vpop.f32.mrb[0].mxu1  ;;  %v10106_v29 = vpop.f32.mrb[12].mxu0 }
 0x34c   :  { %v8023_v31 = vadd.f32 %v2559_v28, %v976_v25  ;;  %v2561_v32 = vpop.f32.mrb[1].mxu1  ;;  %v2684_v33 = vpop.f32.mrb[13].mxu0  ;;  %v8025_v17 = vadd.f32 %v10106_v29, %v984_v15  ;;  %v8715_v25 = vld [vmem:[#allocation11 + $0x200] ss:$8 sps:$4 sm:$0xff]   ;;  %v8723_v29 = vld [vmem:[#allocation11 + $0x224] ss:$8 sps:$4 sm:$0xff]  }
 0x34d   :  { %v8024_v1 = vadd.f32 %v2561_v32, %v980_v26  ;;  %v8026_v35 = vadd.f32 %v2684_v33, %v988_v27  ;;  %v2563_v36 = vpop.f32.mrb[2].mxu1  ;;  %v2686_v37 = vpop.f32.mrb[14].mxu0  ;;  %v8720_v27 = vld [vmem:[#allocation11 + $0x214] ss:$8 sps:$4 sm:$0xff]   ;;  %v8718_v32 = vld [vmem:[#allocation11 + $0x210] ss:$8 sps:$4 sm:$0xff]  }
 0x34e   :  { %v2812_v38 = vmax.f32 %v8023_v31, 0.0  ;;  %v2564_v39 = vpop.f32.mrb[3].mxu1  ;;  %v2687_v58 = vpop.f32.mrb[15].mxu0  ;;  %v2814_v22 = vmax.f32 %v8025_v17, 0.0  ;;  %v8763_v28 = vld [vmem:[#allocation16] ss:$24 sps:$4 sm:$0xff]  }
 0x34f   :  { %v2813_v42 = vmax.f32 %v8024_v1, 0.0  ;;  %v2815_v43 = vmax.f32 %v8026_v35, 0.0  ;;  %v8765_v31 = vld [vmem:[#allocation16 + $0x4] ss:$24 sps:$4 sm:$0xff]   ;;  %v8771_v33 = vld [vmem:[#allocation16 + $0x34] ss:$24 sps:$4 sm:$0xff]  }
 0x350   :  { %v2818_v47 = vpack.c.bf16 %v2812_v38, %v2812_v38  ;;  %v2820_v26 = vpack.c.bf16 %v2814_v22, %v2814_v22  ;;  %3878 = vmatprep.subr.bf16.mxu1 %v8765_v31  ;;  %v8769_v1 = vld [vmem:[#allocation16 + $0x30] ss:$24 sps:$4 sm:$0xff]   ;;  %v8774_v17 = vld [vmem:[#allocation16 + $0x3c] ss:$24 sps:$4 sm:$0xff]   ;;  %v8775_v22 = vld [vmem:[#allocation16 + $0x60] ss:$24 sps:$4 sm:$0xff]  }
 0x351   :  { %v2819_v44 = vpack.c.bf16 %v2813_v42, %v2813_v42  ;;  %v2821_v49 = vpack.c.bf16 %v2815_v43, %v2815_v43  ;;  %3879 = vmatpush1.bf16.msra.mxu1 %v8763_v28  ;;  %v8721_v35 = vld [vmem:[#allocation11 + $0x220] ss:$8 sps:$4 sm:$0xff]   ;;  %v8726_v36 = vld [vmem:[#allocation11 + $0x234] ss:$8 sps:$4 sm:$0xff]   ;;  %v8724_v37 = vld [vmem:[#allocation11 + $0x230] ss:$8 sps:$4 sm:$0xff]  }
 0x352   :  { %3880 = vmatprep.subr.bf16.mxu1 %v8771_v33  ;;  %v8729_v38 = vld [vmem:[#allocation11 + $0x244] ss:$8 sps:$4 sm:$0xff]   ;;  %v8727_v39 = vld [vmem:[#allocation11 + $0x240] ss:$8 sps:$4 sm:$0xff]   ;;  %v8732_v58 = vld [vmem:[#allocation11 + $0x254] ss:$8 sps:$4 sm:$0xff]  }
 0x353   :  { %3444 = vmatprep.mubr.bf16.mxu0 %v2819_v44  ;;  %v8730_v42 = vld [vmem:[#allocation11 + $0x250] ss:$8 sps:$4 sm:$0xff]   ;;  %v8735_v43 = vld [vmem:[#allocation11 + $0x264] ss:$8 sps:$4 sm:$0xff]   ;;  %v8733_v44 = vld [vmem:[#allocation11 + $0x260] ss:$8 sps:$4 sm:$0xff]  }
 0x354   :  { %3445 = vmatmul.mubr.bf16.vlgmr.msra.gmra.mrb[16].mxu0 %v2818_v47  ;;  %v8736_v47 = vld [vmem:[#allocation11 + $0x270] ss:$8 sps:$4 sm:$0xff]   ;;  %v8789_v31 = vld [vmem:[#allocation16 + $0xc4] ss:$24 sps:$4 sm:$0xff]  }
 0x355   :  { %3454 = vmatpush1.bf16.msra.mxu0 %v8667_v45  ;;  %3485 = vmatprep.mubr.bf16.mxu0 %v2821_v49  ;;  %v8738_v45 = vld [vmem:[#allocation11 + $0x274] ss:$8 sps:$4 sm:$0xff]   ;;  %v8739_v49 = vld [vmem:[#allocation11 + $0x280] ss:$8 sps:$4 sm:$0xff]  }
 0x356   :  { %3455 = vmatprep.subr.bf16.mxu0 %v8672_v48  ;;  %3881 = vmatpush1.bf16.msra.mxu1 %v8769_v1  ;;  %v8741_v48 = vld [vmem:[#allocation11 + $0x284] ss:$8 sps:$4 sm:$0xff]   ;;  %v8784_v28 = vld [vmem:[#allocation16 + $0x98] ss:$24 sps:$4 sm:$0xff]  }
 0x357   :  { %v8787_v33 = vld [vmem:[#allocation16 + $0xc0] ss:$24 sps:$4 sm:$0xff]   ;;  %v8795_v1 = vld [vmem:[#allocation16 + $0xf4] ss:$24 sps:$4 sm:$0xff]  }
 0x359   :  { %3456 = vmatpush1.bf16.msra.mxu0 %v8670_v50  ;;  %v8744_v50 = vld [vmem:[#allocation11 + $0x294] ss:$8 sps:$4 sm:$0xff]  }
 0x35a   :  { %3457 = vmatprep.subr.bf16.mxu0 %v8675_v56  ;;  %v8742_v56 = vld [vmem:[#allocation11 + $0x290] ss:$8 sps:$4 sm:$0xff]  }
 0x35d   :  { %3458 = vmatpush1.bf16.msra.mxu0 %v8673_v51  ;;  %v8747_v51 = vld [vmem:[#allocation11 + $0x2a4] ss:$8 sps:$4 sm:$0xff]  }
 0x35e   :  { %3459 = vmatprep.subr.bf16.mxu0 %v8678_v52  ;;  %v8745_v52 = vld [vmem:[#allocation11 + $0x2a0] ss:$8 sps:$4 sm:$0xff]  }
 0x361   :  { %3460 = vmatpush1.bf16.msra.mxu0 %v8676_v53  ;;  %v8750_v53 = vld [vmem:[#allocation11 + $0x2b4] ss:$8 sps:$4 sm:$0xff]  }
 0x362   :  { %3461 = vmatprep.subr.bf16.mxu0 %v8681_v55  ;;  %v8748_v55 = vld [vmem:[#allocation11 + $0x2b0] ss:$8 sps:$4 sm:$0xff]  }
 0x365   :  { %3462 = vmatpush1.bf16.msra.mxu0 %v8679_v60  ;;  %v8753_v60 = vld [vmem:[#allocation11 + $0x2c4] ss:$8 sps:$4 sm:$0xff]  }
 0x366   :  { %3463 = vmatprep.subr.bf16.mxu0 %v8684_v61  ;;  %v8751_v61 = vld [vmem:[#allocation11 + $0x2c0] ss:$8 sps:$4 sm:$0xff]  }
 0x369   :  { %3464 = vmatpush1.bf16.msra.mxu0 %v8682_v62  ;;  %v8756_v62 = vld [vmem:[#allocation11 + $0x2d4] ss:$8 sps:$4 sm:$0xff]  }
 0x36a   :  { %3465 = vmatprep.subr.bf16.mxu0 %v8687_v63  ;;  %v8754_v63 = vld [vmem:[#allocation11 + $0x2d0] ss:$8 sps:$4 sm:$0xff]  }
 0x36d   :  { %3466 = vmatpush1.bf16.msra.mxu0 %v8685_v30  ;;  %v8759_v30 = vld [vmem:[#allocation11 + $0x2e4] ss:$8 sps:$4 sm:$0xff]  }
 0x36e   :  { %3467 = vmatprep.subr.bf16.mxu0 %v8690_v2  ;;  %v8757_v2 = vld [vmem:[#allocation11 + $0x2e0] ss:$8 sps:$4 sm:$0xff]  }
 0x371   :  { %3468 = vmatpush1.bf16.msra.mxu0 %v8688_v41  ;;  %v8762_v41 = vld [vmem:[#allocation11 + $0x2f4] ss:$8 sps:$4 sm:$0xff]  }
 0x372   :  { %3469 = vmatprep.subr.bf16.mxu0 %v8693_v3  ;;  %v8760_v3 = vld [vmem:[#allocation11 + $0x2f0] ss:$8 sps:$4 sm:$0xff]  }
 0x375   :  { %3470 = vmatpush1.bf16.msra.mxu0 %v8691_v46  ;;  %v8768_v46 = vld [vmem:[#allocation16 + $0xc] ss:$24 sps:$4 sm:$0xff]  }
 0x376   :  { %3471 = vmatprep.subr.bf16.mxu0 %v8696_v4  ;;  %v992_v4 = vrot.slane %v10098_v24, %v10083_v40 }
 0x379   :  { %3472 = vmatpush1.bf16.msra.mxu0 %v8694_v5  ;;  %v996_v5 = vrot.slane %v10098_v24, %v10067_v21  ;;  %v8777_v24 = vld [vmem:[#allocation16 + $0x64] ss:$24 sps:$4 sm:$0xff]  }
 0x37a   :  { %3473 = vmatprep.subr.bf16.mxu0 %v8699_v6  ;;  %3882 = vmatprep.subr.bf16.mxu1 %v8777_v24  ;;  %v8832_v24 = vld [vmem:[#allocation14 + $0x90] ss:$24 sps:$4 sm:$0xff]  }
 0x37b   :  { %3883 = vmatpush1.bf16.msra.mxu1 %v8775_v22  ;;  %v8840_v22 = vld [vmem:[#allocation14 + $0xc4] ss:$24 sps:$4 sm:$0xff]  }
 0x37d   :  { %3474 = vmatpush1.bf16.msra.mxu0 %v8697_v7 }
 0x37e   :  { %3475 = vmatprep.subr.bf16.mxu0 %v8702_v8 }
 0x381   :  { %3476 = vmatpush1.bf16.msra.mxu0 %v8700_v9 }
 0x382   :  { %3477 = vmatprep.subr.bf16.mxu0 %v8705_v13 }
 0x385   :  { %3478 = vmatpush1.bf16.msra.mxu0 %v8703_v14 }
 0x386   :  { %3479 = vmatprep.subr.bf16.mxu0 %v8708_v11 }
 0x389   :  { %3480 = vmatpush1.bf16.msra.mxu0 %v8706_v10 }
 0x38a   :  { %3481 = vmatprep.subr.bf16.mxu0 %v8711_v54  ;;  %v8766_v54 = vld [vmem:[#allocation16 + $0x8] ss:$24 sps:$4 sm:$0xff]  }
 0x38d   :  { %3482 = vmatpush1.bf16.msra.mxu0 %v8709_v16 }
 0x38e   :  { %3483 = vmatprep.subr.bf16.mxu0 %v8714_v18  ;;  %v8772_v18 = vld [vmem:[#allocation16 + $0x38] ss:$24 sps:$4 sm:$0xff]  }
 0x391   :  { %3484 = vmatpush1.bf16.msra.mxu0 %v8712_v20  ;;  %v8780_v20 = vld [vmem:[#allocation16 + $0x6c] ss:$24 sps:$4 sm:$0xff]  }
 0x392   :  { %3494 = vmatprep.subr.bf16.mxu0 %v8717_v23  ;;  %v8778_v23 = vld [vmem:[#allocation16 + $0x68] ss:$24 sps:$4 sm:$0xff]  }
 0x394   :  { %3486 = vmatmul.mubr.bf16.vlgmr.msra.gmra.mrb[16].mxu0 %v2820_v26  ;;  %v8786_v26 = vld [vmem:[#allocation16 + $0x9c] ss:$24 sps:$4 sm:$0xff]  }
 0x395   :  { %3495 = vmatpush1.bf16.msra.mxu0 %v8715_v25  ;;  %v8783_v25 = vld [vmem:[#allocation16 + $0x94] ss:$24 sps:$4 sm:$0xff]  }
 0x396   :  { %3496 = vmatprep.subr.bf16.mxu0 %v8720_v27  ;;  %v8781_v27 = vld [vmem:[#allocation16 + $0x90] ss:$24 sps:$4 sm:$0xff]   ;;  %3884 = vmatprep.subr.bf16.mxu1 %v8783_v25  ;;  %v8838_v25 = vld [vmem:[#allocation14 + $0xc0] ss:$24 sps:$4 sm:$0xff]  }
 0x397   :  { %3885 = vmatpush1.bf16.msra.mxu1 %v8781_v27  ;;  %v8846_v27 = vld [vmem:[#allocation14 + $0xf4] ss:$24 sps:$4 sm:$0xff]  }
 0x398   :  { %3886 = vmatprep.subr.bf16.mxu1 %v8789_v31  ;;  %v8844_v31 = vld [vmem:[#allocation14 + $0xf0] ss:$24 sps:$4 sm:$0xff]  }
 0x399   :  { %3497 = vmatpush1.bf16.msra.mxu0 %v8718_v32  ;;  %v8792_v32 = vld [vmem:[#allocation16 + $0xcc] ss:$24 sps:$4 sm:$0xff]  }
 0x39a   :  { %3498 = vmatprep.subr.bf16.mxu0 %v8723_v29  ;;  %v8790_v29 = vld [vmem:[#allocation16 + $0xc8] ss:$24 sps:$4 sm:$0xff]  }
 0x39b   :  { %3887 = vmatpush1.bf16.msra.mxu1 %v8787_v33  ;;  %v8852_v33 = vld [vmem:[#allocation14 + $0x124] ss:$24 sps:$4 sm:$0xff]  }
 0x39c   :  { %3888 = vmatprep.subr.bf16.mxu1 %v8795_v1  ;;  %v8850_v1 = vld [vmem:[#allocation14 + $0x120] ss:$24 sps:$4 sm:$0xff]  }
 0x39d   :  { %3499 = vmatpush1.bf16.msra.mxu0 %v8721_v35  ;;  %v8798_v35 = vld [vmem:[#allocation16 + $0xfc] ss:$24 sps:$4 sm:$0xff]  }
 0x39e   :  { %3500 = vmatprep.subr.bf16.mxu0 %v8726_v36  ;;  %v8793_v36 = vld [vmem:[#allocation16 + $0xf0] ss:$24 sps:$4 sm:$0xff]  }
 0x39f   :  { %3889 = vmatpush1.bf16.msra.mxu1 %v8793_v36  ;;  %v8858_v36 = vld [vmem:[#allocation14 + $0x154] ss:$24 sps:$4 sm:$0xff]  }
 0x3a1   :  { %3501 = vmatpush1.bf16.msra.mxu0 %v8724_v37  ;;  %v8796_v37 = vld [vmem:[#allocation16 + $0xf8] ss:$24 sps:$4 sm:$0xff]  }
 0x3a2   :  { %3502 = vmatprep.subr.bf16.mxu0 %v8729_v38  ;;  %v8801_v38 = vld [vmem:[#allocation16 + $0x124] ss:$24 sps:$4 sm:$0xff]  }
 0x3a3   :  { %3890 = vmatprep.subr.bf16.mxu1 %v8801_v38  ;;  %v8856_v38 = vld [vmem:[#allocation14 + $0x150] ss:$24 sps:$4 sm:$0xff]  }
 0x3a5   :  { %3503 = vmatpush1.bf16.msra.mxu0 %v8727_v39  ;;  %v8804_v39 = vld [vmem:[#allocation16 + $0x12c] ss:$24 sps:$4 sm:$0xff]  }
 0x3a6   :  { %3504 = vmatprep.subr.bf16.mxu0 %v8732_v58  ;;  %v8799_v58 = vld [vmem:[#allocation16 + $0x120] ss:$24 sps:$4 sm:$0xff]  }
 0x3a7   :  { %3891 = vmatpush1.bf16.msra.mxu1 %v8799_v58  ;;  %v8864_v58 = vld [vmem:[#allocation14 + $0x14] ss:$24 sps:$4 sm:$0xff]  }
 0x3a9   :  { %3505 = vmatpush1.bf16.msra.mxu0 %v8730_v42  ;;  %v8802_v42 = vld [vmem:[#allocation16 + $0x128] ss:$24 sps:$4 sm:$0xff]  }
 0x3aa   :  { %3506 = vmatprep.subr.bf16.mxu0 %v8735_v43  ;;  %v8805_v43 = vld [vmem:[#allocation16 + $0x150] ss:$24 sps:$4 sm:$0xff]  }
 0x3ad   :  { %3507 = vmatpush1.bf16.msra.mxu0 %v8733_v44  ;;  %v8807_v44 = vld [vmem:[#allocation16 + $0x154] ss:$24 sps:$4 sm:$0xff]  }
 0x3ae   :  { %3508 = vmatprep.subr.bf16.mxu0 %v8738_v45  ;;  %v8808_v45 = vld [vmem:[#allocation16 + $0x158] ss:$24 sps:$4 sm:$0xff]   ;;  %3892 = vmatprep.subr.bf16.mxu1 %v8807_v44  ;;  %v8867_v44 = vld [vmem:[#allocation14 + $0x3c] ss:$24 sps:$4 sm:$0xff]  }
 0x3af   :  { %3893 = vmatpush1.bf16.msra.mxu1 %v8805_v43  ;;  %v8862_v43 = vld [vmem:[#allocation14 + $0x10] ss:$24 sps:$4 sm:$0xff]  }
 0x3b1   :  { %3509 = vmatpush1.bf16.msra.mxu0 %v8736_v47  ;;  %v8810_v47 = vld [vmem:[#allocation16 + $0x15c] ss:$24 sps:$4 sm:$0xff]  }
 0x3b2   :  { %3510 = vmatprep.subr.bf16.mxu0 %v8741_v48  ;;  %v8813_v48 = vld [vmem:[#allocation16 + $0x14] ss:$24 sps:$4 sm:$0xff]  }
 0x3b3   :  { %3960 = vmatprep.subr.bf16.mxu1 %v8813_v48  ;;  %v8868_v48 = vld [vmem:[#allocation14 + $0x40] ss:$24 sps:$4 sm:$0xff]  }
 0x3b5   :  { %3511 = vmatpush1.bf16.msra.mxu0 %v8739_v49  ;;  %v8816_v49 = vld [vmem:[#allocation14 + $0x4] ss:$24 sps:$4 sm:$0xff]  }
 0x3b6   :  { %3512 = vmatprep.subr.bf16.mxu0 %v8744_v50  ;;  %v2920_v50 = vld [vmem:[#allocation13] sm:$0x3] }
 0x3b9   :  { %3513 = vmatpush1.bf16.msra.mxu0 %v8742_v56  ;;  %v2925_v56 = vrot.slane %v2920_v50, %v10031_v57 }
 0x3ba   :  { %3514 = vmatprep.subr.bf16.mxu0 %v8747_v51  ;;  %v2929_v51 = vrot.slane %v2920_v50, %v10036_v59  ;;  %v8876_v50 = vld [vmem:[#allocation14 + $0x74] ss:$24 sps:$4 sm:$0xff]  }
 0x3bd   :  { %3515 = vmatpush1.bf16.msra.mxu0 %v8745_v52 }
 0x3be   :  { %3516 = vmatprep.subr.bf16.mxu0 %v8750_v53 }
 0x3c1   :  { %3517 = vmatpush1.bf16.msra.mxu0 %v8748_v55 }
 0x3c2   :  { %3518 = vmatprep.subr.bf16.mxu0 %v8753_v60 }
 0x3c5   :  { %3519 = vmatpush1.bf16.msra.mxu0 %v8751_v61 }
 0x3c6   :  { %3520 = vmatprep.subr.bf16.mxu0 %v8756_v62 }
 0x3c9   :  { %3521 = vmatpush1.bf16.msra.mxu0 %v8754_v63 }
 0x3ca   :  { %3522 = vmatprep.subr.bf16.mxu0 %v8759_v30 }
 0x3cd   :  { %3523 = vmatpush1.bf16.msra.mxu0 %v8757_v2 }
 0x3ce   :  { %3524 = vmatprep.subr.bf16.mxu0 %v8762_v41  ;;  %v227_v41 = vld [vmem:[#allocation2 + $0x8] sm:$0xff] }
 0x3d1   :  { %3525 = vmatpush1.bf16.msra.mxu0 %v8760_v3 }
 0x3d2   :  { %3919 = vmatprep.subr.bf16.mxu0 %v8768_v46 }
 0x40b   :  { %v2805_v6 = vpop.f32.mrb[4].mxu1 }
 0x40c   :  { %v8027_v7 = vadd.f32 %v2805_v6, %v992_v4  ;;  %v2807_v8 = vpop.f32.mrb[5].mxu1  ;;  %v8814_v6 = vld [vmem:[#allocation14] ss:$24 sps:$4 sm:$0xff]  }
 0x40d   :  { %v8028_v9 = vadd.f32 %v2807_v8, %v996_v5  ;;  %v2809_v13 = vpop.f32.mrb[6].mxu1  ;;  %v8811_v5 = vld [vmem:[#allocation16 + $0x10] ss:$24 sps:$4 sm:$0xff]   ;;  %v8819_v8 = vld [vmem:[#allocation16 + $0x44] ss:$24 sps:$4 sm:$0xff]  }
 0x40e   :  { %v2816_v14 = vmax.f32 %v8027_v7, 0.0  ;;  %v2810_v11 = vpop.f32.mrb[7].mxu1  ;;  %v8817_v13 = vld [vmem:[#allocation16 + $0x40] ss:$24 sps:$4 sm:$0xff]  }
 0x40f   :  { %v2817_v10 = vmax.f32 %v8028_v9, 0.0  ;;  %v8822_v9 = vld [vmem:[#allocation14 + $0x34] ss:$24 sps:$4 sm:$0xff]  }
 0x410   :  { %v2822_v16 = vpack.c.bf16 %v2816_v14, %v2816_v14  ;;  %v8820_v14 = vld [vmem:[#allocation14 + $0x30] ss:$24 sps:$4 sm:$0xff]   ;;  %v8825_v11 = vld [vmem:[#allocation16 + $0x74] ss:$24 sps:$4 sm:$0xff]  }
 0x411   :  { %v2823_v15 = vpack.c.bf16 %v2817_v10, %v2817_v10  ;;  %v8828_v10 = vld [vmem:[#allocation14 + $0x64] ss:$24 sps:$4 sm:$0xff]  }
 0x413   :  { %3526 = vmatprep.mubr.bf16.mxu0 %v2823_v15  ;;  %v8823_v15 = vld [vmem:[#allocation16 + $0x70] ss:$24 sps:$4 sm:$0xff]  }
 0x414   :  { %3527 = vmatmul.mubr.bf16.vlgmr.msra.gmra.mrb[16].mxu0 %v2822_v16  ;;  %v8831_v16 = vld [vmem:[#allocation16 + $0xa4] ss:$24 sps:$4 sm:$0xff]  }
 0x415   :  { %3920 = vmatpush1.bf16.msra.mxu0 %v8766_v54  ;;  %3951 = vmatprep.mubr.bf16.mxu0 %v9760_v0  ;;  %v8826_v54 = vld [vmem:[#allocation14 + $0x60] ss:$24 sps:$4 sm:$0xff]  }
 0x416   :  { %3921 = vmatprep.subr.bf16.mxu0 %v8774_v17  ;;  %v8834_v17 = vld [vmem:[#allocation14 + $0x94] ss:$24 sps:$4 sm:$0xff]  }
 0x419   :  { %3922 = vmatpush1.bf16.msra.mxu0 %v8772_v18  ;;  %v8829_v18 = vld [vmem:[#allocation16 + $0xa0] ss:$24 sps:$4 sm:$0xff]  }
 0x41a   :  { %3923 = vmatprep.subr.bf16.mxu0 %v8780_v20  ;;  %v8837_v20 = vld [vmem:[#allocation16 + $0xd4] ss:$24 sps:$4 sm:$0xff]  }
 0x41d   :  { %3924 = vmatpush1.bf16.msra.mxu0 %v8778_v23  ;;  %v8835_v23 = vld [vmem:[#allocation16 + $0xd0] ss:$24 sps:$4 sm:$0xff]  }
 0x41e   :  { %3925 = vmatprep.subr.bf16.mxu0 %v8786_v26  ;;  %v8843_v26 = vld [vmem:[#allocation16 + $0x104] ss:$24 sps:$4 sm:$0xff]  }
 0x421   :  { %3926 = vmatpush1.bf16.msra.mxu0 %v8784_v28  ;;  %v8841_v28 = vld [vmem:[#allocation16 + $0x100] ss:$24 sps:$4 sm:$0xff]  }
 0x422   :  { %3927 = vmatprep.subr.bf16.mxu0 %v8792_v32  ;;  %v8849_v32 = vld [vmem:[#allocation16 + $0x134] ss:$24 sps:$4 sm:$0xff]  }
 0x425   :  { %3928 = vmatpush1.bf16.msra.mxu0 %v8790_v29  ;;  %v8847_v29 = vld [vmem:[#allocation16 + $0x130] ss:$24 sps:$4 sm:$0xff]  }
 0x426   :  { %3929 = vmatprep.subr.bf16.mxu0 %v8798_v35  ;;  %v8855_v35 = vld [vmem:[#allocation16 + $0x164] ss:$24 sps:$4 sm:$0xff]  }
 0x429   :  { %3930 = vmatpush1.bf16.msra.mxu0 %v8796_v37  ;;  %v8853_v37 = vld [vmem:[#allocation16 + $0x160] ss:$24 sps:$4 sm:$0xff]  }
 0x42a   :  { %3931 = vmatprep.subr.bf16.mxu0 %v8804_v39  ;;  %v8861_v39 = vld [vmem:[#allocation14 + $0xc] ss:$24 sps:$4 sm:$0xff]  }
 0x42d   :  { %3932 = vmatpush1.bf16.msra.mxu0 %v8802_v42  ;;  %v8859_v42 = vld [vmem:[#allocation14 + $0x8] ss:$24 sps:$4 sm:$0xff]  }
 0x42e   :  { %3933 = vmatprep.subr.bf16.mxu0 %v8810_v47  ;;  %v8865_v47 = vld [vmem:[#allocation14 + $0x38] ss:$24 sps:$4 sm:$0xff]  }
 0x431   :  { %3934 = vmatpush1.bf16.msra.mxu0 %v8808_v45  ;;  %v8870_v45 = vld [vmem:[#allocation14 + $0x44] ss:$24 sps:$4 sm:$0xff]  }
 0x432   :  { %4241 = vmatprep.subr.bf16.mxu0 %v8816_v49  ;;  %v8873_v49 = vld [vmem:[#allocation14 + $0x6c] ss:$24 sps:$4 sm:$0xff]  }
 0x4e7   :  { %v3528_v52 = vpop.f32.mrb[16].mxu0 }
 0x4e8   :  { %v8029_v53 = vadd.f32 %v3528_v52, %v2925_v56  ;;  %v3530_v55 = vpop.f32.mrb[17].mxu0  ;;  %v8871_v56 = vld [vmem:[#allocation14 + $0x68] ss:$24 sps:$4 sm:$0xff]   ;;  %v8879_v52 = vld [vmem:[#allocation14 + $0x9c] ss:$24 sps:$4 sm:$0xff]  }
 0x4e9   :  { %v8030_v60 = vadd.f32 %v3530_v55, %v2929_v51  ;;  %v3532_v61 = vpop.f32.mrb[18].mxu0  ;;  %v8874_v51 = vld [vmem:[#allocation14 + $0x70] ss:$24 sps:$4 sm:$0xff]  }
 0x4ea   :  { %7068 = vst [vmem:[#allocation25 + $0x8] sm:$0xff] %v8029_v53  ;;  %v3533_v62 = vpop.f32.mrb[19].mxu0  ;;  %v8877_v55 = vld [vmem:[#allocation14 + $0x98] ss:$24 sps:$4 sm:$0xff]   ;;  %v8885_v61 = vld [vmem:[#allocation14 + $0xcc] ss:$24 sps:$4 sm:$0xff]  }
 0x4eb   :  { %v3535_v63 = vmax.f32 %v8030_v60, -4.0  ;;  %v8880_v60 = vld [vmem:[#allocation14 + $0xa0] ss:$24 sps:$4 sm:$0xff]   ;;  %v8888_v62 = vld [vmem:[#allocation14 + $0xd4] ss:$24 sps:$4 sm:$0xff]  }
 0x4ed   :  { %v3536_v30 = vmin.f32 %v3535_v63, 15.0  ;;  %v8883_v63 = vld [vmem:[#allocation14 + $0xc8] ss:$24 sps:$4 sm:$0xff]  }
 0x4ef   :  { %v3537_v2 = vmul.f32 1.442695, %v3536_v30  ;;  %v8891_v30 = vld [vmem:[#allocation14 + $0xfc] ss:$24 sps:$4 sm:$0xff]  }
 0x4f1   :  { %9387 = vpow2.f32 %v3537_v2  ;;  %v8894_v2 = vld [vmem:[#allocation14 + $0x104] ss:$24 sps:$4 sm:$0xff]  }
 0x4fb   :  { %v9388_v3 = vpop.eup %9387 }
 0x4fc   :  { %7069 = vst [vmem:[#allocation25 + $0x10] sm:$0xff] %v9388_v3  ;;  %v3539_v46 = vmul.f32 %v9388_v3, %v227_v41  ;;  %v8889_v41 = vld [vmem:[#allocation14 + $0xf8] ss:$24 sps:$4 sm:$0xff]  }
 0x4fd   :  { %v8892_v3 = vld [vmem:[#allocation14 + $0x100] ss:$24 sps:$4 sm:$0xff]  }
 0x4fe   :  { %v3540_v4 = vadd.f32 %v8029_v53, %v3539_v46  ;;  %v8882_v53 = vld [vmem:[#allocation14 + $0xa4] ss:$24 sps:$4 sm:$0xff]  }
 0x4ff   :  { %v8897_v46 = vld [vmem:[#allocation14 + $0x12c] ss:$24 sps:$4 sm:$0xff]  }
 0x500   :  { %v10118_v7 = vpack.c.bf16 %v3540_v4, %v3540_v4  ;;  %v8900_v4 = vld [vmem:[#allocation14 + $0x134] ss:$24 sps:$4 sm:$0xff]  }
 0x502   :  { %3911 = vmatmul.mubr.bf16.vlgmr.msra.gmra.mrb[8].mxu1 %v10118_v7  ;;  %3952 = vmatmul.mubr.bf16.vlgmr.msra.gmra.mrb[20].mxu0 %v10118_v7 }
 0x503   :  { %3961 = vmatpush1.bf16.msra.mxu1 %v8811_v5  ;;  %4242 = vmatpush1.bf16.msra.mxu0 %v8814_v6  ;;  %v8895_v5 = vld [vmem:[#allocation14 + $0x128] ss:$24 sps:$4 sm:$0xff]  }
 0x504   :  { %3962 = vmatprep.subr.bf16.mxu1 %v8819_v8  ;;  %4243 = vmatprep.subr.bf16.mxu0 %v8822_v9  ;;  %v8898_v6 = vld [vmem:[#allocation14 + $0x130] ss:$24 sps:$4 sm:$0xff]   ;;  %v8906_v8 = vld [vmem:[#allocation14 + $0x164] ss:$24 sps:$4 sm:$0xff]  }
 0x505   :  { %3992 = vmatprep.mubr.bf16.mxu1 %v9760_v0  ;;  %4273 = vmatprep.mubr.bf16.mxu0 %v9760_v0  ;;  %v8901_v9 = vld [vmem:[#allocation14 + $0x158] ss:$24 sps:$4 sm:$0xff]  }
 0x507   :  { %3963 = vmatpush1.bf16.msra.mxu1 %v8817_v13  ;;  %4244 = vmatpush1.bf16.msra.mxu0 %v8820_v14  ;;  %v8904_v13 = vld [vmem:[#allocation14 + $0x160] ss:$24 sps:$4 sm:$0xff]  }
 0x508   :  { %3964 = vmatprep.subr.bf16.mxu1 %v8825_v11  ;;  %4245 = vmatprep.subr.bf16.mxu0 %v8828_v10  ;;  %v8909_v14 = vld [vmem:[#allocation19 + $0x4] ss:$24 sps:$4 sm:$0xff]   ;;  %v8907_v10 = vld [vmem:[#allocation19] ss:$24 sps:$4 sm:$0xff]  }
 0x509   :  { %v8912_v11 = vld [vmem:[#allocation19 + $0xc] ss:$24 sps:$4 sm:$0xff]  }
 0x50b   :  { %3965 = vmatpush1.bf16.msra.mxu1 %v8823_v15  ;;  %4246 = vmatpush1.bf16.msra.mxu0 %v8826_v54  ;;  %v8910_v15 = vld [vmem:[#allocation19 + $0x8] ss:$24 sps:$4 sm:$0xff]   ;;  %v8915_v54 = vld [vmem:[#allocation19 + $0x34] ss:$24 sps:$4 sm:$0xff]  }
 0x50c   :  { %3966 = vmatprep.subr.bf16.mxu1 %v8831_v16  ;;  %4247 = vmatprep.subr.bf16.mxu0 %v8834_v17  ;;  %v8918_v16 = vld [vmem:[#allocation19 + $0x3c] ss:$24 sps:$4 sm:$0xff]   ;;  %v8913_v17 = vld [vmem:[#allocation19 + $0x30] ss:$24 sps:$4 sm:$0xff]  }
 0x50f   :  { %3967 = vmatpush1.bf16.msra.mxu1 %v8829_v18  ;;  %4248 = vmatpush1.bf16.msra.mxu0 %v8832_v24  ;;  %v8916_v18 = vld [vmem:[#allocation19 + $0x38] ss:$24 sps:$4 sm:$0xff]   ;;  %v8921_v24 = vld [vmem:[#allocation19 + $0x64] ss:$24 sps:$4 sm:$0xff]  }
 0x510   :  { %3968 = vmatprep.subr.bf16.mxu1 %v8837_v20  ;;  %4249 = vmatprep.subr.bf16.mxu0 %v8840_v22  ;;  %v8924_v20 = vld [vmem:[#allocation19 + $0x6c] ss:$24 sps:$4 sm:$0xff]   ;;  %v8919_v22 = vld [vmem:[#allocation19 + $0x60] ss:$24 sps:$4 sm:$0xff]  }
 0x513   :  { %3969 = vmatpush1.bf16.msra.mxu1 %v8835_v23  ;;  %4250 = vmatpush1.bf16.msra.mxu0 %v8838_v25  ;;  %v8922_v23 = vld [vmem:[#allocation19 + $0x68] ss:$24 sps:$4 sm:$0xff]   ;;  %v8927_v25 = vld [vmem:[#allocation19 + $0x94] ss:$24 sps:$4 sm:$0xff]  }
 0x514   :  { %3970 = vmatprep.subr.bf16.mxu1 %v8843_v26  ;;  %4251 = vmatprep.subr.bf16.mxu0 %v8846_v27  ;;  %v8930_v26 = vld [vmem:[#allocation19 + $0x9c] ss:$24 sps:$4 sm:$0xff]   ;;  %v8925_v27 = vld [vmem:[#allocation19 + $0x90] ss:$24 sps:$4 sm:$0xff]  }
 0x517   :  { %3971 = vmatpush1.bf16.msra.mxu1 %v8841_v28  ;;  %4252 = vmatpush1.bf16.msra.mxu0 %v8844_v31  ;;  %v8933_v28 = vld [vmem:[#allocation19 + $0xc4] ss:$24 sps:$4 sm:$0xff]  }
 0x518   :  { %3972 = vmatprep.subr.bf16.mxu1 %v8849_v32  ;;  %4253 = vmatprep.subr.bf16.mxu0 %v8852_v33  ;;  %v8936_v31 = vld [vmem:[#allocation19 + $0xcc] ss:$24 sps:$4 sm:$0xff]   ;;  %v8931_v32 = vld [vmem:[#allocation19 + $0xc0] ss:$24 sps:$4 sm:$0xff]  }
 0x519   :  { %v8934_v33 = vld [vmem:[#allocation19 + $0xc8] ss:$24 sps:$4 sm:$0xff]  }
 0x51b   :  { %3973 = vmatpush1.bf16.msra.mxu1 %v8847_v29  ;;  %4254 = vmatpush1.bf16.msra.mxu0 %v8850_v1  ;;  %v8939_v29 = vld [vmem:[#allocation19 + $0xf4] ss:$24 sps:$4 sm:$0xff]  }
 0x51c   :  { %3974 = vmatprep.subr.bf16.mxu1 %v8855_v35  ;;  %4255 = vmatprep.subr.bf16.mxu0 %v8858_v36  ;;  %v8942_v1 = vld [vmem:[#allocation19 + $0xfc] ss:$24 sps:$4 sm:$0xff]   ;;  %v8937_v35 = vld [vmem:[#allocation19 + $0xf0] ss:$24 sps:$4 sm:$0xff]  }
 0x51d   :  { %v8940_v36 = vld [vmem:[#allocation19 + $0xf8] ss:$24 sps:$4 sm:$0xff]  }
 0x51f   :  { %3975 = vmatpush1.bf16.msra.mxu1 %v8853_v37  ;;  %4256 = vmatpush1.bf16.msra.mxu0 %v8856_v38  ;;  %v8945_v37 = vld [vmem:[#allocation19 + $0x124] ss:$24 sps:$4 sm:$0xff]  }
 0x520   :  { %4282 = vmatprep.subr.bf16.mxu1 %v8861_v39  ;;  %4323 = vmatprep.subr.bf16.mxu0 %v8864_v58  ;;  %v8948_v38 = vld [vmem:[#allocation19 + $0x12c] ss:$24 sps:$4 sm:$0xff]   ;;  %v8943_v39 = vld [vmem:[#allocation19 + $0x120] ss:$24 sps:$4 sm:$0xff]  }
 0x521   :  { %v8946_v58 = vld [vmem:[#allocation19 + $0x128] ss:$24 sps:$4 sm:$0xff]  }
 0x522   :  { %3993 = vmatmul.mubr.bf16.vlgmr.msra.gmra.mrb[12].mxu1 %v10118_v7  ;;  %4274 = vmatmul.mubr.bf16.vlgmr.msra.gmra.mrb[24].mxu0 %v10021_v19  ;;  %v8903_v7 = vld [vmem:[#allocation14 + $0x15c] ss:$24 sps:$4 sm:$0xff]  }
 0x523   :  { %4283 = vmatpush1.bf16.msra.mxu1 %v8859_v42  ;;  %4324 = vmatpush1.bf16.msra.mxu0 %v8862_v43  ;;  %v8951_v42 = vld [vmem:[#allocation19 + $0x154] ss:$24 sps:$4 sm:$0xff]  }
 0x524   :  { %4284 = vmatprep.subr.bf16.mxu1 %v8867_v44  ;;  %4325 = vmatprep.subr.bf16.mxu0 %v8870_v45  ;;  %v8954_v43 = vld [vmem:[#allocation19 + $0x15c] ss:$24 sps:$4 sm:$0xff]   ;;  %v8949_v44 = vld [vmem:[#allocation19 + $0x150] ss:$24 sps:$4 sm:$0xff]  }
 0x525   :  { %4314 = vmatprep.mubr.bf16.mxu1 %v9760_v0  ;;  %4355 = vmatprep.mubr.bf16.mxu0 %v9760_v0  ;;  %v8886_v0 = vld [vmem:[#allocation14 + $0xd0] ss:$24 sps:$4 sm:$0xff]   ;;  %v8952_v45 = vld [vmem:[#allocation19 + $0x158] ss:$24 sps:$4 sm:$0xff]  }
 0x527   :  { %4285 = vmatpush1.bf16.msra.mxu1 %v8865_v47  ;;  %4326 = vmatpush1.bf16.msra.mxu0 %v8868_v48  ;;  %v8957_v47 = vld [vmem:[#allocation19 + $0x184] ss:$24 sps:$4 sm:$0xff]  }
 0x528   :  { %4286 = vmatprep.subr.bf16.mxu1 %v8873_v49  ;;  %4327 = vmatprep.subr.bf16.mxu0 %v8876_v50  ;;  %v8960_v48 = vld [vmem:[#allocation19 + $0x18c] ss:$24 sps:$4 sm:$0xff]   ;;  %v8955_v49 = vld [vmem:[#allocation19 + $0x180] ss:$24 sps:$4 sm:$0xff]  }
 0x529   :  { %v8958_v50 = vld [vmem:[#allocation19 + $0x188] ss:$24 sps:$4 sm:$0xff]  }
 0x52b   :  { %4287 = vmatpush1.bf16.msra.mxu1 %v8871_v56  ;;  %4328 = vmatpush1.bf16.msra.mxu0 %v8874_v51  ;;  %v8963_v56 = vld [vmem:[#allocation19 + $0x1b4] ss:$24 sps:$4 sm:$0xff]  }
 0x52c   :  { %4288 = vmatprep.subr.bf16.mxu1 %v8879_v52  ;;  %4329 = vmatprep.subr.bf16.mxu0 %v8882_v53  ;;  %v8966_v51 = vld [vmem:[#allocation19 + $0x1bc] ss:$24 sps:$4 sm:$0xff]   ;;  %v8961_v52 = vld [vmem:[#allocation19 + $0x1b0] ss:$24 sps:$4 sm:$0xff]  }
 0x52d   :  { %v8964_v53 = vld [vmem:[#allocation19 + $0x1b8] ss:$24 sps:$4 sm:$0xff]  }
 0x52f   :  { %4289 = vmatpush1.bf16.msra.mxu1 %v8877_v55  ;;  %4330 = vmatpush1.bf16.msra.mxu0 %v8880_v60  ;;  %v8969_v55 = vld [vmem:[#allocation19 + $0x1e4] ss:$24 sps:$4 sm:$0xff]  }
 0x530   :  { %4290 = vmatprep.subr.bf16.mxu1 %v8885_v61  ;;  %4331 = vmatprep.subr.bf16.mxu0 %v8888_v62  ;;  %v8972_v60 = vld [vmem:[#allocation19 + $0x1ec] ss:$24 sps:$4 sm:$0xff]   ;;  %v8967_v61 = vld [vmem:[#allocation19 + $0x1e0] ss:$24 sps:$4 sm:$0xff]  }
 0x531   :  { %v8970_v62 = vld [vmem:[#allocation19 + $0x1e8] ss:$24 sps:$4 sm:$0xff]  }
 0x533   :  { %4291 = vmatpush1.bf16.msra.mxu1 %v8883_v63  ;;  %4332 = vmatpush1.bf16.msra.mxu0 %v8886_v0  ;;  %v8975_v63 = vld [vmem:[#allocation19 + $0x214] ss:$24 sps:$4 sm:$0xff]  }
 0x534   :  { %4292 = vmatprep.subr.bf16.mxu1 %v8891_v30  ;;  %4333 = vmatprep.subr.bf16.mxu0 %v8894_v2  ;;  %v8978_v0 = vld [vmem:[#allocation19 + $0x21c] ss:$24 sps:$4 sm:$0xff]   ;;  %v8973_v30 = vld [vmem:[#allocation19 + $0x210] ss:$24 sps:$4 sm:$0xff]  }
 0x535   :  { %v8976_v2 = vld [vmem:[#allocation19 + $0x218] ss:$24 sps:$4 sm:$0xff]  }
 0x537   :  { %4293 = vmatpush1.bf16.msra.mxu1 %v8889_v41  ;;  %4334 = vmatpush1.bf16.msra.mxu0 %v8892_v3  ;;  %v8981_v41 = vld [vmem:[#allocation19 + $0x244] ss:$24 sps:$4 sm:$0xff]  }
 0x538   :  { %4294 = vmatprep.subr.bf16.mxu1 %v8897_v46  ;;  %4335 = vmatprep.subr.bf16.mxu0 %v8900_v4  ;;  %v8984_v3 = vld [vmem:[#allocation19 + $0x24c] ss:$24 sps:$4 sm:$0xff]   ;;  %v8979_v46 = vld [vmem:[#allocation19 + $0x240] ss:$24 sps:$4 sm:$0xff]  }
 0x539   :  { %v8982_v4 = vld [vmem:[#allocation19 + $0x248] ss:$24 sps:$4 sm:$0xff]  }
 0x53b   :  { %4295 = vmatpush1.bf16.msra.mxu1 %v8895_v5  ;;  %4336 = vmatpush1.bf16.msra.mxu0 %v8898_v6  ;;  %v8987_v5 = vld [vmem:[#allocation19 + $0x274] ss:$24 sps:$4 sm:$0xff]  }
 0x53c   :  { %4296 = vmatprep.subr.bf16.mxu1 %v8903_v7  ;;  %4337 = vmatprep.subr.bf16.mxu0 %v8906_v8  ;;  %v8990_v6 = vld [vmem:[#allocation19 + $0x27c] ss:$24 sps:$4 sm:$0xff]   ;;  %v8985_v7 = vld [vmem:[#allocation19 + $0x270] ss:$24 sps:$4 sm:$0xff]  }
 0x53d   :  { %v8988_v8 = vld [vmem:[#allocation19 + $0x278] ss:$24 sps:$4 sm:$0xff]  }
 0x53f   :  { %4297 = vmatpush1.bf16.msra.mxu1 %v8901_v9  ;;  %4338 = vmatpush1.bf16.msra.mxu0 %v8904_v13  ;;  %v8993_v9 = vld [vmem:[#allocation19 + $0x2a4] ss:$24 sps:$4 sm:$0xff]  }
 0x540   :  { %6174 = vmatprep.subr.bf16.mxu1 %v8909_v14  ;;  %6297 = vmatprep.subr.bf16.mxu0 %v8912_v11  ;;  %v8996_v13 = vld [vmem:[#allocation19 + $0x2ac] ss:$24 sps:$4 sm:$0xff]   ;;  %v8991_v14 = vld [vmem:[#allocation19 + $0x2a0] ss:$24 sps:$4 sm:$0xff]  }
 0x541   :  { %v8994_v11 = vld [vmem:[#allocation19 + $0x2a8] ss:$24 sps:$4 sm:$0xff]  }
 0x542   :  { %4315 = vmatmul.mubr.bf16.vlgmr.msra.gmra.mrb[16].mxu1 %v10021_v19  ;;  %4356 = vmatmul.mubr.bf16.vlgmr.msra.gmra.mrb[28].mxu0 %v10021_v19  ;;  %v8928_v19 = vld [vmem:[#allocation19 + $0x98] ss:$24 sps:$4 sm:$0xff]  }
 0x543   :  { %6175 = vmatpush1.bf16.msra.mxu1 %v8907_v10  ;;  %6298 = vmatpush1.bf16.msra.mxu0 %v8910_v15  ;;  %v8999_v10 = vld [vmem:[#allocation19 + $0x2d4] ss:$24 sps:$4 sm:$0xff]  }
 0x544   :  { %6176 = vmatprep.subr.bf16.mxu1 %v8915_v54  ;;  %6299 = vmatprep.subr.bf16.mxu0 %v8918_v16  ;;  %v9002_v15 = vld [vmem:[#allocation19 + $0x2dc] ss:$24 sps:$4 sm:$0xff]   ;;  %v8997_v54 = vld [vmem:[#allocation19 + $0x2d0] ss:$24 sps:$4 sm:$0xff]  }
 0x545   :  { %v9000_v16 = vld [vmem:[#allocation19 + $0x2d8] ss:$24 sps:$4 sm:$0xff]  }
 0x547   :  { %6177 = vmatpush1.bf16.msra.mxu1 %v8913_v17  ;;  %6300 = vmatpush1.bf16.msra.mxu0 %v8916_v18  ;;  %v9005_v17 = vld [vmem:[#allocation19 + $0x304] ss:$24 sps:$4 sm:$0xff]  }
 0x548   :  { %6178 = vmatprep.subr.bf16.mxu1 %v8921_v24  ;;  %6301 = vmatprep.subr.bf16.mxu0 %v8924_v20  ;;  %v9008_v18 = vld [vmem:[#allocation19 + $0x30c] ss:$24 sps:$4 sm:$0xff]  }
 0x54b   :  { %6179 = vmatpush1.bf16.msra.mxu1 %v8919_v22  ;;  %6302 = vmatpush1.bf16.msra.mxu0 %v8922_v23 }
 0x54c   :  { %6180 = vmatprep.subr.bf16.mxu1 %v8927_v25  ;;  %6303 = vmatprep.subr.bf16.mxu0 %v8930_v26 }
 0x54f   :  { %6181 = vmatpush1.bf16.msra.mxu1 %v8925_v27  ;;  %6304 = vmatpush1.bf16.msra.mxu0 %v8928_v19 }
 0x550   :  { %6182 = vmatprep.subr.bf16.mxu1 %v8933_v28  ;;  %6305 = vmatprep.subr.bf16.mxu0 %v8936_v31  ;;  %v10134_v28 = vld [vmem:[#allocation17] sm:$0x3f] }
 0x551   :  { %v4369_v31 = vrot.slane %v10134_v28, %v10031_v57 }
 0x553   :  { %6183 = vmatpush1.bf16.msra.mxu1 %v8931_v32  ;;  %6306 = vmatpush1.bf16.msra.mxu0 %v8934_v33 }
 0x554   :  { %6184 = vmatprep.subr.bf16.mxu1 %v8939_v29  ;;  %6307 = vmatprep.subr.bf16.mxu0 %v8942_v1  ;;  %v4373_v29 = vrot.slane %v10134_v28, %v10036_v59 }
 0x557   :  { %6185 = vmatpush1.bf16.msra.mxu1 %v8937_v35  ;;  %6308 = vmatpush1.bf16.msra.mxu0 %v8940_v36 }
 0x558   :  { %6186 = vmatprep.subr.bf16.mxu1 %v8945_v37  ;;  %6309 = vmatprep.subr.bf16.mxu0 %v8948_v38 }
 0x55b   :  { %6187 = vmatpush1.bf16.msra.mxu1 %v8943_v39  ;;  %6310 = vmatpush1.bf16.msra.mxu0 %v8946_v58 }
 0x55c   :  { %6188 = vmatprep.subr.bf16.mxu1 %v8951_v42  ;;  %6311 = vmatprep.subr.bf16.mxu0 %v8954_v43 }
 0x55f   :  { %6189 = vmatpush1.bf16.msra.mxu1 %v8949_v44  ;;  %6312 = vmatpush1.bf16.msra.mxu0 %v8952_v45 }
 0x560   :  { %6190 = vmatprep.subr.bf16.mxu1 %v8957_v47  ;;  %6313 = vmatprep.subr.bf16.mxu0 %v8960_v48 }
 0x563   :  { %6191 = vmatpush1.bf16.msra.mxu1 %v8955_v49  ;;  %6314 = vmatpush1.bf16.msra.mxu0 %v8958_v50  ;;  %v9003_v49 = vld [vmem:[#allocation19 + $0x300] ss:$24 sps:$4 sm:$0xff]  }
 0x564   :  { %6192 = vmatprep.subr.bf16.mxu1 %v8963_v56  ;;  %6315 = vmatprep.subr.bf16.mxu0 %v8966_v51  ;;  %v9006_v50 = vld [vmem:[#allocation19 + $0x308] ss:$24 sps:$4 sm:$0xff]   ;;  %v9011_v51 = vld [vmem:[#allocation19 + $0x334] ss:$24 sps:$4 sm:$0xff]  }
 0x567   :  { %6193 = vmatpush1.bf16.msra.mxu1 %v8961_v52  ;;  %6316 = vmatpush1.bf16.msra.mxu0 %v8964_v53  ;;  %v9014_v52 = vld [vmem:[#allocation19 + $0x33c] ss:$24 sps:$4 sm:$0xff]   ;;  %v9009_v53 = vld [vmem:[#allocation19 + $0x330] ss:$24 sps:$4 sm:$0xff]  }
 0x568   :  { %6194 = vmatprep.subr.bf16.mxu1 %v8969_v55  ;;  %6317 = vmatprep.subr.bf16.mxu0 %v8972_v60  ;;  %v9012_v55 = vld [vmem:[#allocation19 + $0x338] ss:$24 sps:$4 sm:$0xff]   ;;  %v9017_v60 = vld [vmem:[#allocation19 + $0x364] ss:$24 sps:$4 sm:$0xff]  }
 0x56b   :  { %6195 = vmatpush1.bf16.msra.mxu1 %v8967_v61  ;;  %6318 = vmatpush1.bf16.msra.mxu0 %v8970_v62  ;;  %v9020_v61 = vld [vmem:[#allocation19 + $0x36c] ss:$24 sps:$4 sm:$0xff]   ;;  %v9015_v62 = vld [vmem:[#allocation19 + $0x360] ss:$24 sps:$4 sm:$0xff]  }
 0x56c   :  { %6196 = vmatprep.subr.bf16.mxu1 %v8975_v63  ;;  %6319 = vmatprep.subr.bf16.mxu0 %v8978_v0  ;;  %v9018_v63 = vld [vmem:[#allocation19 + $0x368] ss:$24 sps:$4 sm:$0xff]   ;;  %v9023_v0 = vld [vmem:[#allocation19 + $0x394] ss:$24 sps:$4 sm:$0xff]  }
 0x56f   :  { %6197 = vmatpush1.bf16.msra.mxu1 %v8973_v30  ;;  %6320 = vmatpush1.bf16.msra.mxu0 %v8976_v2  ;;  %v9026_v30 = vld [vmem:[#allocation19 + $0x39c] ss:$24 sps:$4 sm:$0xff]   ;;  %v9021_v2 = vld [vmem:[#allocation19 + $0x390] ss:$24 sps:$4 sm:$0xff]  }
 0x570   :  { %6198 = vmatprep.subr.bf16.mxu1 %v8981_v41  ;;  %6321 = vmatprep.subr.bf16.mxu0 %v8984_v3  ;;  %v9024_v41 = vld [vmem:[#allocation19 + $0x398] ss:$24 sps:$4 sm:$0xff]   ;;  %v9029_v3 = vld [vmem:[#allocation19 + $0x3c4] ss:$24 sps:$4 sm:$0xff]  }
 0x573   :  { %6199 = vmatpush1.bf16.msra.mxu1 %v8979_v46  ;;  %6322 = vmatpush1.bf16.msra.mxu0 %v8982_v4  ;;  %v9032_v46 = vld [vmem:[#allocation19 + $0x3cc] ss:$24 sps:$4 sm:$0xff]   ;;  %v9027_v4 = vld [vmem:[#allocation19 + $0x3c0] ss:$24 sps:$4 sm:$0xff]  }
 0x574   :  { %6200 = vmatprep.subr.bf16.mxu1 %v8987_v5  ;;  %6323 = vmatprep.subr.bf16.mxu0 %v8990_v6  ;;  %v9030_v5 = vld [vmem:[#allocation19 + $0x3c8] ss:$24 sps:$4 sm:$0xff]   ;;  %v9035_v6 = vld [vmem:[#allocation19 + $0x3f4] ss:$24 sps:$4 sm:$0xff]  }
 0x577   :  { %6201 = vmatpush1.bf16.msra.mxu1 %v8985_v7  ;;  %6324 = vmatpush1.bf16.msra.mxu0 %v8988_v8  ;;  %v9038_v7 = vld [vmem:[#allocation19 + $0x3fc] ss:$24 sps:$4 sm:$0xff]   ;;  %v9033_v8 = vld [vmem:[#allocation19 + $0x3f0] ss:$24 sps:$4 sm:$0xff]  }
 0x578   :  { %6202 = vmatprep.subr.bf16.mxu1 %v8993_v9  ;;  %6325 = vmatprep.subr.bf16.mxu0 %v8996_v13  ;;  %v9036_v9 = vld [vmem:[#allocation19 + $0x3f8] ss:$24 sps:$4 sm:$0xff]   ;;  %v9041_v13 = vld [vmem:[#allocation19 + $0x424] ss:$24 sps:$4 sm:$0xff]  }
 0x57b   :  { %6203 = vmatpush1.bf16.msra.mxu1 %v8991_v14  ;;  %6326 = vmatpush1.bf16.msra.mxu0 %v8994_v11  ;;  %v9044_v14 = vld [vmem:[#allocation19 + $0x42c] ss:$24 sps:$4 sm:$0xff]   ;;  %v4377_v11 = vrot.slane %v10134_v28, %v10062_v12 }
 0x57c   :  { %6204 = vmatprep.subr.bf16.mxu1 %v8999_v10  ;;  %6327 = vmatprep.subr.bf16.mxu0 %v9002_v15  ;;  %v4385_v10 = vrot.slane %v10134_v28, %v10083_v40 }
 0x57f   :  { %6205 = vmatpush1.bf16.msra.mxu1 %v8997_v54  ;;  %6328 = vmatpush1.bf16.msra.mxu0 %v9000_v16  ;;  %v4381_v16 = vrot.slane %v10134_v28, %v10051_v34 }
 0x580   :  { %6215 = vmatprep.subr.bf16.mxu1 %v9005_v17  ;;  %6338 = vmatprep.subr.bf16.mxu0 %v9008_v18  ;;  %v4389_v17 = vrot.slane %v10134_v28, %v10067_v21  ;;  %v9039_v18 = vld [vmem:[#allocation19 + $0x420] ss:$24 sps:$4 sm:$0xff]  }
 0x5d5   :  { %v3912_v24 = vpop.f32.mrb[8].mxu1  ;;  %v10130_v20 = vpop.f32.mrb[20].mxu0 }
 0x5d6   :  { %v3914_v22 = vpop.f32.mrb[9].mxu1  ;;  %v10132_v23 = vpop.f32.mrb[21].mxu0 }
 0x5d7   :  { %v3916_v25 = vpop.f32.mrb[10].mxu1  ;;  %v3957_v26 = vpop.f32.mrb[22].mxu0 }
 0x5d8   :  { %v3917_v27 = vpop.f32.mrb[11].mxu1  ;;  %v3958_v19 = vpop.f32.mrb[23].mxu0 }
 0x5d9   :  { %v9047_v19 = vld [vmem:[#allocation19 + $0x454] ss:$24 sps:$4 sm:$0xff]  }
 0x5f5   :  { %v10138_v32 = vpop.f32.mrb[12].mxu1  ;;  %v4275_v33 = vpop.f32.mrb[24].mxu0 }
 0x5f6   :  { %v4276_v1 = vadd.f32 %v4275_v33, %v3912_v24  ;;  %v10142_v35 = vpop.f32.mrb[13].mxu1  ;;  %v4277_v36 = vpop.f32.mrb[25].mxu0  ;;  %v9042_v24 = vld [vmem:[#allocation19 + $0x428] ss:$24 sps:$4 sm:$0xff]  }
 0x5f7   :  { %v4278_v37 = vadd.f32 %v4277_v36, %v3914_v22  ;;  %v3998_v38 = vpop.f32.mrb[14].mxu1  ;;  %v4279_v39 = vpop.f32.mrb[26].mxu0 }
 0x5f8   :  { %v4396_v58 = vadd.f32 %v4369_v31, %v4276_v1  ;;  %v3999_v42 = vpop.f32.mrb[15].mxu1  ;;  %v4280_v43 = vpop.f32.mrb[27].mxu0  ;;  %v9050_v31 = vld [vmem:[#allocation19 + $0x45c] ss:$24 sps:$4 sm:$0xff]  }
 0x5f9   :  { %v4397_v44 = vadd.f32 %v4373_v29, %v4278_v37  ;;  %v9048_v42 = vld [vmem:[#allocation19 + $0x458] ss:$24 sps:$4 sm:$0xff]   ;;  %v9056_v43 = vld [vmem:[#allocation19 + $0x48c] ss:$24 sps:$4 sm:$0xff]  }
 0x5fa   :  { %v4402_v45 = vmax.f32 %v4396_v58, 0.0  ;;  %v9045_v58 = vld [vmem:[#allocation19 + $0x450] ss:$24 sps:$4 sm:$0xff]  }
 0x5fb   :  { %v4403_v47 = vmax.f32 %v4397_v44, 0.0 }
 0x5fc   :  { %v10146_v56 = vpack.c.bf16 %v4402_v45, %v4402_v45  ;;  %v9051_v45 = vld [vmem:[#allocation19 + $0x480] ss:$24 sps:$4 sm:$0xff]  }
 0x5fd   :  { %v10144_v48 = vpack.c.bf16 %v4403_v47, %v4403_v47  ;;  %v9054_v47 = vld [vmem:[#allocation19 + $0x488] ss:$24 sps:$4 sm:$0xff]  }
 0x5ff   :  { %6206 = vmatprep.mubr.bf16.mxu1 %v10144_v48  ;;  %6329 = vmatprep.mubr.bf16.mxu0 %v10144_v48 }
 0x600   :  { %6207 = vmatmul.mubr.bf16.vlgmr.msra.gmra.mrb[20].mxu1 %v10146_v56  ;;  %6330 = vmatmul.mubr.bf16.vlgmr.msra.gmra.mrb[32].mxu0 %v10146_v56 }
 0x601   :  { %6216 = vmatpush1.bf16.msra.mxu1 %v9003_v49  ;;  %6339 = vmatpush1.bf16.msra.mxu0 %v9006_v50  ;;  %v9059_v49 = vld [vmem:[#allocation19 + $0x4b4] ss:$24 sps:$4 sm:$0xff]  }
 0x602   :  { %6217 = vmatprep.subr.bf16.mxu1 %v9011_v51  ;;  %6340 = vmatprep.subr.bf16.mxu0 %v9014_v52  ;;  %v9062_v50 = vld [vmem:[#allocation19 + $0x4bc] ss:$24 sps:$4 sm:$0xff]   ;;  %v9057_v51 = vld [vmem:[#allocation19 + $0x4b0] ss:$24 sps:$4 sm:$0xff]  }
 0x603   :  { %v9060_v52 = vld [vmem:[#allocation19 + $0x4b8] ss:$24 sps:$4 sm:$0xff]  }
 0x605   :  { %6218 = vmatpush1.bf16.msra.mxu1 %v9009_v53  ;;  %6341 = vmatpush1.bf16.msra.mxu0 %v9012_v55  ;;  %v9065_v53 = vld [vmem:[#allocation19 + $0x4e4] ss:$24 sps:$4 sm:$0xff]  }
 0x606   :  { %6219 = vmatprep.subr.bf16.mxu1 %v9017_v60  ;;  %6342 = vmatprep.subr.bf16.mxu0 %v9020_v61  ;;  %v9068_v55 = vld [vmem:[#allocation19 + $0x4ec] ss:$24 sps:$4 sm:$0xff]   ;;  %v9063_v60 = vld [vmem:[#allocation19 + $0x4e0] ss:$24 sps:$4 sm:$0xff]  }
 0x607   :  { %v9066_v61 = vld [vmem:[#allocation19 + $0x4e8] ss:$24 sps:$4 sm:$0xff]  }
 0x609   :  { %6220 = vmatpush1.bf16.msra.mxu1 %v9015_v62  ;;  %6343 = vmatpush1.bf16.msra.mxu0 %v9018_v63  ;;  %v9071_v62 = vld [vmem:[#allocation19 + $0x514] ss:$24 sps:$4 sm:$0xff]  }
 0x60a   :  { %6221 = vmatprep.subr.bf16.mxu1 %v9023_v0  ;;  %6344 = vmatprep.subr.bf16.mxu0 %v9026_v30  ;;  %v9074_v63 = vld [vmem:[#allocation19 + $0x51c] ss:$24 sps:$4 sm:$0xff]   ;;  %v9069_v0 = vld [vmem:[#allocation19 + $0x510] ss:$24 sps:$4 sm:$0xff]  }
 0x60b   :  { %v9072_v30 = vld [vmem:[#allocation19 + $0x518] ss:$24 sps:$4 sm:$0xff]  }
 0x60d   :  { %6222 = vmatpush1.bf16.msra.mxu1 %v9021_v2  ;;  %6345 = vmatpush1.bf16.msra.mxu0 %v9024_v41  ;;  %v9077_v2 = vld [vmem:[#allocation19 + $0x544] ss:$24 sps:$4 sm:$0xff]  }
 0x60e   :  { %6223 = vmatprep.subr.bf16.mxu1 %v9029_v3  ;;  %6346 = vmatprep.subr.bf16.mxu0 %v9032_v46  ;;  %v9080_v41 = vld [vmem:[#allocation19 + $0x54c] ss:$24 sps:$4 sm:$0xff]   ;;  %v9075_v3 = vld [vmem:[#allocation19 + $0x540] ss:$24 sps:$4 sm:$0xff]  }
 0x60f   :  { %v9078_v46 = vld [vmem:[#allocation19 + $0x548] ss:$24 sps:$4 sm:$0xff]  }
 0x611   :  { %6224 = vmatpush1.bf16.msra.mxu1 %v9027_v4  ;;  %6347 = vmatpush1.bf16.msra.mxu0 %v9030_v5  ;;  %v9083_v4 = vld [vmem:[#allocation19 + $0x574] ss:$24 sps:$4 sm:$0xff]  }
 0x612   :  { %6225 = vmatprep.subr.bf16.mxu1 %v9035_v6  ;;  %6348 = vmatprep.subr.bf16.mxu0 %v9038_v7  ;;  %v9086_v5 = vld [vmem:[#allocation19 + $0x57c] ss:$24 sps:$4 sm:$0xff]   ;;  %v9081_v6 = vld [vmem:[#allocation19 + $0x570] ss:$24 sps:$4 sm:$0xff]  }
 0x613   :  { %v9084_v7 = vld [vmem:[#allocation19 + $0x578] ss:$24 sps:$4 sm:$0xff]  }
 0x615   :  { %6226 = vmatpush1.bf16.msra.mxu1 %v9033_v8  ;;  %6349 = vmatpush1.bf16.msra.mxu0 %v9036_v9  ;;  %v4316_v15 = vpop.f32.mrb[16].mxu1  ;;  %v4357_v54 = vpop.f32.mrb[28].mxu0  ;;  %v9089_v8 = vld [vmem:[#allocation19 + $0x5a4] ss:$24 sps:$4 sm:$0xff]  }
 0x616   :  { %v4317_v22 = vadd.f32 %v4316_v15, %v10130_v20  ;;  %v4358_v25 = vadd.f32 %v4357_v54, %v10138_v32  ;;  %v4318_v26 = vpop.f32.mrb[17].mxu1  ;;  %v4359_v27 = vpop.f32.mrb[29].mxu0  ;;  %6227 = vmatprep.subr.bf16.mxu1 %v9041_v13  ;;  %6350 = vmatprep.subr.bf16.mxu0 %v9044_v14  ;;  %v9092_v9 = vld [vmem:[#allocation19 + $0x5ac] ss:$24 sps:$4 sm:$0xff]   ;;  %v9087_v13 = vld [vmem:[#allocation19 + $0x5a0] ss:$24 sps:$4 sm:$0xff]  }
 0x617   :  { %v4319_v33 = vadd.f32 %v4318_v26, %v10132_v23  ;;  %v4360_v29 = vadd.f32 %v4359_v27, %v10142_v35  ;;  %v4320_v1 = vpop.f32.mrb[18].mxu1  ;;  %v4361_v36 = vpop.f32.mrb[30].mxu0  ;;  %v9053_v23 = vld [vmem:[#allocation19 + $0x484] ss:$24 sps:$4 sm:$0xff]   ;;  %v9090_v14 = vld [vmem:[#allocation19 + $0x5a8] ss:$24 sps:$4 sm:$0xff]  }
 0x618   :  { %v10164_v37 = vadd.f32 %v4377_v11, %v4317_v22  ;;  %v10166_v28 = vadd.f32 %v4385_v10, %v4358_v25  ;;  %v4321_v38 = vpop.f32.mrb[19].mxu1  ;;  %v4362_v20 = vpop.f32.mrb[31].mxu0  ;;  %v9095_v11 = vld [vmem:[#allocation19 + $0x5d4] ss:$24 sps:$4 sm:$0xff]   ;;  %v9093_v15 = vld [vmem:[#allocation19 + $0x5d0] ss:$24 sps:$4 sm:$0xff]  }
 0x619   :  { %v4399_v39 = vadd.f32 %v4381_v16, %v4319_v33  ;;  %v10168_v32 = vadd.f32 %v4389_v17, %v4360_v29  ;;  %6228 = vmatpush1.bf16.msra.mxu1 %v9039_v18  ;;  %6351 = vmatpush1.bf16.msra.mxu0 %v9042_v24  ;;  %v9098_v10 = vld [vmem:[#allocation19 + $0x5dc] ss:$24 sps:$4 sm:$0xff]   ;;  %v9096_v54 = vld [vmem:[#allocation19 + $0x5d8] ss:$24 sps:$4 sm:$0xff]   ;;  %v9104_v18 = vld [vmem:[#allocation19 + $0x60c] ss:$24 sps:$4 sm:$0xff]  }
 0x61a   :  { %6229 = vmatprep.subr.bf16.mxu1 %v9047_v19  ;;  %6352 = vmatprep.subr.bf16.mxu0 %v9050_v31  ;;  %v4404_v16 = vmax.f32 %v10164_v37, 0.0  ;;  %v9101_v17 = vld [vmem:[#allocation19 + $0x604] ss:$24 sps:$4 sm:$0xff]   ;;  %v9099_v22 = vld [vmem:[#allocation19 + $0x600] ss:$24 sps:$4 sm:$0xff]  }
 0x61b   :  { %v4405_v35 = vmax.f32 %v4399_v39, 0.0  ;;  %v4407_v24 = vmax.f32 %v10168_v32, 0.0  ;;  %v9102_v26 = vld [vmem:[#allocation19 + $0x608] ss:$24 sps:$4 sm:$0xff]   ;;  %v9107_v19 = vld [vmem:[#allocation19 + $0x634] ss:$24 sps:$4 sm:$0xff]  }
 0x61c   :  { %v10176_v25 = vpack.c.bf16 %v4404_v16, %v4404_v16  ;;  %v9110_v31 = vld [vmem:[#allocation19 + $0x63c] ss:$24 sps:$4 sm:$0xff]   ;;  %v9105_v33 = vld [vmem:[#allocation19 + $0x630] ss:$24 sps:$4 sm:$0xff]   ;;  %v9116_v36 = vld [vmem:[#allocation19 + $0x66c] ss:$24 sps:$4 sm:$0xff]  }
 0x61d   :  { %v10170_v44 = vpack.c.bf16 %v4405_v35, %v4405_v35  ;;  %6230 = vmatpush1.bf16.msra.mxu1 %v9045_v58  ;;  %6353 = vmatpush1.bf16.msra.mxu0 %v9048_v42  ;;  %v10178_v27 = vpack.c.bf16 %v4407_v24, %v4407_v24  ;;  %v9108_v29 = vld [vmem:[#allocation19 + $0x638] ss:$24 sps:$4 sm:$0xff]   ;;  %v9113_v1 = vld [vmem:[#allocation19 + $0x664] ss:$24 sps:$4 sm:$0xff]   ;;  %v9114_v38 = vld [vmem:[#allocation19 + $0x668] ss:$24 sps:$4 sm:$0xff]  }
 0x61e   :  { %6231 = vmatprep.subr.bf16.mxu1 %v9053_v23  ;;  %6354 = vmatprep.subr.bf16.mxu0 %v9056_v43  ;;  %v9111_v37 = vld [vmem:[#allocation19 + $0x660] ss:$24 sps:$4 sm:$0xff]   ;;  %v9119_v20 = vld [vmem:[#allocation19 + $0x694] ss:$24 sps:$4 sm:$0xff]   ;;  %v9117_v32 = vld [vmem:[#allocation19 + $0x690] ss:$24 sps:$4 sm:$0xff]  }
 0x61f   :  { %6247 = vmatprep.mubr.bf16.mxu1 %v10170_v44  ;;  %6370 = vmatprep.mubr.bf16.mxu0 %v10170_v44  ;;  %v9122_v39 = vld [vmem:[#allocation19 + $0x69c] ss:$24 sps:$4 sm:$0xff]   ;;  %v9120_v58 = vld [vmem:[#allocation19 + $0x698] ss:$24 sps:$4 sm:$0xff]   ;;  %v9128_v23 = vld [vmem:[#allocation19 + $0x6cc] ss:$24 sps:$4 sm:$0xff]  }
 0x620   :  { %v9125_v42 = vld [vmem:[#allocation19 + $0x6c4] ss:$24 sps:$4 sm:$0xff]   ;;  %v9123_v43 = vld [vmem:[#allocation19 + $0x6c0] ss:$24 sps:$4 sm:$0xff]  }
 0x621   :  { %6232 = vmatpush1.bf16.msra.mxu1 %v9051_v45  ;;  %6355 = vmatpush1.bf16.msra.mxu0 %v9054_v47  ;;  %v9126_v35 = vld [vmem:[#allocation19 + $0x6c8] ss:$24 sps:$4 sm:$0xff]   ;;  %v9131_v45 = vld [vmem:[#allocation19 + $0x6f4] ss:$24 sps:$4 sm:$0xff]  }
 0x622   :  { %6233 = vmatprep.subr.bf16.mxu1 %v9059_v49  ;;  %6356 = vmatprep.subr.bf16.mxu0 %v9062_v50  ;;  %v9134_v47 = vld [vmem:[#allocation19 + $0x6fc] ss:$24 sps:$4 sm:$0xff]   ;;  %v9129_v49 = vld [vmem:[#allocation19 + $0x6f0] ss:$24 sps:$4 sm:$0xff]   ;;  %v9171_v16 = vld [vmem:[#allocation19 + $0x840] ss:$24 sps:$4 sm:$0xff]  }
 0x623   :  { %v9132_v50 = vld [vmem:[#allocation19 + $0x6f8] ss:$24 sps:$4 sm:$0xff]   ;;  %v9182_v24 = vld [vmem:[#allocation19 + $0x87c] ss:$24 sps:$4 sm:$0xff]  }
 0x625   :  { %6234 = vmatpush1.bf16.msra.mxu1 %v9057_v51  ;;  %6357 = vmatpush1.bf16.msra.mxu0 %v9060_v52  ;;  %v9137_v51 = vld [vmem:[#allocation19 + $0x724] ss:$24 sps:$4 sm:$0xff]  }
 0x626   :  { %6235 = vmatprep.subr.bf16.mxu1 %v9065_v53  ;;  %6358 = vmatprep.subr.bf16.mxu0 %v9068_v55  ;;  %v9140_v52 = vld [vmem:[#allocation19 + $0x72c] ss:$24 sps:$4 sm:$0xff]   ;;  %v9135_v53 = vld [vmem:[#allocation19 + $0x720] ss:$24 sps:$4 sm:$0xff]  }
 0x627   :  { %v9138_v55 = vld [vmem:[#allocation19 + $0x728] ss:$24 sps:$4 sm:$0xff]  }
 0x629   :  { %6236 = vmatpush1.bf16.msra.mxu1 %v9063_v60  ;;  %6359 = vmatpush1.bf16.msra.mxu0 %v9066_v61  ;;  %v9143_v60 = vld [vmem:[#allocation19 + $0x754] ss:$24 sps:$4 sm:$0xff]  }
 0x62a   :  { %6237 = vmatprep.subr.bf16.mxu1 %v9071_v62  ;;  %6360 = vmatprep.subr.bf16.mxu0 %v9074_v63  ;;  %v9146_v61 = vld [vmem:[#allocation19 + $0x75c] ss:$24 sps:$4 sm:$0xff]   ;;  %v9141_v62 = vld [vmem:[#allocation19 + $0x750] ss:$24 sps:$4 sm:$0xff]  }
 0x62b   :  { %v9144_v63 = vld [vmem:[#allocation19 + $0x758] ss:$24 sps:$4 sm:$0xff]  }
 0x62d   :  { %6238 = vmatpush1.bf16.msra.mxu1 %v9069_v0  ;;  %6361 = vmatpush1.bf16.msra.mxu0 %v9072_v30  ;;  %v9149_v0 = vld [vmem:[#allocation19 + $0x784] ss:$24 sps:$4 sm:$0xff]  }
 0x62e   :  { %6239 = vmatprep.subr.bf16.mxu1 %v9077_v2  ;;  %6362 = vmatprep.subr.bf16.mxu0 %v9080_v41  ;;  %v9152_v30 = vld [vmem:[#allocation19 + $0x78c] ss:$24 sps:$4 sm:$0xff]   ;;  %v9147_v2 = vld [vmem:[#allocation19 + $0x780] ss:$24 sps:$4 sm:$0xff]  }
 0x62f   :  { %v9150_v41 = vld [vmem:[#allocation19 + $0x788] ss:$24 sps:$4 sm:$0xff]  }
 0x631   :  { %6240 = vmatpush1.bf16.msra.mxu1 %v9075_v3  ;;  %6363 = vmatpush1.bf16.msra.mxu0 %v9078_v46  ;;  %v9155_v3 = vld [vmem:[#allocation19 + $0x7b4] ss:$24 sps:$4 sm:$0xff]  }
 0x632   :  { %6241 = vmatprep.subr.bf16.mxu1 %v9083_v4  ;;  %6364 = vmatprep.subr.bf16.mxu0 %v9086_v5  ;;  %v9158_v46 = vld [vmem:[#allocation19 + $0x7bc] ss:$24 sps:$4 sm:$0xff]   ;;  %v9153_v4 = vld [vmem:[#allocation19 + $0x7b0] ss:$24 sps:$4 sm:$0xff]  }
 0x633   :  { %v9156_v5 = vld [vmem:[#allocation19 + $0x7b8] ss:$24 sps:$4 sm:$0xff]  }
 0x635   :  { %6242 = vmatpush1.bf16.msra.mxu1 %v9081_v6  ;;  %6365 = vmatpush1.bf16.msra.mxu0 %v9084_v7  ;;  %v9161_v6 = vld [vmem:[#allocation19 + $0x7e4] ss:$24 sps:$4 sm:$0xff]  }
 0x636   :  { %6243 = vmatprep.subr.bf16.mxu1 %v9089_v8  ;;  %6366 = vmatprep.subr.bf16.mxu0 %v9092_v9  ;;  %v9164_v7 = vld [vmem:[#allocation19 + $0x7ec] ss:$24 sps:$4 sm:$0xff]   ;;  %v9159_v8 = vld [vmem:[#allocation19 + $0x7e0] ss:$24 sps:$4 sm:$0xff]  }
 0x637   :  { %v9162_v9 = vld [vmem:[#allocation19 + $0x7e8] ss:$24 sps:$4 sm:$0xff]  }
 0x639   :  { %6244 = vmatpush1.bf16.msra.mxu1 %v9087_v13  ;;  %6367 = vmatpush1.bf16.msra.mxu0 %v9090_v14  ;;  %v9167_v13 = vld [vmem:[#allocation19 + $0x814] ss:$24 sps:$4 sm:$0xff]  }
 0x63a   :  { %6245 = vmatprep.subr.bf16.mxu1 %v9095_v11  ;;  %6368 = vmatprep.subr.bf16.mxu0 %v9098_v10  ;;  %v9170_v14 = vld [vmem:[#allocation19 + $0x81c] ss:$24 sps:$4 sm:$0xff]   ;;  %v9165_v11 = vld [vmem:[#allocation19 + $0x810] ss:$24 sps:$4 sm:$0xff]  }
 0x63b   :  { %v9168_v10 = vld [vmem:[#allocation19 + $0x818] ss:$24 sps:$4 sm:$0xff]  }
 0x63d   :  { %6246 = vmatpush1.bf16.msra.mxu1 %v9093_v15  ;;  %6369 = vmatpush1.bf16.msra.mxu0 %v9096_v54  ;;  %v9173_v15 = vld [vmem:[#allocation19 + $0x844] ss:$24 sps:$4 sm:$0xff]  }
 0x63e   :  { %6256 = vmatprep.subr.bf16.mxu1 %v9101_v17  ;;  %6379 = vmatprep.subr.bf16.mxu0 %v9104_v18  ;;  %v9176_v54 = vld [vmem:[#allocation19 + $0x84c] ss:$24 sps:$4 sm:$0xff]   ;;  %v9174_v17 = vld [vmem:[#allocation19 + $0x848] ss:$24 sps:$4 sm:$0xff]  }
 0x63f   :  { %v9179_v18 = vld [vmem:[#allocation19 + $0x874] ss:$24 sps:$4 sm:$0xff]  }
 0x640   :  { %6248 = vmatmul.mubr.bf16.vlgmr.msra.gmra.mrb[20].mxu1 %v10176_v25  ;;  %6371 = vmatmul.mubr.bf16.vlgmr.msra.gmra.mrb[32].mxu0 %v10176_v25 }
 0x641   :  { %6257 = vmatpush1.bf16.msra.mxu1 %v9099_v22  ;;  %6288 = vmatprep.mubr.bf16.mxu1 %v10178_v27  ;;  %v9177_v22 = vld [vmem:[#allocation19 + $0x870] ss:$24 sps:$4 sm:$0xff]  }
 0x642   :  { %6380 = vmatpush1.bf16.msra.mxu0 %v9102_v26  ;;  %6411 = vmatprep.mubr.bf16.mxu0 %v10178_v27  ;;  %v9180_v26 = vld [vmem:[#allocation19 + $0x878] ss:$24 sps:$4 sm:$0xff]  }
 0x643   :  { %6258 = vmatprep.subr.bf16.mxu1 %v9107_v19  ;;  %6381 = vmatprep.subr.bf16.mxu0 %v9110_v31  ;;  %v9185_v19 = vld [vmem:[#allocation19 + $0x8a4] ss:$24 sps:$4 sm:$0xff]  }
 0x644   :  { %v9188_v31 = vld [vmem:[#allocation19 + $0x8ac] ss:$24 sps:$4 sm:$0xff]  }
 0x645   :  { %6259 = vmatpush1.bf16.msra.mxu1 %v9105_v33  ;;  %v9183_v33 = vld [vmem:[#allocation19 + $0x8a0] ss:$24 sps:$4 sm:$0xff]  }
 0x646   :  { %6382 = vmatpush1.bf16.msra.mxu0 %v9108_v29  ;;  %6260 = vmatprep.subr.bf16.mxu1 %v9113_v1  ;;  %v9186_v29 = vld [vmem:[#allocation19 + $0x8a8] ss:$24 sps:$4 sm:$0xff]   ;;  %v9191_v1 = vld [vmem:[#allocation19 + $0x8d4] ss:$24 sps:$4 sm:$0xff]  }
 0x647   :  { %6383 = vmatprep.subr.bf16.mxu0 %v9116_v36  ;;  %v9194_v36 = vld [vmem:[#allocation19 + $0x8dc] ss:$24 sps:$4 sm:$0xff]  }
 0x649   :  { %6261 = vmatpush1.bf16.msra.mxu1 %v9111_v37  ;;  %v9189_v37 = vld [vmem:[#allocation19 + $0x8d0] ss:$24 sps:$4 sm:$0xff]  }
 0x64a   :  { %6384 = vmatpush1.bf16.msra.mxu0 %v9114_v38  ;;  %6262 = vmatprep.subr.bf16.mxu1 %v9119_v20  ;;  %v4406_v38 = vmax.f32 %v10166_v28, 0.0  ;;  %v9192_v20 = vld [vmem:[#allocation19 + $0x8d8] ss:$24 sps:$4 sm:$0xff]   ;;  %v9203_v28 = vld [vmem:[#allocation19 + $0x74] ss:$24 sps:$4 sm:$0xff]  }
 0x64b   :  { %6385 = vmatprep.subr.bf16.mxu0 %v9122_v39  ;;  %v9197_v39 = vld [vmem:[#allocation19 + $0x14] ss:$24 sps:$4 sm:$0xff]  }
 0x64d   :  { %6263 = vmatpush1.bf16.msra.mxu1 %v9117_v32  ;;  %v9195_v32 = vld [vmem:[#allocation19 + $0x10] ss:$24 sps:$4 sm:$0xff]  }
 0x64e   :  { %6386 = vmatpush1.bf16.msra.mxu0 %v9120_v58  ;;  %6264 = vmatprep.subr.bf16.mxu1 %v9125_v42  ;;  %v10185_v58 = vpack.c.bf16 %v4406_v38, %v4406_v38  ;;  %v9200_v42 = vld [vmem:[#allocation19 + $0x44] ss:$24 sps:$4 sm:$0xff]  }
 0x64f   :  { %6387 = vmatprep.subr.bf16.mxu0 %v9128_v23  ;;  %v9198_v23 = vld [vmem:[#allocation19 + $0x40] ss:$24 sps:$4 sm:$0xff]   ;;  %v9260_v38 = vld [vmem:[#allocation19 + $0x404] ss:$24 sps:$4 sm:$0xff]  }
 0x651   :  { %6265 = vmatpush1.bf16.msra.mxu1 %v9123_v43  ;;  %v9201_v43 = vld [vmem:[#allocation19 + $0x70] ss:$24 sps:$4 sm:$0xff]  }
 0x652   :  { %6388 = vmatpush1.bf16.msra.mxu0 %v9126_v35  ;;  %6266 = vmatprep.subr.bf16.mxu1 %v9131_v45  ;;  %v9206_v35 = vld [vmem:[#allocation19 + $0xa4] ss:$24 sps:$4 sm:$0xff]   ;;  %v9204_v45 = vld [vmem:[#allocation19 + $0xa0] ss:$24 sps:$4 sm:$0xff]  }
 0x653   :  { %6389 = vmatprep.subr.bf16.mxu0 %v9134_v47  ;;  %v9209_v47 = vld [vmem:[#allocation19 + $0xd4] ss:$24 sps:$4 sm:$0xff]  }
 0x655   :  { %6267 = vmatpush1.bf16.msra.mxu1 %v9129_v49  ;;  %v9207_v49 = vld [vmem:[#allocation19 + $0xd0] ss:$24 sps:$4 sm:$0xff]  }
 0x656   :  { %6390 = vmatpush1.bf16.msra.mxu0 %v9132_v50  ;;  %6268 = vmatprep.subr.bf16.mxu1 %v9137_v51  ;;  %v9212_v50 = vld [vmem:[#allocation19 + $0x104] ss:$24 sps:$4 sm:$0xff]   ;;  %v9210_v51 = vld [vmem:[#allocation19 + $0x100] ss:$24 sps:$4 sm:$0xff]  }
 0x657   :  { %6391 = vmatprep.subr.bf16.mxu0 %v9140_v52  ;;  %v9215_v52 = vld [vmem:[#allocation19 + $0x134] ss:$24 sps:$4 sm:$0xff]  }
 0x659   :  { %6269 = vmatpush1.bf16.msra.mxu1 %v9135_v53  ;;  %v9218_v53 = vld [vmem:[#allocation19 + $0x164] ss:$24 sps:$4 sm:$0xff]  }
 0x65a   :  { %6392 = vmatpush1.bf16.msra.mxu0 %v9138_v55  ;;  %6270 = vmatprep.subr.bf16.mxu1 %v9143_v60  ;;  %v9216_v55 = vld [vmem:[#allocation19 + $0x160] ss:$24 sps:$4 sm:$0xff]   ;;  %v9221_v60 = vld [vmem:[#allocation19 + $0x194] ss:$24 sps:$4 sm:$0xff]  }
 0x65b   :  { %6393 = vmatprep.subr.bf16.mxu0 %v9146_v61  ;;  %v9219_v61 = vld [vmem:[#allocation19 + $0x190] ss:$24 sps:$4 sm:$0xff]  }
 0x65d   :  { %6271 = vmatpush1.bf16.msra.mxu1 %v9141_v62  ;;  %v9224_v62 = vld [vmem:[#allocation19 + $0x1c4] ss:$24 sps:$4 sm:$0xff]  }
 0x65e   :  { %6394 = vmatpush1.bf16.msra.mxu0 %v9144_v63  ;;  %6272 = vmatprep.subr.bf16.mxu1 %v9149_v0  ;;  %v9222_v63 = vld [vmem:[#allocation19 + $0x1c0] ss:$24 sps:$4 sm:$0xff]   ;;  %v9227_v0 = vld [vmem:[#allocation19 + $0x1f4] ss:$24 sps:$4 sm:$0xff]  }
 0x65f   :  { %6395 = vmatprep.subr.bf16.mxu0 %v9152_v30  ;;  %v9225_v30 = vld [vmem:[#allocation19 + $0x1f0] ss:$24 sps:$4 sm:$0xff]  }
 0x661   :  { %6273 = vmatpush1.bf16.msra.mxu1 %v9147_v2  ;;  %v9230_v2 = vld [vmem:[#allocation19 + $0x224] ss:$24 sps:$4 sm:$0xff]  }
 0x662   :  { %6396 = vmatpush1.bf16.msra.mxu0 %v9150_v41  ;;  %6274 = vmatprep.subr.bf16.mxu1 %v9155_v3  ;;  %v9228_v41 = vld [vmem:[#allocation19 + $0x220] ss:$24 sps:$4 sm:$0xff]   ;;  %v9233_v3 = vld [vmem:[#allocation19 + $0x254] ss:$24 sps:$4 sm:$0xff]  }
 0x663   :  { %6397 = vmatprep.subr.bf16.mxu0 %v9158_v46  ;;  %v9231_v46 = vld [vmem:[#allocation19 + $0x250] ss:$24 sps:$4 sm:$0xff]  }
 0x665   :  { %6275 = vmatpush1.bf16.msra.mxu1 %v9153_v4  ;;  %v9236_v4 = vld [vmem:[#allocation19 + $0x284] ss:$24 sps:$4 sm:$0xff]  }
 0x666   :  { %6398 = vmatpush1.bf16.msra.mxu0 %v9156_v5  ;;  %6276 = vmatprep.subr.bf16.mxu1 %v9161_v6  ;;  %v9234_v5 = vld [vmem:[#allocation19 + $0x280] ss:$24 sps:$4 sm:$0xff]   ;;  %v9239_v6 = vld [vmem:[#allocation19 + $0x2b4] ss:$24 sps:$4 sm:$0xff]  }
 0x667   :  { %6399 = vmatprep.subr.bf16.mxu0 %v9164_v7  ;;  %v9237_v7 = vld [vmem:[#allocation19 + $0x2b0] ss:$24 sps:$4 sm:$0xff]  }
 0x669   :  { %6277 = vmatpush1.bf16.msra.mxu1 %v9159_v8  ;;  %v9242_v8 = vld [vmem:[#allocation19 + $0x2e4] ss:$24 sps:$4 sm:$0xff]  }
 0x66a   :  { %6400 = vmatpush1.bf16.msra.mxu0 %v9162_v9  ;;  %6278 = vmatprep.subr.bf16.mxu1 %v9167_v13  ;;  %v9240_v9 = vld [vmem:[#allocation19 + $0x2e0] ss:$24 sps:$4 sm:$0xff]   ;;  %v9336_v13 = vld [vmem:[#allocation22 + $0x40] sm:$0xff]  }
 0x66b   :  { %6401 = vmatprep.subr.bf16.mxu0 %v9170_v14  ;;  %v9245_v14 = vld [vmem:[#allocation19 + $0x314] ss:$24 sps:$4 sm:$0xff]  }
 0x66d   :  { %6279 = vmatpush1.bf16.msra.mxu1 %v9165_v11  ;;  %v9340_v11 = vld [vmem:[#allocation22] sm:$0xff]  }
 0x66e   :  { %6402 = vmatpush1.bf16.msra.mxu0 %v9168_v10  ;;  %6280 = vmatprep.subr.bf16.mxu1 %v9173_v15  ;;  %v9243_v10 = vld [vmem:[#allocation19 + $0x310] ss:$24 sps:$4 sm:$0xff]  }
 0x66f   :  { %6403 = vmatprep.subr.bf16.mxu0 %v9176_v54  ;;  %v9341_v15 = vld [vmem:[#allocation22 + $0x48] sm:$0xff]   ;;  %v9248_v54 = vld [vmem:[#allocation19 + $0x344] ss:$24 sps:$4 sm:$0xff]  }
 0x671   :  { %6281 = vmatpush1.bf16.msra.mxu1 %v9171_v16  ;;  %v9342_v16 = vld [vmem:[#allocation22 + $0x8] sm:$0xff]  }
 0x672   :  { %6404 = vmatpush1.bf16.msra.mxu0 %v9174_v17  ;;  %6282 = vmatprep.subr.bf16.mxu1 %v9179_v18  ;;  %v9343_v17 = vld [vmem:[#allocation22 + $0x50] sm:$0xff]  }
 0x673   :  { %6405 = vmatprep.subr.bf16.mxu0 %v9182_v24  ;;  %v9246_v18 = vld [vmem:[#allocation19 + $0x340] ss:$24 sps:$4 sm:$0xff]   ;;  %v9251_v24 = vld [vmem:[#allocation19 + $0x374] ss:$24 sps:$4 sm:$0xff]  }
 0x675   :  { %6283 = vmatpush1.bf16.msra.mxu1 %v9177_v22  ;;  %v9344_v22 = vld [vmem:[#allocation22 + $0x10] sm:$0xff]  }
 0x676   :  { %6406 = vmatpush1.bf16.msra.mxu0 %v9180_v26  ;;  %6284 = vmatprep.subr.bf16.mxu1 %v9185_v19  ;;  %v9345_v26 = vld [vmem:[#allocation22 + $0x58] sm:$0xff]   ;;  %v9249_v19 = vld [vmem:[#allocation19 + $0x370] ss:$24 sps:$4 sm:$0xff]  }
 0x677   :  { %6407 = vmatprep.subr.bf16.mxu0 %v9188_v31  ;;  %v9254_v31 = vld [vmem:[#allocation19 + $0x3a4] ss:$24 sps:$4 sm:$0xff]  }
 0x679   :  { %6285 = vmatpush1.bf16.msra.mxu1 %v9183_v33  ;;  %v9346_v33 = vld [vmem:[#allocation22 + $0x18] sm:$0xff]  }
 0x67a   :  { %6408 = vmatpush1.bf16.msra.mxu0 %v9186_v29  ;;  %6286 = vmatprep.subr.bf16.mxu1 %v9191_v1  ;;  %v9347_v29 = vld [vmem:[#allocation22 + $0x60] sm:$0xff]  }
 0x67b   :  { %6409 = vmatprep.subr.bf16.mxu0 %v9194_v36  ;;  %v9257_v1 = vld [vmem:[#allocation19 + $0x3d4] ss:$24 sps:$4 sm:$0xff]  }
 0x67c   :  { %v9349_v36 = vld [vmem:[#allocation22 + $0x68] sm:$0xff]  }
 0x67d   :  { %6287 = vmatpush1.bf16.msra.mxu1 %v9189_v37  ;;  %v9255_v37 = vld [vmem:[#allocation19 + $0x3d0] ss:$24 sps:$4 sm:$0xff]  }
 0x67e   :  { %6410 = vmatpush1.bf16.msra.mxu0 %v9192_v20  ;;  %6420 = vmatprep.subr.bf16.mxu1 %v9197_v39  ;;  %v9350_v20 = vld [vmem:[#allocation22 + $0x28] sm:$0xff]   ;;  %v9258_v39 = vld [vmem:[#allocation19 + $0x400] ss:$24 sps:$4 sm:$0xff]  }
 0x67f   :  { %7957 = vmatprep.subr.bf16.mxu0 %v9336_v13  ;;  %v9302_v13 = vld [vmem:[#allocation19 + $0x6a4] ss:$24 sps:$4 sm:$0xff]  }
 0x680   :  { %6289 = vmatmul.mubr.bf16.vlgmr.msra.gmra.mrb[20].mxu1 %v10185_v58 }
 0x681   :  { %6412 = vmatmul.mubr.bf16.vlgmr.msra.gmra.mrb[32].mxu0 %v10185_v58  ;;  %6421 = vmatpush1.bf16.msra.mxu1 %v9195_v32  ;;  %v9263_v32 = vld [vmem:[#allocation19 + $0x434] ss:$24 sps:$4 sm:$0xff]  }
 0x682   :  { %6452 = vmatprep.mubr.bf16.mxu1 %v10144_v48  ;;  %6422 = vmatprep.subr.bf16.mxu1 %v9200_v42  ;;  %v9213_v48 = vld [vmem:[#allocation19 + $0x130] ss:$24 sps:$4 sm:$0xff]   ;;  %v9351_v42 = vld [vmem:[#allocation22 + $0x70] sm:$0xff]  }
 0x683   :  { %7958 = vmatpush3.bf16.msra.mxu0 %v9340_v11  ;;  %v9305_v11 = vld [vmem:[#allocation19 + $0x6d4] ss:$24 sps:$4 sm:$0xff]  }
 0x684   :  { %7959 = vmatprep.subr.bf16.mxu0 %v9341_v15  ;;  %v9308_v15 = vld [vmem:[#allocation19 + $0x704] ss:$24 sps:$4 sm:$0xff]  }
 0x685   :  { %6423 = vmatpush1.bf16.msra.mxu1 %v9198_v23  ;;  %v9352_v23 = vld [vmem:[#allocation22 + $0x30] sm:$0xff]  }
 0x686   :  { %6424 = vmatprep.subr.bf16.mxu1 %v9203_v28  ;;  %v9261_v28 = vld [vmem:[#allocation19 + $0x430] ss:$24 sps:$4 sm:$0xff]  }
 0x687   :  { %7960 = vmatpush3.bf16.msra.mxu0 %v9342_v16  ;;  %v9314_v16 = vld [vmem:[#allocation19 + $0x764] ss:$24 sps:$4 sm:$0xff]  }
 0x688   :  { %7961 = vmatprep.subr.bf16.mxu0 %v9343_v17  ;;  %v9312_v17 = vld [vmem:[#allocation19 + $0x760] ss:$24 sps:$4 sm:$0xff]  }
 0x689   :  { %6425 = vmatpush1.bf16.msra.mxu1 %v9201_v43  ;;  %v9266_v43 = vld [vmem:[#allocation19 + $0x464] ss:$24 sps:$4 sm:$0xff]  }
 0x68a   :  { %6426 = vmatprep.subr.bf16.mxu1 %v9206_v35  ;;  %v9353_v35 = vld [vmem:[#allocation22 + $0x78] sm:$0xff]  }
 0x68b   :  { %7962 = vmatpush3.bf16.msra.mxu0 %v9344_v22  ;;  %v9320_v22 = vld [vmem:[#allocation19 + $0x7c4] ss:$24 sps:$4 sm:$0xff]  }
 0x68c   :  { %7963 = vmatprep.subr.bf16.mxu0 %v9345_v26  ;;  %v9318_v26 = vld [vmem:[#allocation19 + $0x7c0] ss:$24 sps:$4 sm:$0xff]  }
 0x68d   :  { %6427 = vmatpush1.bf16.msra.mxu1 %v9204_v45  ;;  %v9354_v45 = vld [vmem:[#allocation22 + $0x38] sm:$0xff]  }
 0x68e   :  { %6428 = vmatprep.subr.bf16.mxu1 %v9209_v47  ;;  %v9264_v47 = vld [vmem:[#allocation19 + $0x460] ss:$24 sps:$4 sm:$0xff]  }
 0x68f   :  { %7964 = vmatpush3.bf16.msra.mxu0 %v9346_v33  ;;  %v9326_v33 = vld [vmem:[#allocation19 + $0x824] ss:$24 sps:$4 sm:$0xff]  }
 0x690   :  { %7965 = vmatprep.subr.bf16.mxu0 %v9347_v29  ;;  %v9324_v29 = vld [vmem:[#allocation19 + $0x820] ss:$24 sps:$4 sm:$0xff]  }
 0x691   :  { %6429 = vmatpush1.bf16.msra.mxu1 %v9207_v49  ;;  %v9269_v49 = vld [vmem:[#allocation19 + $0x494] ss:$24 sps:$4 sm:$0xff]  }
 0x692   :  { %6430 = vmatprep.subr.bf16.mxu1 %v9212_v50  ;;  %v9355_v50 = vld [vmem:[#allocation22 + $0xc0] sm:$0xff]  }
 0x695   :  { %6431 = vmatpush1.bf16.msra.mxu1 %v9210_v51  ;;  %v9267_v51 = vld [vmem:[#allocation19 + $0x490] ss:$24 sps:$4 sm:$0xff]  }
 0x696   :  { %6432 = vmatprep.subr.bf16.mxu1 %v9215_v52  ;;  %v9272_v52 = vld [vmem:[#allocation19 + $0x4c4] ss:$24 sps:$4 sm:$0xff]  }
 0x699   :  { %6433 = vmatpush1.bf16.msra.mxu1 %v9213_v48  ;;  %v9270_v48 = vld [vmem:[#allocation19 + $0x4c0] ss:$24 sps:$4 sm:$0xff]  }
 0x69a   :  { %6434 = vmatprep.subr.bf16.mxu1 %v9218_v53  ;;  %v9275_v53 = vld [vmem:[#allocation19 + $0x4f4] ss:$24 sps:$4 sm:$0xff]  }
 0x69d   :  { %6435 = vmatpush1.bf16.msra.mxu1 %v9216_v55  ;;  %v9273_v55 = vld [vmem:[#allocation19 + $0x4f0] ss:$24 sps:$4 sm:$0xff]  }
 0x69e   :  { %6436 = vmatprep.subr.bf16.mxu1 %v9221_v60  ;;  %v9278_v60 = vld [vmem:[#allocation19 + $0x524] ss:$24 sps:$4 sm:$0xff]  }
 0x6a1   :  { %6437 = vmatpush1.bf16.msra.mxu1 %v9219_v61  ;;  %v9276_v61 = vld [vmem:[#allocation19 + $0x520] ss:$24 sps:$4 sm:$0xff]  }
 0x6a2   :  { %6438 = vmatprep.subr.bf16.mxu1 %v9224_v62  ;;  %v9281_v62 = vld [vmem:[#allocation19 + $0x554] ss:$24 sps:$4 sm:$0xff]  }
 0x6a5   :  { %6439 = vmatpush1.bf16.msra.mxu1 %v9222_v63  ;;  %v9279_v63 = vld [vmem:[#allocation19 + $0x550] ss:$24 sps:$4 sm:$0xff]  }
 0x6a6   :  { %6440 = vmatprep.subr.bf16.mxu1 %v9227_v0  ;;  %v9284_v0 = vld [vmem:[#allocation19 + $0x584] ss:$24 sps:$4 sm:$0xff]  }
 0x6a9   :  { %6441 = vmatpush1.bf16.msra.mxu1 %v9225_v30  ;;  %v9282_v30 = vld [vmem:[#allocation19 + $0x580] ss:$24 sps:$4 sm:$0xff]  }
 0x6aa   :  { %6442 = vmatprep.subr.bf16.mxu1 %v9230_v2  ;;  %v9287_v2 = vld [vmem:[#allocation19 + $0x5b4] ss:$24 sps:$4 sm:$0xff]  }
 0x6ad   :  { %6443 = vmatpush1.bf16.msra.mxu1 %v9228_v41  ;;  %v9285_v41 = vld [vmem:[#allocation19 + $0x5b0] ss:$24 sps:$4 sm:$0xff]  }
 0x6ae   :  { %6444 = vmatprep.subr.bf16.mxu1 %v9233_v3  ;;  %v9290_v3 = vld [vmem:[#allocation19 + $0x5e4] ss:$24 sps:$4 sm:$0xff]  }
 0x6b1   :  { %6445 = vmatpush1.bf16.msra.mxu1 %v9231_v46  ;;  %v9288_v46 = vld [vmem:[#allocation19 + $0x5e0] ss:$24 sps:$4 sm:$0xff]  }
 0x6b2   :  { %6446 = vmatprep.subr.bf16.mxu1 %v9236_v4  ;;  %v9293_v4 = vld [vmem:[#allocation19 + $0x614] ss:$24 sps:$4 sm:$0xff]  }
 0x6b5   :  { %6447 = vmatpush1.bf16.msra.mxu1 %v9234_v5  ;;  %v9291_v5 = vld [vmem:[#allocation19 + $0x610] ss:$24 sps:$4 sm:$0xff]  }
 0x6b6   :  { %6448 = vmatprep.subr.bf16.mxu1 %v9239_v6  ;;  %v9296_v6 = vld [vmem:[#allocation19 + $0x644] ss:$24 sps:$4 sm:$0xff]  }
 0x6b9   :  { %6449 = vmatpush1.bf16.msra.mxu1 %v9237_v7  ;;  %v9294_v7 = vld [vmem:[#allocation19 + $0x640] ss:$24 sps:$4 sm:$0xff]  }
 0x6ba   :  { %6450 = vmatprep.subr.bf16.mxu1 %v9242_v8  ;;  %v9299_v8 = vld [vmem:[#allocation19 + $0x674] ss:$24 sps:$4 sm:$0xff]  }
 0x6bd   :  { %6451 = vmatpush1.bf16.msra.mxu1 %v9240_v9  ;;  %v9297_v9 = vld [vmem:[#allocation19 + $0x670] ss:$24 sps:$4 sm:$0xff]  }
 0x6be   :  { %6461 = vmatprep.subr.bf16.mxu1 %v9245_v14  ;;  %v9300_v14 = vld [vmem:[#allocation19 + $0x6a0] ss:$24 sps:$4 sm:$0xff]  }
 0x6c0   :  { %6453 = vmatmul.mubr.bf16.vlgmr.msra.gmra.mrb[24].mxu1 %v10146_v56  ;;  %v9252_v56 = vld [vmem:[#allocation19 + $0x3a0] ss:$24 sps:$4 sm:$0xff]  }
 0x6c1   :  { %6462 = vmatpush1.bf16.msra.mxu1 %v9243_v10  ;;  %6493 = vmatprep.mubr.bf16.mxu1 %v10170_v44  ;;  %v9348_v44 = vld [vmem:[#allocation22 + $0x20] sm:$0xff]  }
 0x6c2   :  { %6463 = vmatprep.subr.bf16.mxu1 %v9248_v54  ;;  %7966 = vmatpush3.bf16.msra.mxu0 %v9348_v44  ;;  %v9303_v10 = vld [vmem:[#allocation19 + $0x6d0] ss:$24 sps:$4 sm:$0xff]   ;;  %v9311_v54 = vld [vmem:[#allocation19 + $0x734] ss:$24 sps:$4 sm:$0xff]   ;;  %v9332_v44 = vld [vmem:[#allocation19 + $0x884] ss:$24 sps:$4 sm:$0xff]  }
 0x6c3   :  { %7967 = vmatprep.subr.bf16.mxu0 %v9349_v36  ;;  %v9330_v36 = vld [vmem:[#allocation19 + $0x880] ss:$24 sps:$4 sm:$0xff]  }
 0x6c5   :  { %6464 = vmatpush1.bf16.msra.mxu1 %v9246_v18  ;;  %v9317_v18 = vld [vmem:[#allocation19 + $0x794] ss:$24 sps:$4 sm:$0xff]  }
 0x6c6   :  { %6465 = vmatprep.subr.bf16.mxu1 %v9251_v24  ;;  %7968 = vmatpush3.bf16.msra.mxu0 %v9350_v20  ;;  %v9315_v24 = vld [vmem:[#allocation19 + $0x790] ss:$24 sps:$4 sm:$0xff]   ;;  %v9339_v20 = vld [vmem:[#allocation19 + $0x8e4] ss:$24 sps:$4 sm:$0xff]  }
 0x6c7   :  { %7969 = vmatprep.subr.bf16.mxu0 %v9351_v42 }
 0x6c9   :  { %6466 = vmatpush1.bf16.msra.mxu1 %v9249_v19  ;;  %v9323_v19 = vld [vmem:[#allocation19 + $0x7f4] ss:$24 sps:$4 sm:$0xff]  }
 0x6ca   :  { %6467 = vmatprep.subr.bf16.mxu1 %v9254_v31  ;;  %7970 = vmatpush3.bf16.msra.mxu0 %v9352_v23  ;;  %v9321_v31 = vld [vmem:[#allocation19 + $0x7f0] ss:$24 sps:$4 sm:$0xff]  }
 0x6cb   :  { %7971 = vmatprep.subr.bf16.mxu0 %v9353_v35 }
 0x6cd   :  { %6468 = vmatpush1.bf16.msra.mxu1 %v9252_v56  ;;  %v9329_v56 = vld [vmem:[#allocation19 + $0x854] ss:$24 sps:$4 sm:$0xff]  }
 0x6ce   :  { %6469 = vmatprep.subr.bf16.mxu1 %v9257_v1  ;;  %7972 = vmatpush3.bf16.msra.mxu0 %v9354_v45  ;;  %v9327_v1 = vld [vmem:[#allocation19 + $0x850] ss:$24 sps:$4 sm:$0xff]  }
 0x6cf   :  { %7979 = vmatprep.subr.bf16.mxu0 %v9355_v50 }
 0x6d1   :  { %6470 = vmatpush1.bf16.msra.mxu1 %v9255_v37  ;;  %v9335_v37 = vld [vmem:[#allocation19 + $0x8b4] ss:$24 sps:$4 sm:$0xff]  }
 0x6d2   :  { %6471 = vmatprep.subr.bf16.mxu1 %v9260_v38  ;;  %v9333_v38 = vld [vmem:[#allocation19 + $0x8b0] ss:$24 sps:$4 sm:$0xff]  }
 0x6d5   :  { %6472 = vmatpush1.bf16.msra.mxu1 %v9258_v39  ;;  %v9337_v39 = vld [vmem:[#allocation19 + $0x8e0] ss:$24 sps:$4 sm:$0xff]  }
 0x6d6   :  { %6473 = vmatprep.subr.bf16.mxu1 %v9263_v32  ;;  %v10195_v32 = vld [vmem:[#allocation20] sm:$0x3f] }
 0x6d7   :  { %v4707_v42 = vrot.slane %v10195_v32, %v10031_v57  ;;  %v4711_v23 = vrot.slane %v10195_v32, %v10036_v59 }
 0x6d9   :  { %6474 = vmatpush1.bf16.msra.mxu1 %v9261_v28  ;;  %v4719_v28 = vrot.slane %v10195_v32, %v10051_v34  ;;  %v9358_v34 = vld [vmem:[#allocation22 + $0x88] sm:$0xff]  }
 0x6da   :  { %6475 = vmatprep.subr.bf16.mxu1 %v9266_v43 }
 0x6dd   :  { %6476 = vmatpush1.bf16.msra.mxu1 %v9264_v47 }
 0x6de   :  { %6477 = vmatprep.subr.bf16.mxu1 %v9269_v49 }
 0x6e1   :  { %6478 = vmatpush1.bf16.msra.mxu1 %v9267_v51 }
 0x6e2   :  { %6479 = vmatprep.subr.bf16.mxu1 %v9272_v52 }
 0x6e5   :  { %6480 = vmatpush1.bf16.msra.mxu1 %v9270_v48 }
 0x6e6   :  { %6481 = vmatprep.subr.bf16.mxu1 %v9275_v53 }
 0x6e9   :  { %6482 = vmatpush1.bf16.msra.mxu1 %v9273_v55 }
 0x6ea   :  { %6483 = vmatprep.subr.bf16.mxu1 %v9278_v60 }
 0x6ed   :  { %6484 = vmatpush1.bf16.msra.mxu1 %v9276_v61 }
 0x6ee   :  { %6485 = vmatprep.subr.bf16.mxu1 %v9281_v62  ;;  %v9356_v62 = vld [vmem:[#allocation22 + $0x80] sm:$0xff]  }
 0x6f1   :  { %6486 = vmatpush1.bf16.msra.mxu1 %v9279_v63  ;;  %v9357_v63 = vld [vmem:[#allocation22 + $0xc8] sm:$0xff]  }
 0x6f2   :  { %6487 = vmatprep.subr.bf16.mxu1 %v9284_v0 }
 0x6f5   :  { %6488 = vmatpush1.bf16.msra.mxu1 %v9282_v30  ;;  %v9359_v30 = vld [vmem:[#allocation22 + $0xd0] sm:$0xff]  }
 0x6f6   :  { %6489 = vmatprep.subr.bf16.mxu1 %v9287_v2  ;;  %v9360_v2 = vld [vmem:[#allocation22 + $0x90] sm:$0xff]  }
 0x6f9   :  { %6490 = vmatpush1.bf16.msra.mxu1 %v9285_v41  ;;  %v9361_v41 = vld [vmem:[#allocation22 + $0xd8] sm:$0xff]  }
 0x6fa   :  { %6491 = vmatprep.subr.bf16.mxu1 %v9290_v3  ;;  %v9362_v3 = vld [vmem:[#allocation22 + $0x98] sm:$0xff]  }
 0x6fd   :  { %6492 = vmatpush1.bf16.msra.mxu1 %v9288_v46  ;;  %v9363_v46 = vld [vmem:[#allocation22 + $0xe0] sm:$0xff]  }
 0x6fe   :  { %6502 = vmatprep.subr.bf16.mxu1 %v9293_v4  ;;  %v9364_v4 = vld [vmem:[#allocation22 + $0xa0] sm:$0xff]  }
 0x700   :  { %6494 = vmatmul.mubr.bf16.vlgmr.msra.gmra.mrb[24].mxu1 %v10176_v25  ;;  %v9306_v25 = vld [vmem:[#allocation19 + $0x700] ss:$24 sps:$4 sm:$0xff]  }
 0x701   :  { %6503 = vmatpush1.bf16.msra.mxu1 %v9291_v5  ;;  %6534 = vmatprep.mubr.bf16.mxu1 %v10178_v27  ;;  %v9309_v27 = vld [vmem:[#allocation19 + $0x730] ss:$24 sps:$4 sm:$0xff]  }
 0x702   :  { %6504 = vmatprep.subr.bf16.mxu1 %v9296_v6  ;;  %v9365_v5 = vld [vmem:[#allocation22 + $0xe8] sm:$0xff]  }
 0x703   :  { %v9366_v6 = vld [vmem:[#allocation22 + $0xa8] sm:$0xff]  }
 0x705   :  { %6505 = vmatpush1.bf16.msra.mxu1 %v9294_v7  ;;  %v4715_v7 = vrot.slane %v10195_v32, %v10062_v12  ;;  %v9374_v12 = vld [vmem:[#allocation22 + $0x108] sm:$0xff]  }
 0x706   :  { %6506 = vmatprep.subr.bf16.mxu1 %v9299_v8  ;;  %v9367_v8 = vld [vmem:[#allocation22 + $0xf0] sm:$0xff]  }
 0x709   :  { %6507 = vmatpush1.bf16.msra.mxu1 %v9297_v9  ;;  %v9368_v9 = vld [vmem:[#allocation22 + $0xb0] sm:$0xff]  }
 0x70a   :  { %6508 = vmatprep.subr.bf16.mxu1 %v9302_v13 }
 0x70d   :  { %6509 = vmatpush1.bf16.msra.mxu1 %v9300_v14  ;;  %v9369_v14 = vld [vmem:[#allocation22 + $0xf8] sm:$0xff]  }
 0x70e   :  { %6510 = vmatprep.subr.bf16.mxu1 %v9305_v11  ;;  %v9370_v11 = vld [vmem:[#allocation22 + $0xb8] sm:$0xff]  }
 0x711   :  { %6511 = vmatpush1.bf16.msra.mxu1 %v9303_v10 }
 0x712   :  { %6512 = vmatprep.subr.bf16.mxu1 %v9308_v15  ;;  %v9371_v15 = vld [vmem:[#allocation22 + $0x140] sm:$0xff]  }
 0x715   :  { %6513 = vmatpush1.bf16.msra.mxu1 %v9306_v25  ;;  %v9372_v25 = vld [vmem:[#allocation22 + $0x100] sm:$0xff]  }
 0x716   :  { %6514 = vmatprep.subr.bf16.mxu1 %v9311_v54 }
 0x719   :  { %6515 = vmatpush1.bf16.msra.mxu1 %v9309_v27  ;;  %v9373_v27 = vld [vmem:[#allocation22 + $0x148] sm:$0xff]  }
 0x71a   :  { %6516 = vmatprep.subr.bf16.mxu1 %v9314_v16  ;;  %v9375_v16 = vld [vmem:[#allocation22 + $0x150] sm:$0xff]  }
 0x71d   :  { %6517 = vmatpush1.bf16.msra.mxu1 %v9312_v17  ;;  %v9376_v17 = vld [vmem:[#allocation22 + $0x110] sm:$0xff]  }
 0x71e   :  { %6518 = vmatprep.subr.bf16.mxu1 %v9317_v18  ;;  %v9377_v18 = vld [vmem:[#allocation22 + $0x158] sm:$0xff]  }
 0x721   :  { %6519 = vmatpush1.bf16.msra.mxu1 %v9315_v24  ;;  %v9378_v24 = vld [vmem:[#allocation22 + $0x118] sm:$0xff]  }
 0x722   :  { %6520 = vmatprep.subr.bf16.mxu1 %v9320_v22  ;;  %v9379_v22 = vld [vmem:[#allocation22 + $0x160] sm:$0xff]  }
 0x725   :  { %6521 = vmatpush1.bf16.msra.mxu1 %v9318_v26  ;;  %v9380_v26 = vld [vmem:[#allocation22 + $0x120] sm:$0xff]  }
 0x726   :  { %6522 = vmatprep.subr.bf16.mxu1 %v9323_v19  ;;  %v9381_v19 = vld [vmem:[#allocation22 + $0x168] sm:$0xff]  }
 0x729   :  { %6523 = vmatpush1.bf16.msra.mxu1 %v9321_v31  ;;  %v9382_v31 = vld [vmem:[#allocation22 + $0x128] sm:$0xff]  }
 0x72a   :  { %6524 = vmatprep.subr.bf16.mxu1 %v9326_v33  ;;  %v9383_v33 = vld [vmem:[#allocation22 + $0x170] sm:$0xff]  }
 0x72d   :  { %6525 = vmatpush1.bf16.msra.mxu1 %v9324_v29  ;;  %v9384_v29 = vld [vmem:[#allocation22 + $0x130] sm:$0xff]  }
 0x72e   :  { %6526 = vmatprep.subr.bf16.mxu1 %v9329_v56  ;;  %v9385_v56 = vld [vmem:[#allocation22 + $0x178] sm:$0xff]  }
 0x731   :  { %6527 = vmatpush1.bf16.msra.mxu1 %v9327_v1  ;;  %v9386_v1 = vld [vmem:[#allocation22 + $0x138] sm:$0xff]  }
 0x732   :  { %6528 = vmatprep.subr.bf16.mxu1 %v9332_v44  ;;  %v4723_v44 = vrot.slane %v10195_v32, %v10083_v40 }
 0x735   :  { %6529 = vmatpush1.bf16.msra.mxu1 %v9330_v36  ;;  %v4727_v36 = vrot.slane %v10195_v32, %v10067_v21 }
 0x736   :  { %6530 = vmatprep.subr.bf16.mxu1 %v9335_v37 }
 0x739   :  { %6531 = vmatpush1.bf16.msra.mxu1 %v9333_v38 }
 0x73a   :  { %6532 = vmatprep.subr.bf16.mxu1 %v9339_v20 }
 0x73d   :  { %6533 = vmatpush1.bf16.msra.mxu1 %v9337_v39 }
 0x740   :  { %6535 = vmatmul.mubr.bf16.vlgmr.msra.gmra.mrb[24].mxu1 %v10185_v58 }
 0x753   :  { %v6290_v43 = vpop.f32.mrb[20].mxu1 }
 0x754   :  { %v8031_v35 = vadd.f32 %v6290_v43, %v4707_v42  ;;  %v6413_v45 = vpop.f32.mrb[32].mxu0  ;;  %v6292_v47 = vpop.f32.mrb[21].mxu1 }
 0x755   :  { %v8032_v49 = vadd.f32 %v6292_v47, %v4711_v23  ;;  %v6415_v50 = vpop.f32.mrb[33].mxu0  ;;  %v6294_v51 = vpop.f32.mrb[22].mxu1  ;;  %v8033_v13 = vadd.f32 %v6413_v45, %v4715_v7 }
 0x756   :  { %v6543_v52 = vmax.f32 %v8031_v35, 0.0  ;;  %v8034_v58 = vadd.f32 %v6415_v50, %v4719_v28  ;;  %v6417_v48 = vpop.f32.mrb[34].mxu0  ;;  %v6295_v53 = vpop.f32.mrb[23].mxu1 }
 0x757   :  { %v6544_v55 = vmax.f32 %v8032_v49, 0.0  ;;  %v6418_v60 = vpop.f32.mrb[35].mxu0  ;;  %v6545_v10 = vmax.f32 %v8033_v13, 0.0 }
 0x758   :  { %v6546_v57 = vmax.f32 %v8034_v58, 0.0  ;;  %v6549_v59 = vpack.c.bf16 %v6543_v52, %v6543_v52  ;;  %v7908_v52 = vld [vmem:[#allocation23] ss:$0 sm:$0xff] }
 0x759   :  { %v6550_v61 = vpack.c.bf16 %v6544_v55, %v6544_v55  ;;  %v6551_v54 = vpack.c.bf16 %v6545_v10, %v6545_v10 }
 0x75a   :  { %v6552_v0 = vpack.c.bf16 %v6546_v57, %v6546_v57 }
 0x75b   :  { %6978 = vmatprep.mubr.bf16.mxu0 %v6550_v61 }
 0x75c   :  { %6979 = vmatmul.mubr.bf16.vlgmr.msra.gmra.mrb[36].mxu0 %v6549_v59 }
 0x75d   :  { %7980 = vmatpush3.bf16.msra.mxu0 %v9356_v62  ;;  %7018 = vmatprep.mubr.bf16.mxu0 %v6552_v0 }
 0x75e   :  { %7981 = vmatprep.subr.bf16.mxu0 %v9357_v63 }
 0x761   :  { %7982 = vmatpush3.bf16.msra.mxu0 %v9358_v34 }
 0x762   :  { %7983 = vmatprep.subr.bf16.mxu0 %v9359_v30 }
 0x765   :  { %7984 = vmatpush3.bf16.msra.mxu0 %v9360_v2 }
 0x766   :  { %7985 = vmatprep.subr.bf16.mxu0 %v9361_v41 }
 0x769   :  { %7986 = vmatpush3.bf16.msra.mxu0 %v9362_v3 }
 0x76a   :  { %7987 = vmatprep.subr.bf16.mxu0 %v9363_v46 }
 0x76d   :  { %7988 = vmatpush3.bf16.msra.mxu0 %v9364_v4 }
 0x76e   :  { %7989 = vmatprep.subr.bf16.mxu0 %v9365_v5 }
 0x771   :  { %7990 = vmatpush3.bf16.msra.mxu0 %v9366_v6 }
 0x772   :  { %7991 = vmatprep.subr.bf16.mxu0 %v9367_v8 }
 0x775   :  { %7992 = vmatpush3.bf16.msra.mxu0 %v9368_v9 }
 0x776   :  { %7993 = vmatprep.subr.bf16.mxu0 %v9369_v14 }
 0x779   :  { %7994 = vmatpush3.bf16.msra.mxu0 %v9370_v11 }
 0x77a   :  { %8001 = vmatprep.subr.bf16.mxu0 %v9371_v15 }
 0x77c   :  { %7019 = vmatmul.mubr.bf16.vlgmr.msra.gmra.mrb[40].mxu0 %v6551_v54 }
 0x77d   :  { %8002 = vmatpush3.bf16.msra.mxu0 %v9372_v25 }
 0x77e   :  { %8003 = vmatprep.subr.bf16.mxu0 %v9373_v27 }
 0x781   :  { %8004 = vmatpush3.bf16.msra.mxu0 %v9374_v12 }
 0x782   :  { %8005 = vmatprep.subr.bf16.mxu0 %v9375_v16 }
 0x785   :  { %8006 = vmatpush3.bf16.msra.mxu0 %v9376_v17 }
 0x786   :  { %8007 = vmatprep.subr.bf16.mxu0 %v9377_v18 }
 0x789   :  { %8008 = vmatpush3.bf16.msra.mxu0 %v9378_v24 }
 0x78a   :  { %8009 = vmatprep.subr.bf16.mxu0 %v9379_v22 }
 0x78d   :  { %8010 = vmatpush3.bf16.msra.mxu0 %v9380_v26 }
 0x78e   :  { %8011 = vmatprep.subr.bf16.mxu0 %v9381_v19 }
 0x791   :  { %8012 = vmatpush3.bf16.msra.mxu0 %v9382_v31 }
 0x792   :  { %8013 = vmatprep.subr.bf16.mxu0 %v9383_v33 }
 0x795   :  { %8014 = vmatpush3.bf16.msra.mxu0 %v9384_v29 }
 0x796   :  { %8015 = vmatprep.subr.bf16.mxu0 %v9385_v56 }
 0x799   :  { %8016 = vmatpush3.bf16.msra.mxu0 %v9386_v1 }
 0x813   :  { %v6536_v37 = vpop.f32.mrb[24].mxu1 }
 0x814   :  { %v8035_v38 = vadd.f32 %v6536_v37, %v4723_v44  ;;  %v6538_v20 = vpop.f32.mrb[25].mxu1 }
 0x815   :  { %v8036_v39 = vadd.f32 %v6538_v20, %v4727_v36  ;;  %v6540_v42 = vpop.f32.mrb[26].mxu1 }
 0x816   :  { %v6547_v23 = vmax.f32 %v8035_v38, 0.0  ;;  %v6541_v28 = vpop.f32.mrb[27].mxu1 }
 0x817   :  { %v6548_v43 = vmax.f32 %v8036_v39, 0.0 }
 0x818   :  { %v6553_v45 = vpack.c.bf16 %v6547_v23, %v6547_v23 }
 0x819   :  { %v6554_v35 = vpack.c.bf16 %v6548_v43, %v6548_v43 }
 0x81b   :  { %7058 = vmatprep.mubr.bf16.mxu0 %v6554_v35 }
 0x81c   :  { %7059 = vmatmul.mubr.bf16.vlgmr.msra.gmra.mrb[44].mxu0 %v6553_v45 }
 0x82f   :  { %v7973_v47 = vpop.f32.mrb[36].mxu0 }
 0x830   :  { %v7974_v49 = vpop.f32.mrb[37].mxu0 }
 0x831   :  { %v7975_v50 = vadd.f32 %v7974_v49, %v7973_v47  ;;  %v7976_v51 = vpop.f32.mrb[38].mxu0 }
 0x832   :  { %v7977_v40 = vpop.f32.mrb[39].mxu0 }
 0x833   :  { %v6981_v32 = vadd.f32 %v7975_v50, %v7908_v52 }
 0x84f   :  { %v7995_v58 = vpop.f32.mrb[40].mxu0 }
 0x850   :  { %v7996_v21 = vpop.f32.mrb[41].mxu0 }
 0x851   :  { %v7997_v48 = vadd.f32 %v7996_v21, %v7995_v58  ;;  %v7998_v53 = vpop.f32.mrb[42].mxu0 }
 0x852   :  { %v7999_v55 = vpop.f32.mrb[43].mxu0 }
 0x853   :  { %v7021_v60 = vadd.f32 %v7997_v48, %v6981_v32 }
 0x8ef   :  { %v8017_v57 = vpop.f32.mrb[44].mxu0 }
 0x8f0   :  { %v8018_v61 = vpop.f32.mrb[45].mxu0 }
 0x8f1   :  { %v8019_v62 = vadd.f32 %v8018_v61, %v8017_v57  ;;  %v8020_v59 = vpop.f32.mrb[46].mxu0 }
 0x8f2   :  { %v8021_v63 = vpop.f32.mrb[47].mxu0 }
 0x8f3   :  { %v7061_v0 = vadd.f32 %v8019_v62, %v7021_v60 }
 0x8f5   :  { %9389 = vtanh.f32 %v7061_v0 }
 0x8ff   :  { %v9390_v34 = vpop.eup %9389 }
 0x900   :  { %7067 = vst [vmem:[#allocation25] sm:$0xff] %v9390_v34 }
 0x901   :  { %9711 = shalt.err (!%p9708_p4)
}
 0x902   :  { %s9712_s7 = scalar_lea.hbm %s10235_s14, 384 }
 0x903   :  { %p9713_p5 = scmp.ne.s32.totalorder %s10235_s14, %s9712_s7  ;;  %p9716_p6 = scmp.lt.u32.totalorder %s9712_s7, %s10235_s14 }
 0x905   :  { %p9718_p7 = pnand %p9716_p6, %p9713_p5 }
 0x907   :  { %9721 = shalt.err (!%p9718_p7)
}
 0x908   :  { %7079 = dma.vmem_to_hbm [thread:$0]  %s7077_s4, 384, %s10235_s14, [#allocation4]  }
 0x909   :  { %9738 = dma.done.wait [#allocation4], 384  }
 0x90a   :  { %9739 = vsyncadd [#allocation4], 4294966912 }
 0x90b   :  { %7083 = vsyncpa [#allocation3], 1 }
 0x90c   :  { %7084 = vsyncpa [#allocation6], 1 }
 0x90d   :  { %7085 = vsyncpa [#allocation9], 1 }
 0x90e   :  { %7086 = vsyncpa [#allocation12], 1 }
 0x90f   :  { %7087 = vsyncpa [#allocation15], 1 }
 0x910   :  { %7088 = vsyncpa [#allocation18], 1 }
 0x911   :  { %7089 = vsyncpa [#allocation21], 1 }
 0x912   :  { %7090 = vsyncpa [#allocation24], 1 }
 0x913   :  { %7091 = vsyncpa [#allocation4], 1 }

</bundles_post_ra>
